<compile_context>
chip_gen: v6e
topology: v6e:2x2x1
jax: 0.10.0
libtpu: 0.0.40
codegen_flags: <defaults>
</compile_context>

<pallas_src>
import jax
import jax.numpy as jnp
from jax.experimental import pallas as pl
from jax.experimental.pallas import tpu as pltpu


def _round_up(v, m):
    return ((v + m - 1) // m) * m


# ------------------------------- kernel --------------------------------------


def _make_conv_kernel(*, stride, th, wq, relu, gated, has_res, compute_dtype):
    """Implicit-GEMM 3x3 conv kernel over stride-phase planes."""
    s = stride
    mt = th * wq  # rows of the matmul M-tile (th output rows x wq output cols)

    def kernel(*refs):
        it = iter(refs)
        x_ref = next(it)                       # (s*s, 1, hq*wq, cin)  f32 planes
        w_ref = next(it)                       # (9, cin, tn)          compute_dtype
        b_ref = next(it)                       # (1, tn)               f32
        gate_ref = next(it) if gated else None  # (1, tn)              f32
        res_ref = next(it) if has_res else None  # (1, mt, tn)         f32
        out_ref = next(it)                     # (1, mt, tn)           f32

        tn = out_ref.shape[-1]
        row0 = pl.program_id(2) * th

        acc = jnp.zeros((mt, tn), jnp.float32)
        for ky in range(3):
            for kx in range(3):
                plane = (ky % s) * s + (kx % s)
                off = (row0 + ky // s) * wq + (kx // s)
                lhs = x_ref[plane, 0, pl.ds(off, mt), :]     # (mt, cin) contiguous
                if lhs.dtype != compute_dtype:
                    lhs = lhs.astype(compute_dtype)
                acc = acc + jnp.dot(lhs, w_ref[ky * 3 + kx],
                                    preferred_element_type=jnp.float32)

        acc = acc + b_ref[...]                                # (1, tn) broadcast
        if has_res:
            acc = acc + res_ref[0]
        if gated:
            acc = jnp.where(gate_ref[...] > 0.5, jnp.maximum(acc, 0.0), acc)
        elif relu:
            acc = jnp.maximum(acc, 0.0)
        out_ref[0] = acc.astype(out_ref.dtype)

    return kernel


# ------------------------------ wrapper ---------------------------------------


def fold_conv_bn(w_oihw, conv_b, gamma, beta, mean, var, eps=1e-5):
    """Fold conv bias + BN running stats into the weights / a per-channel bias."""
    cout, cin, _, _ = w_oihw.shape
    scale = gamma / jnp.sqrt(var + eps)                       # (Cout,)
    bias = (conv_b - mean) * scale + beta                     # (Cout,)
    # (Cout,Cin,3,3) -> (ky,kx,Cin,Cout) -> (9,Cin,Cout), BN scale folded in.
    w = jnp.transpose(w_oihw, (2, 3, 1, 0)).reshape(9, cin, cout) * scale[None, None, :]
    return w, bias


def conv3x3_bn(x_nhwc, w_folded, bias, *, stride, relu=True, relu_gate=None,
               residual=None, compute_dtype=jnp.float32, target_rows=512):
    """Fused 3x3 conv (pad=1) + folded BN [+ residual] [+ ReLU / gated ReLU]."""
    n, h, w_in, cin = x_nhwc.shape
    cout = w_folded.shape[-1]
    s = int(stride)

    hout = (h + 2 - 3) // s + 1
    wout = (w_in + 2 - 3) // s + 1
    dy_max = 2 // s                       # max row offset inside a phase plane
    dx_max = 2 // s

    # --- tiling ---------------------------------------------------------------
    cout_p = _round_up(cout, 128)                     # lane-dense output channels
    tn = 256 if cout_p % 256 == 0 else 128            # Cout tile
    wq = _round_up(max((w_in + 2 + s - 1) // s, wout + dx_max), 8)  # plane width
    th = max(1, min(hout, max(1, target_rows // wq)))  # output rows per M-tile
    n_ht = -(-hout // th)
    hout_p = n_ht * th
    hq = hout_p + dy_max + 1                          # plane rows (+1 wrap slack)
    mt = th * wq

    # --- stride-phase decomposition of the padded activation (single copy) ----
    xp = jnp.pad(x_nhwc.astype(jnp.float32),
                 ((0, 0), (1, s * hq - h - 1), (1, s * wq - w_in - 1), (0, 0)))
    planes = xp.reshape(n, hq, s, wq, s, cin).transpose(2, 4, 0, 1, 3, 5)
    planes = planes.reshape(s * s, n, hq * wq, cin)

    # --- parameters (Cout padded to lane-dense width) --------------------------
    w_p = jnp.pad(w_folded, ((0, 0), (0, 0), (0, cout_p - cout))).astype(compute_dtype)
    b_p = jnp.pad(bias, (0, cout_p - cout)).reshape(1, cout_p).astype(jnp.float32)

    gated = relu_gate is not None
    has_res = residual is not None

    inputs = [planes, w_p, b_p]
    in_specs = [
        pl.BlockSpec((s * s, 1, hq * wq, cin), lambda nb, jb, ib: (0, nb, 0, 0)),
        pl.BlockSpec((9, cin, tn), lambda nb, jb, ib: (0, 0, jb)),
        pl.BlockSpec((1, tn), lambda nb, jb, ib: (0, jb)),
    ]
    if gated:
        g_p = jnp.pad(relu_gate.astype(jnp.float32), (0, cout_p - cout)).reshape(1, cout_p)
        inputs.append(g_p)
        in_specs.append(pl.BlockSpec((1, tn), lambda nb, jb, ib: (0, jb)))
    if has_res:
        res = jnp.pad(residual.astype(jnp.float32),
                      ((0, 0), (0, hout_p - hout), (0, wq - wout), (0, cout_p - cout)))
        res = res.reshape(n, hout_p * wq, cout_p)
        inputs.append(res)
        in_specs.append(pl.BlockSpec((1, mt, tn), lambda nb, jb, ib: (nb, ib, jb)))

    kernel = _make_conv_kernel(stride=s, th=th, wq=wq, relu=relu, gated=gated,
                               has_res=has_res, compute_dtype=compute_dtype)

    out = pl.pallas_call(
        kernel,
        out_shape=jax.ShapeDtypeStruct((n, hout_p * wq, cout_p), jnp.float32),
        grid_spec=pltpu.PrefetchScalarGridSpec(
            num_scalar_prefetch=0,
            grid=(n, cout_p // tn, n_ht),
            in_specs=in_specs,
            out_specs=pl.BlockSpec((1, mt, tn), lambda nb, jb, ib: (nb, ib, jb)),
        ),
        compiler_params=pltpu.CompilerParams(
            dimension_semantics=("parallel", "parallel", "parallel"),
            vmem_limit_bytes=48 * 1024 * 1024),
    )(*inputs)

    out = out.reshape(n, hout_p, wq, cout_p)
    return out[:, :hout, :wout, :cout]


# ----------------------------- FasterBlock ------------------------------------


def init_faster_block_params(key, in_channels, out_channels, stride):
    ks = jax.random.split(key, 20)

    def conv_bn(i, cin, cout):
        return dict(
            w=0.1 * jax.random.normal(ks[i + 0], (cout, cin, 3, 3), jnp.float32),
            b=0.1 * jax.random.normal(ks[i + 1], (cout,), jnp.float32),
            gamma=1.0 + 0.1 * jax.random.normal(ks[i + 2], (cout,), jnp.float32),
            beta=0.1 * jax.random.normal(ks[i + 3], (cout,), jnp.float32),
            mean=0.1 * jax.random.normal(ks[i + 4], (cout,), jnp.float32),
            var=1.0 + 0.1 * jnp.abs(jax.random.normal(ks[i + 5], (cout,), jnp.float32)),
        )

    params = dict(
        conv1=conv_bn(0, in_channels, out_channels),
        conv2=conv_bn(6, out_channels, out_channels),
    )
    if stride > 1:
        params["down"] = conv_bn(12, in_channels, out_channels)
    return params


def faster_block_forward(params, x_nchw, stride, compute_dtype=jnp.bfloat16):
    x = jnp.transpose(x_nchw, (0, 2, 3, 1))  # NCHW -> NHWC

    p1, p2 = params["conv1"], params["conv2"]
    w1, b1 = fold_conv_bn(p1["w"], p1["b"], p1["gamma"], p1["beta"],
                          p1["mean"], p1["var"])

    if stride > 1:
        # Fuse conv1 and the downsample conv into a single pallas_call:
        # concatenate weights along Cout; per-channel gate applies ReLU only
        # to the conv1 half.
        pd = params["down"]
        wd, bd = fold_conv_bn(pd["w"], pd["b"], pd["gamma"], pd["beta"],
                              pd["mean"], pd["var"])
        cout = w1.shape[-1]
        w_cat = jnp.concatenate([w1, wd], axis=-1)
        b_cat = jnp.concatenate([b1, bd], axis=-1)
        gate = jnp.concatenate([jnp.ones((cout,), jnp.float32),
                                jnp.zeros((cout,), jnp.float32)])
        both = conv3x3_bn(x, w_cat, b_cat, stride=stride, relu_gate=gate,
                          compute_dtype=compute_dtype)
        out = both[..., :cout]
        identity = both[..., cout:]
    else:
        # TODO(synk): PyTorch forward would raise AttributeError for stride==1
        # (self._downsample never created); we use a plain identity instead.
        out = conv3x3_bn(x, w1, b1, stride=stride, relu=True,
                         compute_dtype=compute_dtype)
        identity = x

    w2, b2 = fold_conv_bn(p2["w"], p2["b"], p2["gamma"], p2["beta"],
                          p2["mean"], p2["var"])
    out = conv3x3_bn(out, w2, b2, stride=1, relu=True, residual=identity,
                     compute_dtype=compute_dtype)

    return jnp.transpose(out, (0, 3, 1, 2))  # NHWC -> NCHW


# -------------------------- pure-JAX reference --------------------------------


def _ref_conv_bn(x_nhwc, w, b, g, be, m, v, stride, relu, residual=None, eps=1e-5):
    y = jax.lax.conv_general_dilated(
        x_nhwc, jnp.transpose(w, (2, 3, 1, 0)),
        window_strides=(stride, stride), padding=((1, 1), (1, 1)),
        dimension_numbers=("NHWC", "HWIO", "NHWC"))
    y = (y + b - m) / jnp.sqrt(v + eps) * g + be
    if residual is not None:
        y = y + residual
    if relu:
        y = jnp.maximum(y, 0.0)
    return y


def _ref_forward(params, x_nchw, stride):
    x = jnp.transpose(x_nchw, (0, 2, 3, 1))
    p1, p2 = params["conv1"], params["conv2"]
    out = _ref_conv_bn(x, p1["w"], p1["b"], p1["gamma"], p1["beta"],
                       p1["mean"], p1["var"], stride, True)
    if stride > 1:
        pd = params["down"]
        identity = _ref_conv_bn(x, pd["w"], pd["b"], pd["gamma"], pd["beta"],
                                pd["mean"], pd["var"], stride, False)
    else:
        identity = x
    out = _ref_conv_bn(out, p2["w"], p2["b"], p2["gamma"], p2["beta"],
                       p2["mean"], p2["var"], 1, True, residual=identity)
    return jnp.transpose(out, (0, 3, 1, 2))


# --------------------------------- main ---------------------------------------


if __name__ == "__main__":
    key = jax.random.PRNGKey(0)
    k_x, k_p = jax.random.split(key)

    in_channels, out_channels, stride = 4, 8, 2
    x = jax.random.normal(k_x, (2, in_channels, 16, 16), jnp.float32)  # NCHW
    params = init_faster_block_params(k_p, in_channels, out_channels, stride)

    fwd = jax.jit(faster_block_forward, static_argnames=("stride", "compute_dtype"))

    y_ref = jax.block_until_ready(_ref_forward(params, x, stride))

    # Exact path: f32 MXU inputs -> tight tolerance vs the pure-JAX reference.
    y32 = jax.block_until_ready(fwd(params, x, stride=stride,
                                    compute_dtype=jnp.float32))
    assert y32.shape == (2, out_channels, 8, 8), y32.shape
    assert jnp.allclose(y32, y_ref, atol=1e-4, rtol=1e-4), "f32 mismatch vs reference"

    # Fast path: bf16 MXU inputs, f32 accumulate/epilogue -> loose tolerance.
    ybf = jax.block_until_ready(fwd(params, x, stride=stride,
                                    compute_dtype=jnp.bfloat16))
    rel_err = jnp.max(jnp.abs(ybf - y_ref)) / (jnp.max(jnp.abs(y_ref)) + 1e-6)
    assert float(rel_err) < 5e-2, f"bf16 mismatch vs reference (rel_err={rel_err})"

    print("KERNEL_OK")
</pallas_src>

<mosaic_0001>
module attributes {stable_mosaic.version = 11 : i64} {
  func.func @kernel(%arg0: i32, %arg1: i32, %arg2: i32, %arg3: memref<4x1x160x4xf32, #tpu.memory_space<vmem>>, %arg4: memref<9x4x128xf32, #tpu.memory_space<vmem>>, %arg5: memref<1x128xf32, #tpu.memory_space<vmem>>, %arg6: memref<1x128xf32, #tpu.memory_space<vmem>>, %arg7: memref<1x128x128xf32, #tpu.memory_space<vmem>>) attributes {dimension_semantics = [#tpu.dimension_semantics<parallel>, #tpu.dimension_semantics<parallel>, #tpu.dimension_semantics<parallel>], iteration_bounds = array<i64: 2, 1, 1>, scalar_prefetch = 0 : i64, scratch_operands = 0 : i64, tpu.core_type = #tpu.core_type<tc>, window_params = [{transform_indices = @transform_0, window_bounds = array<i64: 4, 1, 160, 4>}, {transform_indices = @transform_1, window_bounds = array<i64: 9, 4, 128>}, {transform_indices = @transform_2, window_bounds = array<i64: 1, 128>}, {transform_indices = @transform_3, window_bounds = array<i64: 1, 128>}, {transform_indices = @transform_4, window_bounds = array<i64: 1, 128, 128>}]} {
    %c8_i32 = arith.constant 8 : i32
    %0 = arith.muli %arg2, %c8_i32 : i32
    %cst = arith.constant 0.000000e+00 : f32
    %1 = vector.broadcast %cst : f32 to vector<128x128xf32>
    %c0_i32 = arith.constant 0 : i32
    %2 = arith.addi %0, %c0_i32 : i32
    %c16_i32 = arith.constant 16 : i32
    %3 = arith.muli %2, %c16_i32 : i32
    %c0_i32_0 = arith.constant 0 : i32
    %4 = arith.addi %3, %c0_i32_0 : i32
    %c0 = arith.constant 0 : index
    %c0_1 = arith.constant 0 : index
    %5 = arith.index_cast %4 : i32 to index
    %c0_2 = arith.constant 0 : index
    %6 = vector.load %arg3[%c0, %c0_1, %5, %c0_2] : memref<4x1x160x4xf32, #tpu.memory_space<vmem>>, vector<1x1x128x4xf32>
    %7 = vector.shape_cast %6 : vector<1x1x128x4xf32> to vector<128x4xf32>
    %c0_3 = arith.constant 0 : index
    %c0_4 = arith.constant 0 : index
    %c0_5 = arith.constant 0 : index
    %8 = vector.load %arg4[%c0_3, %c0_4, %c0_5] : memref<9x4x128xf32, #tpu.memory_space<vmem>>, vector<1x4x128xf32>
    %9 = vector.shape_cast %8 : vector<1x4x128xf32> to vector<4x128xf32>
    %cst_6 = arith.constant dense<0.000000e+00> : vector<128x128xf32>
    %10 = tpu.matmul %7, %9, %cst_6 {dimension_numbers = #tpu.dot_dimension_numbers<[1], [0], [0], [1], [0, 0, 1, 1], [], []>} : vector<128x4xf32>, vector<4x128xf32>, vector<128x128xf32> -> vector<128x128xf32>
    %11 = arith.addf %1, %10 : vector<128x128xf32>
    %c0_i32_7 = arith.constant 0 : i32
    %12 = arith.addi %0, %c0_i32_7 : i32
    %c16_i32_8 = arith.constant 16 : i32
    %13 = arith.muli %12, %c16_i32_8 : i32
    %c0_i32_9 = arith.constant 0 : i32
    %14 = arith.addi %13, %c0_i32_9 : i32
    %c1 = arith.constant 1 : index
    %c0_10 = arith.constant 0 : index
    %15 = arith.index_cast %14 : i32 to index
    %c0_11 = arith.constant 0 : index
    %16 = vector.load %arg3[%c1, %c0_10, %15, %c0_11] : memref<4x1x160x4xf32, #tpu.memory_space<vmem>>, vector<1x1x128x4xf32>
    %17 = vector.shape_cast %16 : vector<1x1x128x4xf32> to vector<128x4xf32>
    %c1_12 = arith.constant 1 : index
    %c0_13 = arith.constant 0 : index
    %c0_14 = arith.constant 0 : index
    %18 = vector.load %arg4[%c1_12, %c0_13, %c0_14] : memref<9x4x128xf32, #tpu.memory_space<vmem>>, vector<1x4x128xf32>
    %19 = vector.shape_cast %18 : vector<1x4x128xf32> to vector<4x128xf32>
    %cst_15 = arith.constant dense<0.000000e+00> : vector<128x128xf32>
    %20 = tpu.matmul %17, %19, %cst_15 {dimension_numbers = #tpu.dot_dimension_numbers<[1], [0], [0], [1], [0, 0, 1, 1], [], []>} : vector<128x4xf32>, vector<4x128xf32>, vector<128x128xf32> -> vector<128x128xf32>
    %21 = arith.addf %11, %20 : vector<128x128xf32>
    %c0_i32_16 = arith.constant 0 : i32
    %22 = arith.addi %0, %c0_i32_16 : i32
    %c16_i32_17 = arith.constant 16 : i32
    %23 = arith.muli %22, %c16_i32_17 : i32
    %c1_i32 = arith.constant 1 : i32
    %24 = arith.addi %23, %c1_i32 : i32
    %c0_18 = arith.constant 0 : index
    %c0_19 = arith.constant 0 : index
    %25 = arith.index_cast %24 : i32 to index
    %c0_20 = arith.constant 0 : index
    %26 = vector.load %arg3[%c0_18, %c0_19, %25, %c0_20] : memref<4x1x160x4xf32, #tpu.memory_space<vmem>>, vector<1x1x128x4xf32>
    %27 = vector.shape_cast %26 : vector<1x1x128x4xf32> to vector<128x4xf32>
    %c2 = arith.constant 2 : index
    %c0_21 = arith.constant 0 : index
    %c0_22 = arith.constant 0 : index
    %28 = vector.load %arg4[%c2, %c0_21, %c0_22] : memref<9x4x128xf32, #tpu.memory_space<vmem>>, vector<1x4x128xf32>
    %29 = vector.shape_cast %28 : vector<1x4x128xf32> to vector<4x128xf32>
    %cst_23 = arith.constant dense<0.000000e+00> : vector<128x128xf32>
    %30 = tpu.matmul %27, %29, %cst_23 {dimension_numbers = #tpu.dot_dimension_numbers<[1], [0], [0], [1], [0, 0, 1, 1], [], []>} : vector<128x4xf32>, vector<4x128xf32>, vector<128x128xf32> -> vector<128x128xf32>
    %31 = arith.addf %21, %30 : vector<128x128xf32>
    %c0_i32_24 = arith.constant 0 : i32
    %32 = arith.addi %0, %c0_i32_24 : i32
    %c16_i32_25 = arith.constant 16 : i32
    %33 = arith.muli %32, %c16_i32_25 : i32
    %c0_i32_26 = arith.constant 0 : i32
    %34 = arith.addi %33, %c0_i32_26 : i32
    %c2_27 = arith.constant 2 : index
    %c0_28 = arith.constant 0 : index
    %35 = arith.index_cast %34 : i32 to index
    %c0_29 = arith.constant 0 : index
    %36 = vector.load %arg3[%c2_27, %c0_28, %35, %c0_29] : memref<4x1x160x4xf32, #tpu.memory_space<vmem>>, vector<1x1x128x4xf32>
    %37 = vector.shape_cast %36 : vector<1x1x128x4xf32> to vector<128x4xf32>
    %c3 = arith.constant 3 : index
    %c0_30 = arith.constant 0 : index
    %c0_31 = arith.constant 0 : index
    %38 = vector.load %arg4[%c3, %c0_30, %c0_31] : memref<9x4x128xf32, #tpu.memory_space<vmem>>, vector<1x4x128xf32>
    %39 = vector.shape_cast %38 : vector<1x4x128xf32> to vector<4x128xf32>
    %cst_32 = arith.constant dense<0.000000e+00> : vector<128x128xf32>
    %40 = tpu.matmul %37, %39, %cst_32 {dimension_numbers = #tpu.dot_dimension_numbers<[1], [0], [0], [1], [0, 0, 1, 1], [], []>} : vector<128x4xf32>, vector<4x128xf32>, vector<128x128xf32> -> vector<128x128xf32>
    %41 = arith.addf %31, %40 : vector<128x128xf32>
    %c0_i32_33 = arith.constant 0 : i32
    %42 = arith.addi %0, %c0_i32_33 : i32
    %c16_i32_34 = arith.constant 16 : i32
    %43 = arith.muli %42, %c16_i32_34 : i32
    %c0_i32_35 = arith.constant 0 : i32
    %44 = arith.addi %43, %c0_i32_35 : i32
    %c3_36 = arith.constant 3 : index
    %c0_37 = arith.constant 0 : index
    %45 = arith.index_cast %44 : i32 to index
    %c0_38 = arith.constant 0 : index
    %46 = vector.load %arg3[%c3_36, %c0_37, %45, %c0_38] : memref<4x1x160x4xf32, #tpu.memory_space<vmem>>, vector<1x1x128x4xf32>
    %47 = vector.shape_cast %46 : vector<1x1x128x4xf32> to vector<128x4xf32>
    %c4 = arith.constant 4 : index
    %c0_39 = arith.constant 0 : index
    %c0_40 = arith.constant 0 : index
    %48 = vector.load %arg4[%c4, %c0_39, %c0_40] : memref<9x4x128xf32, #tpu.memory_space<vmem>>, vector<1x4x128xf32>
    %49 = vector.shape_cast %48 : vector<1x4x128xf32> to vector<4x128xf32>
    %cst_41 = arith.constant dense<0.000000e+00> : vector<128x128xf32>
    %50 = tpu.matmul %47, %49, %cst_41 {dimension_numbers = #tpu.dot_dimension_numbers<[1], [0], [0], [1], [0, 0, 1, 1], [], []>} : vector<128x4xf32>, vector<4x128xf32>, vector<128x128xf32> -> vector<128x128xf32>
    %51 = arith.addf %41, %50 : vector<128x128xf32>
    %c0_i32_42 = arith.constant 0 : i32
    %52 = arith.addi %0, %c0_i32_42 : i32
    %c16_i32_43 = arith.constant 16 : i32
    %53 = arith.muli %52, %c16_i32_43 : i32
    %c1_i32_44 = arith.constant 1 : i32
    %54 = arith.addi %53, %c1_i32_44 : i32
    %c2_45 = arith.constant 2 : index
    %c0_46 = arith.constant 0 : index
    %55 = arith.index_cast %54 : i32 to index
    %c0_47 = arith.constant 0 : index
    %56 = vector.load %arg3[%c2_45, %c0_46, %55, %c0_47] : memref<4x1x160x4xf32, #tpu.memory_space<vmem>>, vector<1x1x128x4xf32>
    %57 = vector.shape_cast %56 : vector<1x1x128x4xf32> to vector<128x4xf32>
    %c5 = arith.constant 5 : index
    %c0_48 = arith.constant 0 : index
    %c0_49 = arith.constant 0 : index
    %58 = vector.load %arg4[%c5, %c0_48, %c0_49] : memref<9x4x128xf32, #tpu.memory_space<vmem>>, vector<1x4x128xf32>
    %59 = vector.shape_cast %58 : vector<1x4x128xf32> to vector<4x128xf32>
    %cst_50 = arith.constant dense<0.000000e+00> : vector<128x128xf32>
    %60 = tpu.matmul %57, %59, %cst_50 {dimension_numbers = #tpu.dot_dimension_numbers<[1], [0], [0], [1], [0, 0, 1, 1], [], []>} : vector<128x4xf32>, vector<4x128xf32>, vector<128x128xf32> -> vector<128x128xf32>
    %61 = arith.addf %51, %60 : vector<128x128xf32>
    %c1_i32_51 = arith.constant 1 : i32
    %62 = arith.addi %0, %c1_i32_51 : i32
    %c16_i32_52 = arith.constant 16 : i32
    %63 = arith.muli %62, %c16_i32_52 : i32
    %c0_i32_53 = arith.constant 0 : i32
    %64 = arith.addi %63, %c0_i32_53 : i32
    %c0_54 = arith.constant 0 : index
    %c0_55 = arith.constant 0 : index
    %65 = arith.index_cast %64 : i32 to index
    %c0_56 = arith.constant 0 : index
    %66 = vector.load %arg3[%c0_54, %c0_55, %65, %c0_56] : memref<4x1x160x4xf32, #tpu.memory_space<vmem>>, vector<1x1x128x4xf32>
    %67 = vector.shape_cast %66 : vector<1x1x128x4xf32> to vector<128x4xf32>
    %c6 = arith.constant 6 : index
    %c0_57 = arith.constant 0 : index
    %c0_58 = arith.constant 0 : index
    %68 = vector.load %arg4[%c6, %c0_57, %c0_58] : memref<9x4x128xf32, #tpu.memory_space<vmem>>, vector<1x4x128xf32>
    %69 = vector.shape_cast %68 : vector<1x4x128xf32> to vector<4x128xf32>
    %cst_59 = arith.constant dense<0.000000e+00> : vector<128x128xf32>
    %70 = tpu.matmul %67, %69, %cst_59 {dimension_numbers = #tpu.dot_dimension_numbers<[1], [0], [0], [1], [0, 0, 1, 1], [], []>} : vector<128x4xf32>, vector<4x128xf32>, vector<128x128xf32> -> vector<128x128xf32>
    %71 = arith.addf %61, %70 : vector<128x128xf32>
    %c1_i32_60 = arith.constant 1 : i32
    %72 = arith.addi %0, %c1_i32_60 : i32
    %c16_i32_61 = arith.constant 16 : i32
    %73 = arith.muli %72, %c16_i32_61 : i32
    %c0_i32_62 = arith.constant 0 : i32
    %74 = arith.addi %73, %c0_i32_62 : i32
    %c1_63 = arith.constant 1 : index
    %c0_64 = arith.constant 0 : index
    %75 = arith.index_cast %74 : i32 to index
    %c0_65 = arith.constant 0 : index
    %76 = vector.load %arg3[%c1_63, %c0_64, %75, %c0_65] : memref<4x1x160x4xf32, #tpu.memory_space<vmem>>, vector<1x1x128x4xf32>
    %77 = vector.shape_cast %76 : vector<1x1x128x4xf32> to vector<128x4xf32>
    %c7 = arith.constant 7 : index
    %c0_66 = arith.constant 0 : index
    %c0_67 = arith.constant 0 : index
    %78 = vector.load %arg4[%c7, %c0_66, %c0_67] : memref<9x4x128xf32, #tpu.memory_space<vmem>>, vector<1x4x128xf32>
    %79 = vector.shape_cast %78 : vector<1x4x128xf32> to vector<4x128xf32>
    %cst_68 = arith.constant dense<0.000000e+00> : vector<128x128xf32>
    %80 = tpu.matmul %77, %79, %cst_68 {dimension_numbers = #tpu.dot_dimension_numbers<[1], [0], [0], [1], [0, 0, 1, 1], [], []>} : vector<128x4xf32>, vector<4x128xf32>, vector<128x128xf32> -> vector<128x128xf32>
    %81 = arith.addf %71, %80 : vector<128x128xf32>
    %c1_i32_69 = arith.constant 1 : i32
    %82 = arith.addi %0, %c1_i32_69 : i32
    %c16_i32_70 = arith.constant 16 : i32
    %83 = arith.muli %82, %c16_i32_70 : i32
    %c1_i32_71 = arith.constant 1 : i32
    %84 = arith.addi %83, %c1_i32_71 : i32
    %c0_72 = arith.constant 0 : index
    %c0_73 = arith.constant 0 : index
    %85 = arith.index_cast %84 : i32 to index
    %c0_74 = arith.constant 0 : index
    %86 = vector.load %arg3[%c0_72, %c0_73, %85, %c0_74] : memref<4x1x160x4xf32, #tpu.memory_space<vmem>>, vector<1x1x128x4xf32>
    %87 = vector.shape_cast %86 : vector<1x1x128x4xf32> to vector<128x4xf32>
    %c8 = arith.constant 8 : index
    %c0_75 = arith.constant 0 : index
    %c0_76 = arith.constant 0 : index
    %88 = vector.load %arg4[%c8, %c0_75, %c0_76] : memref<9x4x128xf32, #tpu.memory_space<vmem>>, vector<1x4x128xf32>
    %89 = vector.shape_cast %88 : vector<1x4x128xf32> to vector<4x128xf32>
    %cst_77 = arith.constant dense<0.000000e+00> : vector<128x128xf32>
    %90 = tpu.matmul %87, %89, %cst_77 {dimension_numbers = #tpu.dot_dimension_numbers<[1], [0], [0], [1], [0, 0, 1, 1], [], []>} : vector<128x4xf32>, vector<4x128xf32>, vector<128x128xf32> -> vector<128x128xf32>
    %91 = arith.addf %81, %90 : vector<128x128xf32>
    %c0_78 = arith.constant 0 : index
    %c0_79 = arith.constant 0 : index
    %92 = vector.load %arg5[%c0_78, %c0_79] : memref<1x128xf32, #tpu.memory_space<vmem>>, vector<1x128xf32>
    %93 = vector.broadcast %92 : vector<1x128xf32> to vector<128x128xf32>
    %94 = arith.addf %91, %93 : vector<128x128xf32>
    %c0_80 = arith.constant 0 : index
    %c0_81 = arith.constant 0 : index
    %95 = vector.load %arg6[%c0_80, %c0_81] : memref<1x128xf32, #tpu.memory_space<vmem>>, vector<1x128xf32>
    %cst_82 = arith.constant 5.000000e-01 : f32
    %96 = vector.broadcast %cst_82 : f32 to vector<1x128xf32>
    %97 = arith.cmpf ogt, %95, %96 : vector<1x128xf32>
    %cst_83 = arith.constant 0.000000e+00 : f32
    %98 = vector.broadcast %cst_83 : f32 to vector<128x128xf32>
    %99 = arith.maximumf %94, %98 : vector<128x128xf32>
    %100 = vector.shape_cast %97 : vector<1x128xi1> to vector<1x128xi1>
    %101 = vector.broadcast %100 : vector<1x128xi1> to vector<128x128xi1>
    %102 = arith.select %101, %99, %94 : vector<128x128xi1>, vector<128x128xf32>
    %c0_84 = arith.constant 0 : index
    %c0_85 = arith.constant 0 : index
    %c0_86 = arith.constant 0 : index
    %103 = vector.load %arg7[%c0_84, %c0_85, %c0_86] : memref<1x128x128xf32, #tpu.memory_space<vmem>>, vector<1x128x128xf32>
    %104 = vector.shape_cast %103 : vector<1x128x128xf32> to vector<128x128xf32>
    %105 = vector.shape_cast %102 : vector<128x128xf32> to vector<1x128x128xf32>
    tpu.vector_store %arg7[%c0_84, %c0_85, %c0_86], %105 {strides = array<i32>} : memref<1x128x128xf32, #tpu.memory_space<vmem>>, vector<1x128x128xf32>,
    return
  }
  func.func @transform_0(%arg0: i32, %arg1: i32, %arg2: i32) -> (i32, i32, i32, i32) {
    %c0_i32 = arith.constant 0 : i32
    %c0_i32_0 = arith.constant 0 : i32
    %c0_i32_1 = arith.constant 0 : i32
    %c0_i32_2 = arith.constant 0 : i32
    return %c0_i32, %arg0, %c0_i32_0, %c0_i32_1 : i32, i32, i32, i32
  }
  func.func @transform_1(%arg0: i32, %arg1: i32, %arg2: i32) -> (i32, i32, i32) {
    %c0_i32 = arith.constant 0 : i32
    %c0_i32_0 = arith.constant 0 : i32
    %c0_i32_1 = arith.constant 0 : i32
    return %c0_i32, %c0_i32_0, %arg1 : i32, i32, i32
  }
  func.func @transform_2(%arg0: i32, %arg1: i32, %arg2: i32) -> (i32, i32) {
    %c0_i32 = arith.constant 0 : i32
    %c0_i32_0 = arith.constant 0 : i32
    return %c0_i32, %arg1 : i32, i32
  }
  func.func @transform_3(%arg0: i32, %arg1: i32, %arg2: i32) -> (i32, i32) {
    %c0_i32 = arith.constant 0 : i32
    %c0_i32_0 = arith.constant 0 : i32
    return %c0_i32, %arg1 : i32, i32
  }
  func.func @transform_4(%arg0: i32, %arg1: i32, %arg2: i32) -> (i32, i32, i32) {
    %c0_i32 = arith.constant 0 : i32
    return %arg0, %arg2, %arg1 : i32, i32, i32
  }
}

module attributes {stable_mosaic.version = 11 : i64} {
  func.func @kernel(%arg0: i32, %arg1: i32, %arg2: i32, %arg3: memref<1x1x176x8xf32, #tpu.memory_space<vmem>>, %arg4: memref<9x8x128xf32, #tpu.memory_space<vmem>>, %arg5: memref<1x128xf32, #tpu.memory_space<vmem>>, %arg6: memref<1x128x128xf32, #tpu.memory_space<vmem>>, %arg7: memref<1x128x128xf32, #tpu.memory_space<vmem>>) attributes {dimension_semantics = [#tpu.dimension_semantics<parallel>, #tpu.dimension_semantics<parallel>, #tpu.dimension_semantics<parallel>], iteration_bounds = array<i64: 2, 1, 1>, scalar_prefetch = 0 : i64, scratch_operands = 0 : i64, tpu.core_type = #tpu.core_type<tc>, window_params = [{transform_indices = @transform_0, window_bounds = array<i64: 1, 1, 176, 8>}, {transform_indices = @transform_1, window_bounds = array<i64: 9, 8, 128>}, {transform_indices = @transform_2, window_bounds = array<i64: 1, 128>}, {transform_indices = @transform_3, window_bounds = array<i64: 1, 128, 128>}, {transform_indices = @transform_4, window_bounds = array<i64: 1, 128, 128>}]} {
    %c8_i32 = arith.constant 8 : i32
    %0 = arith.muli %arg2, %c8_i32 : i32
    %cst = arith.constant 0.000000e+00 : f32
    %1 = vector.broadcast %cst : f32 to vector<128x128xf32>
    %c0_i32 = arith.constant 0 : i32
    %2 = arith.addi %0, %c0_i32 : i32
    %c16_i32 = arith.constant 16 : i32
    %3 = arith.muli %2, %c16_i32 : i32
    %c0_i32_0 = arith.constant 0 : i32
    %4 = arith.addi %3, %c0_i32_0 : i32
    %c0 = arith.constant 0 : index
    %c0_1 = arith.constant 0 : index
    %5 = arith.index_cast %4 : i32 to index
    %c0_2 = arith.constant 0 : index
    %6 = vector.load %arg3[%c0, %c0_1, %5, %c0_2] : memref<1x1x176x8xf32, #tpu.memory_space<vmem>>, vector<1x1x128x8xf32>
    %7 = vector.shape_cast %6 : vector<1x1x128x8xf32> to vector<128x8xf32>
    %c0_3 = arith.constant 0 : index
    %c0_4 = arith.constant 0 : index
    %c0_5 = arith.constant 0 : index
    %8 = vector.load %arg4[%c0_3, %c0_4, %c0_5] : memref<9x8x128xf32, #tpu.memory_space<vmem>>, vector<1x8x128xf32>
    %9 = vector.shape_cast %8 : vector<1x8x128xf32> to vector<8x128xf32>
    %cst_6 = arith.constant dense<0.000000e+00> : vector<128x128xf32>
    %10 = tpu.matmul %7, %9, %cst_6 {dimension_numbers = #tpu.dot_dimension_numbers<[1], [0], [0], [1], [0, 0, 1, 1], [], []>} : vector<128x8xf32>, vector<8x128xf32>, vector<128x128xf32> -> vector<128x128xf32>
    %11 = arith.addf %1, %10 : vector<128x128xf32>
    %c0_i32_7 = arith.constant 0 : i32
    %12 = arith.addi %0, %c0_i32_7 : i32
    %c16_i32_8 = arith.constant 16 : i32
    %13 = arith.muli %12, %c16_i32_8 : i32
    %c1_i32 = arith.constant 1 : i32
    %14 = arith.addi %13, %c1_i32 : i32
    %c0_9 = arith.constant 0 : index
    %c0_10 = arith.constant 0 : index
    %15 = arith.index_cast %14 : i32 to index
    %c0_11 = arith.constant 0 : index
    %16 = vector.load %arg3[%c0_9, %c0_10, %15, %c0_11] : memref<1x1x176x8xf32, #tpu.memory_space<vmem>>, vector<1x1x128x8xf32>
    %17 = vector.shape_cast %16 : vector<1x1x128x8xf32> to vector<128x8xf32>
    %c1 = arith.constant 1 : index
    %c0_12 = arith.constant 0 : index
    %c0_13 = arith.constant 0 : index
    %18 = vector.load %arg4[%c1, %c0_12, %c0_13] : memref<9x8x128xf32, #tpu.memory_space<vmem>>, vector<1x8x128xf32>
    %19 = vector.shape_cast %18 : vector<1x8x128xf32> to vector<8x128xf32>
    %cst_14 = arith.constant dense<0.000000e+00> : vector<128x128xf32>
    %20 = tpu.matmul %17, %19, %cst_14 {dimension_numbers = #tpu.dot_dimension_numbers<[1], [0], [0], [1], [0, 0, 1, 1], [], []>} : vector<128x8xf32>, vector<8x128xf32>, vector<128x128xf32> -> vector<128x128xf32>
    %21 = arith.addf %11, %20 : vector<128x128xf32>
    %c0_i32_15 = arith.constant 0 : i32
    %22 = arith.addi %0, %c0_i32_15 : i32
    %c16_i32_16 = arith.constant 16 : i32
    %23 = arith.muli %22, %c16_i32_16 : i32
    %c2_i32 = arith.constant 2 : i32
    %24 = arith.addi %23, %c2_i32 : i32
    %c0_17 = arith.constant 0 : index
    %c0_18 = arith.constant 0 : index
    %25 = arith.index_cast %24 : i32 to index
    %c0_19 = arith.constant 0 : index
    %26 = vector.load %arg3[%c0_17, %c0_18, %25, %c0_19] : memref<1x1x176x8xf32, #tpu.memory_space<vmem>>, vector<1x1x128x8xf32>
    %27 = vector.shape_cast %26 : vector<1x1x128x8xf32> to vector<128x8xf32>
    %c2 = arith.constant 2 : index
    %c0_20 = arith.constant 0 : index
    %c0_21 = arith.constant 0 : index
    %28 = vector.load %arg4[%c2, %c0_20, %c0_21] : memref<9x8x128xf32, #tpu.memory_space<vmem>>, vector<1x8x128xf32>
    %29 = vector.shape_cast %28 : vector<1x8x128xf32> to vector<8x128xf32>
    %cst_22 = arith.constant dense<0.000000e+00> : vector<128x128xf32>
    %30 = tpu.matmul %27, %29, %cst_22 {dimension_numbers = #tpu.dot_dimension_numbers<[1], [0], [0], [1], [0, 0, 1, 1], [], []>} : vector<128x8xf32>, vector<8x128xf32>, vector<128x128xf32> -> vector<128x128xf32>
    %31 = arith.addf %21, %30 : vector<128x128xf32>
    %c1_i32_23 = arith.constant 1 : i32
    %32 = arith.addi %0, %c1_i32_23 : i32
    %c16_i32_24 = arith.constant 16 : i32
    %33 = arith.muli %32, %c16_i32_24 : i32
    %c0_i32_25 = arith.constant 0 : i32
    %34 = arith.addi %33, %c0_i32_25 : i32
    %c0_26 = arith.constant 0 : index
    %c0_27 = arith.constant 0 : index
    %35 = arith.index_cast %34 : i32 to index
    %c0_28 = arith.constant 0 : index
    %36 = vector.load %arg3[%c0_26, %c0_27, %35, %c0_28] : memref<1x1x176x8xf32, #tpu.memory_space<vmem>>, vector<1x1x128x8xf32>
    %37 = vector.shape_cast %36 : vector<1x1x128x8xf32> to vector<128x8xf32>
    %c3 = arith.constant 3 : index
    %c0_29 = arith.constant 0 : index
    %c0_30 = arith.constant 0 : index
    %38 = vector.load %arg4[%c3, %c0_29, %c0_30] : memref<9x8x128xf32, #tpu.memory_space<vmem>>, vector<1x8x128xf32>
    %39 = vector.shape_cast %38 : vector<1x8x128xf32> to vector<8x128xf32>
    %cst_31 = arith.constant dense<0.000000e+00> : vector<128x128xf32>
    %40 = tpu.matmul %37, %39, %cst_31 {dimension_numbers = #tpu.dot_dimension_numbers<[1], [0], [0], [1], [0, 0, 1, 1], [], []>} : vector<128x8xf32>, vector<8x128xf32>, vector<128x128xf32> -> vector<128x128xf32>
    %41 = arith.addf %31, %40 : vector<128x128xf32>
    %c1_i32_32 = arith.constant 1 : i32
    %42 = arith.addi %0, %c1_i32_32 : i32
    %c16_i32_33 = arith.constant 16 : i32
    %43 = arith.muli %42, %c16_i32_33 : i32
    %c1_i32_34 = arith.constant 1 : i32
    %44 = arith.addi %43, %c1_i32_34 : i32
    %c0_35 = arith.constant 0 : index
    %c0_36 = arith.constant 0 : index
    %45 = arith.index_cast %44 : i32 to index
    %c0_37 = arith.constant 0 : index
    %46 = vector.load %arg3[%c0_35, %c0_36, %45, %c0_37] : memref<1x1x176x8xf32, #tpu.memory_space<vmem>>, vector<1x1x128x8xf32>
    %47 = vector.shape_cast %46 : vector<1x1x128x8xf32> to vector<128x8xf32>
    %c4 = arith.constant 4 : index
    %c0_38 = arith.constant 0 : index
    %c0_39 = arith.constant 0 : index
    %48 = vector.load %arg4[%c4, %c0_38, %c0_39] : memref<9x8x128xf32, #tpu.memory_space<vmem>>, vector<1x8x128xf32>
    %49 = vector.shape_cast %48 : vector<1x8x128xf32> to vector<8x128xf32>
    %cst_40 = arith.constant dense<0.000000e+00> : vector<128x128xf32>
    %50 = tpu.matmul %47, %49, %cst_40 {dimension_numbers = #tpu.dot_dimension_numbers<[1], [0], [0], [1], [0, 0, 1, 1], [], []>} : vector<128x8xf32>, vector<8x128xf32>, vector<128x128xf32> -> vector<128x128xf32>
    %51 = arith.addf %41, %50 : vector<128x128xf32>
    %c1_i32_41 = arith.constant 1 : i32
    %52 = arith.addi %0, %c1_i32_41 : i32
    %c16_i32_42 = arith.constant 16 : i32
    %53 = arith.muli %52, %c16_i32_42 : i32
    %c2_i32_43 = arith.constant 2 : i32
    %54 = arith.addi %53, %c2_i32_43 : i32
    %c0_44 = arith.constant 0 : index
    %c0_45 = arith.constant 0 : index
    %55 = arith.index_cast %54 : i32 to index
    %c0_46 = arith.constant 0 : index
    %56 = vector.load %arg3[%c0_44, %c0_45, %55, %c0_46] : memref<1x1x176x8xf32, #tpu.memory_space<vmem>>, vector<1x1x128x8xf32>
    %57 = vector.shape_cast %56 : vector<1x1x128x8xf32> to vector<128x8xf32>
    %c5 = arith.constant 5 : index
    %c0_47 = arith.constant 0 : index
    %c0_48 = arith.constant 0 : index
    %58 = vector.load %arg4[%c5, %c0_47, %c0_48] : memref<9x8x128xf32, #tpu.memory_space<vmem>>, vector<1x8x128xf32>
    %59 = vector.shape_cast %58 : vector<1x8x128xf32> to vector<8x128xf32>
    %cst_49 = arith.constant dense<0.000000e+00> : vector<128x128xf32>
    %60 = tpu.matmul %57, %59, %cst_49 {dimension_numbers = #tpu.dot_dimension_numbers<[1], [0], [0], [1], [0, 0, 1, 1], [], []>} : vector<128x8xf32>, vector<8x128xf32>, vector<128x128xf32> -> vector<128x128xf32>
    %61 = arith.addf %51, %60 : vector<128x128xf32>
    %c2_i32_50 = arith.constant 2 : i32
    %62 = arith.addi %0, %c2_i32_50 : i32
    %c16_i32_51 = arith.constant 16 : i32
    %63 = arith.muli %62, %c16_i32_51 : i32
    %c0_i32_52 = arith.constant 0 : i32
    %64 = arith.addi %63, %c0_i32_52 : i32
    %c0_53 = arith.constant 0 : index
    %c0_54 = arith.constant 0 : index
    %65 = arith.index_cast %64 : i32 to index
    %c0_55 = arith.constant 0 : index
    %66 = vector.load %arg3[%c0_53, %c0_54, %65, %c0_55] : memref<1x1x176x8xf32, #tpu.memory_space<vmem>>, vector<1x1x128x8xf32>
    %67 = vector.shape_cast %66 : vector<1x1x128x8xf32> to vector<128x8xf32>
    %c6 = arith.constant 6 : index
    %c0_56 = arith.constant 0 : index
    %c0_57 = arith.constant 0 : index
    %68 = vector.load %arg4[%c6, %c0_56, %c0_57] : memref<9x8x128xf32, #tpu.memory_space<vmem>>, vector<1x8x128xf32>
    %69 = vector.shape_cast %68 : vector<1x8x128xf32> to vector<8x128xf32>
    %cst_58 = arith.constant dense<0.000000e+00> : vector<128x128xf32>
    %70 = tpu.matmul %67, %69, %cst_58 {dimension_numbers = #tpu.dot_dimension_numbers<[1], [0], [0], [1], [0, 0, 1, 1], [], []>} : vector<128x8xf32>, vector<8x128xf32>, vector<128x128xf32> -> vector<128x128xf32>
    %71 = arith.addf %61, %70 : vector<128x128xf32>
    %c2_i32_59 = arith.constant 2 : i32
    %72 = arith.addi %0, %c2_i32_59 : i32
    %c16_i32_60 = arith.constant 16 : i32
    %73 = arith.muli %72, %c16_i32_60 : i32
    %c1_i32_61 = arith.constant 1 : i32
    %74 = arith.addi %73, %c1_i32_61 : i32
    %c0_62 = arith.constant 0 : index
    %c0_63 = arith.constant 0 : index
    %75 = arith.index_cast %74 : i32 to index
    %c0_64 = arith.constant 0 : index
    %76 = vector.load %arg3[%c0_62, %c0_63, %75, %c0_64] : memref<1x1x176x8xf32, #tpu.memory_space<vmem>>, vector<1x1x128x8xf32>
    %77 = vector.shape_cast %76 : vector<1x1x128x8xf32> to vector<128x8xf32>
    %c7 = arith.constant 7 : index
    %c0_65 = arith.constant 0 : index
    %c0_66 = arith.constant 0 : index
    %78 = vector.load %arg4[%c7, %c0_65, %c0_66] : memref<9x8x128xf32, #tpu.memory_space<vmem>>, vector<1x8x128xf32>
    %79 = vector.shape_cast %78 : vector<1x8x128xf32> to vector<8x128xf32>
    %cst_67 = arith.constant dense<0.000000e+00> : vector<128x128xf32>
    %80 = tpu.matmul %77, %79, %cst_67 {dimension_numbers = #tpu.dot_dimension_numbers<[1], [0], [0], [1], [0, 0, 1, 1], [], []>} : vector<128x8xf32>, vector<8x128xf32>, vector<128x128xf32> -> vector<128x128xf32>
    %81 = arith.addf %71, %80 : vector<128x128xf32>
    %c2_i32_68 = arith.constant 2 : i32
    %82 = arith.addi %0, %c2_i32_68 : i32
    %c16_i32_69 = arith.constant 16 : i32
    %83 = arith.muli %82, %c16_i32_69 : i32
    %c2_i32_70 = arith.constant 2 : i32
    %84 = arith.addi %83, %c2_i32_70 : i32
    %c0_71 = arith.constant 0 : index
    %c0_72 = arith.constant 0 : index
    %85 = arith.index_cast %84 : i32 to index
    %c0_73 = arith.constant 0 : index
    %86 = vector.load %arg3[%c0_71, %c0_72, %85, %c0_73] : memref<1x1x176x8xf32, #tpu.memory_space<vmem>>, vector<1x1x128x8xf32>
    %87 = vector.shape_cast %86 : vector<1x1x128x8xf32> to vector<128x8xf32>
    %c8 = arith.constant 8 : index
    %c0_74 = arith.constant 0 : index
    %c0_75 = arith.constant 0 : index
    %88 = vector.load %arg4[%c8, %c0_74, %c0_75] : memref<9x8x128xf32, #tpu.memory_space<vmem>>, vector<1x8x128xf32>
    %89 = vector.shape_cast %88 : vector<1x8x128xf32> to vector<8x128xf32>
    %cst_76 = arith.constant dense<0.000000e+00> : vector<128x128xf32>
    %90 = tpu.matmul %87, %89, %cst_76 {dimension_numbers = #tpu.dot_dimension_numbers<[1], [0], [0], [1], [0, 0, 1, 1], [], []>} : vector<128x8xf32>, vector<8x128xf32>, vector<128x128xf32> -> vector<128x128xf32>
    %91 = arith.addf %81, %90 : vector<128x128xf32>
    %c0_77 = arith.constant 0 : index
    %c0_78 = arith.constant 0 : index
    %92 = vector.load %arg5[%c0_77, %c0_78] : memref<1x128xf32, #tpu.memory_space<vmem>>, vector<1x128xf32>
    %93 = vector.broadcast %92 : vector<1x128xf32> to vector<128x128xf32>
    %94 = arith.addf %91, %93 : vector<128x128xf32>
    %c0_79 = arith.constant 0 : index
    %c0_80 = arith.constant 0 : index
    %c0_81 = arith.constant 0 : index
    %95 = vector.load %arg6[%c0_79, %c0_80, %c0_81] : memref<1x128x128xf32, #tpu.memory_space<vmem>>, vector<1x128x128xf32>
    %96 = vector.shape_cast %95 : vector<1x128x128xf32> to vector<128x128xf32>
    %97 = arith.addf %94, %96 : vector<128x128xf32>
    %cst_82 = arith.constant 0.000000e+00 : f32
    %98 = vector.broadcast %cst_82 : f32 to vector<128x128xf32>
    %99 = arith.maximumf %97, %98 : vector<128x128xf32>
    %c0_83 = arith.constant 0 : index
    %c0_84 = arith.constant 0 : index
    %c0_85 = arith.constant 0 : index
    %100 = vector.load %arg7[%c0_83, %c0_84, %c0_85] : memref<1x128x128xf32, #tpu.memory_space<vmem>>, vector<1x128x128xf32>
    %101 = vector.shape_cast %100 : vector<1x128x128xf32> to vector<128x128xf32>
    %102 = vector.shape_cast %99 : vector<128x128xf32> to vector<1x128x128xf32>
    tpu.vector_store %arg7[%c0_83, %c0_84, %c0_85], %102 {strides = array<i32>} : memref<1x128x128xf32, #tpu.memory_space<vmem>>, vector<1x128x128xf32>,
    return
  }
  func.func @transform_0(%arg0: i32, %arg1: i32, %arg2: i32) -> (i32, i32, i32, i32) {
    %c0_i32 = arith.constant 0 : i32
    %c0_i32_0 = arith.constant 0 : i32
    %c0_i32_1 = arith.constant 0 : i32
    %c0_i32_2 = arith.constant 0 : i32
    return %c0_i32, %arg0, %c0_i32_0, %c0_i32_1 : i32, i32, i32, i32
  }
  func.func @transform_1(%arg0: i32, %arg1: i32, %arg2: i32) -> (i32, i32, i32) {
    %c0_i32 = arith.constant 0 : i32
    %c0_i32_0 = arith.constant 0 : i32
    %c0_i32_1 = arith.constant 0 : i32
    return %c0_i32, %c0_i32_0, %arg1 : i32, i32, i32
  }
  func.func @transform_2(%arg0: i32, %arg1: i32, %arg2: i32) -> (i32, i32) {
    %c0_i32 = arith.constant 0 : i32
    %c0_i32_0 = arith.constant 0 : i32
    return %c0_i32, %arg1 : i32, i32
  }
  func.func @transform_3(%arg0: i32, %arg1: i32, %arg2: i32) -> (i32, i32, i32) {
    %c0_i32 = arith.constant 0 : i32
    return %arg0, %arg2, %arg1 : i32, i32, i32
  }
  func.func @transform_4(%arg0: i32, %arg1: i32, %arg2: i32) -> (i32, i32, i32) {
    %c0_i32 = arith.constant 0 : i32
    return %arg0, %arg2, %arg1 : i32, i32, i32
  }
}

</mosaic_0001>

<bundles_post_ra>
// kernel: faster_block_forward.2
= control target key start
LH: loop header
LB: loop body
LE: loop exit
PB: predicated region body
PF: predicated region fallthrough
CT: control target
= control target key end

     0   :  { %s3742_s15 = smov 0   ;;  %s3744_s16 = smov 0   ;;  %s4749_s0 = inlined_call_operand.vmem [shape: f32[4,2,160,4], index: 0, kind: input, shape index: {}]   ;;  %s4750_s1 = inlined_call_operand.vmem [shape: f32[9,4,128], index: 1, kind: input, shape index: {}]   ;;  %s4751_s2 = inlined_call_operand.vmem [shape: f32[1,128], index: 2, kind: input, shape index: {}]   ;;  %s4752_s3 = inlined_call_operand.vmem [shape: f32[1,128], index: 3, kind: input, shape index: {}]   ;;  %s4753_s4 = inlined_call_operand.vmem [shape: f32[2,128,128], index: 4, kind: output, shape index: {}]  }
   0x1   :  { %s3746_s17 = smov 0   ;;  %s3748_s18 = smov 0  }
   0x2   :  { %s3750_s19 = smov 0  }
   0x3 LB: > { %s33_s20 = sadd.s32 1, %s3710_s18  ;;  %p47_p1 = scmp.ne.s32.totalorder %s3702_s16, %s3698_s15  ;;  %s3714_s19 = sphi %s3750_s19, %s14_s19   ;;  %s3710_s18 = sphi %s3748_s18, %s4799_s18   ;;  %s3706_s17 = sphi %s3746_s17, %s4798_s17   ;;  %s3702_s16 = sphi %s3744_s16, %s4797_s16   ;;  %s3698_s15 = sphi %s3742_s15, %s4796_s15  }
   0x4   : > { %p35_p0 = scmp.ge.s32.totalorder %s33_s20, 2  ;;  %p48_p2 = scmp.eq.s32.totalorder %s3714_s19, 0 }
   0x5   : > { %s40_s22 = sadd.s32 1, %s3702_s16  ;;  %p2945_p5 = scmp.ge.s32.totalorder %s3714_s19, 2 }
   0x6   : > { %s4801_s20 = smov (%p35_p0, %s33_s20), 0  ;;  %p49_p3 = por %p48_p2, %p47_p1 }
   0x7   : > { %s37_s21 = ssub.s32 %s3710_s18, %s4801_s20  ;;  %200 = sbr.rel (%p2945_p5) target bundleno = 57 (0x39), region = 28 }
   0x8   : > { %p38_p4 = scmp.eq.s32.totalorder %s37_s21, 0 }
   0xa   : > { %s3777_s23 = scalar_select %p38_p4, %s3702_s16, %s40_s22  }
   0xc   : > { %203 = sbr.rel (!%p49_p3) target bundleno = 57 (0x39), region = 32  ;;  %s205_s24 = sand.u32 (%p49_p3), 1, %s3702_s16  }
   0xd   : > { %s3633_s25 = smul.u32 (%p49_p3), 160, %s3710_s18 }
   0xe   : > { %s3632_s26 = smul.u32 (%p49_p3), 640, %s205_s24 }
   0xf   : > { %s3785_s29 = scalar_lea.vmem (%p49_p3), %s4749_s0, %s3633_s25 }
  0x10   : > { %v397_v0 = vld [vmem:[%s3785_s29] sm:$0xff] (%p49_p3)  ;;  %v399_v1 = vld [vmem:[%s3785_s29 + $0x8] sm:$0xff] (%p49_p3)  ;;  %v401_v2 = vld [vmem:[%s3785_s29 + $0x10] sm:$0xff] (%p49_p3)  ;;  %s3790_s30 = scalar_lea.vmem (%p49_p3), [#allocation2], %s3632_s26 }
  0x11   : > { %398 = vst [vmem:[%s3790_s30] sm:$0xff] %v397_v0  ;;  %400 = vst [vmem:[%s3790_s30 + $0x8] sm:$0xff] %v399_v1  ;;  %v403_v3 = vld [vmem:[%s3785_s29 + $0x18] sm:$0xff]  ;;  %v405_v4 = vld [vmem:[%s3785_s29 + $0x20] sm:$0xff] }
  0x12   : > { %402 = vst [vmem:[%s3790_s30 + $0x10] sm:$0xff] %v401_v2  ;;  %v407_v5 = vld [vmem:[%s3785_s29 + $0x28] sm:$0xff]  ;;  %404 = vst [vmem:[%s3790_s30 + $0x18] sm:$0xff] %v403_v3  ;;  %v409_v6 = vld [vmem:[%s3785_s29 + $0x30] sm:$0xff] }
  0x13   : > { %406 = vst [vmem:[%s3790_s30 + $0x20] sm:$0xff] %v405_v4  ;;  %408 = vst [vmem:[%s3790_s30 + $0x28] sm:$0xff] %v407_v5  ;;  %v411_v7 = vld [vmem:[%s3785_s29 + $0x38] sm:$0xff]  ;;  %v413_v8 = vld [vmem:[%s3785_s29 + $0x40] sm:$0xff] }
  0x14   : > { %410 = vst [vmem:[%s3790_s30 + $0x30] sm:$0xff] %v409_v6  ;;  %412 = vst [vmem:[%s3790_s30 + $0x38] sm:$0xff] %v411_v7  ;;  %v415_v9 = vld [vmem:[%s3785_s29 + $0x48] sm:$0xff]  ;;  %v417_v10 = vld [vmem:[%s3785_s29 + $0x50] sm:$0xff] }
  0x15   : > { %414 = vst [vmem:[%s3790_s30 + $0x40] sm:$0xff] %v413_v8  ;;  %v419_v11 = vld [vmem:[%s3785_s29 + $0x58] sm:$0xff]  ;;  %416 = vst [vmem:[%s3790_s30 + $0x48] sm:$0xff] %v415_v9  ;;  %v421_v12 = vld [vmem:[%s3785_s29 + $0x60] sm:$0xff] }
  0x16   : > { %418 = vst [vmem:[%s3790_s30 + $0x50] sm:$0xff] %v417_v10  ;;  %420 = vst [vmem:[%s3790_s30 + $0x58] sm:$0xff] %v419_v11  ;;  %v423_v13 = vld [vmem:[%s3785_s29 + $0x68] sm:$0xff]  ;;  %v425_v14 = vld [vmem:[%s3785_s29 + $0x70] sm:$0xff] }
  0x17   : > { %422 = vst [vmem:[%s3790_s30 + $0x60] sm:$0xff] %v421_v12  ;;  %424 = vst [vmem:[%s3790_s30 + $0x68] sm:$0xff] %v423_v13  ;;  %v427_v15 = vld [vmem:[%s3785_s29 + $0x78] sm:$0xff]  ;;  %v429_v16 = vld [vmem:[%s3785_s29 + $0x80] sm:$0xff] }
  0x18   : > { %426 = vst [vmem:[%s3790_s30 + $0x70] sm:$0xff] %v425_v14  ;;  %v431_v17 = vld [vmem:[%s3785_s29 + $0x88] sm:$0xff]  ;;  %428 = vst [vmem:[%s3790_s30 + $0x78] sm:$0xff] %v427_v15  ;;  %v433_v18 = vld [vmem:[%s3785_s29 + $0x90] sm:$0xff] }
  0x19   : > { %430 = vst [vmem:[%s3790_s30 + $0x80] sm:$0xff] %v429_v16  ;;  %432 = vst [vmem:[%s3790_s30 + $0x88] sm:$0xff] %v431_v17  ;;  %v435_v19 = vld [vmem:[%s3785_s29 + $0x98] sm:$0xff]  ;;  %v437_v20 = vld [vmem:[%s3785_s29 + $0x140] sm:$0xff] }
  0x1a   : > { %434 = vst [vmem:[%s3790_s30 + $0x90] sm:$0xff] %v433_v18  ;;  %436 = vst [vmem:[%s3790_s30 + $0x98] sm:$0xff] %v435_v19  ;;  %v439_v21 = vld [vmem:[%s3785_s29 + $0x148] sm:$0xff]  ;;  %v441_v22 = vld [vmem:[%s3785_s29 + $0x150] sm:$0xff] }
  0x1b   : > { %438 = vst [vmem:[%s3790_s30 + $0xa0] sm:$0xff] %v437_v20  ;;  %v443_v23 = vld [vmem:[%s3785_s29 + $0x158] sm:$0xff]  ;;  %440 = vst [vmem:[%s3790_s30 + $0xa8] sm:$0xff] %v439_v21  ;;  %v445_v24 = vld [vmem:[%s3785_s29 + $0x160] sm:$0xff] }
  0x1c   : > { %442 = vst [vmem:[%s3790_s30 + $0xb0] sm:$0xff] %v441_v22  ;;  %444 = vst [vmem:[%s3790_s30 + $0xb8] sm:$0xff] %v443_v23  ;;  %v447_v25 = vld [vmem:[%s3785_s29 + $0x168] sm:$0xff]  ;;  %v449_v26 = vld [vmem:[%s3785_s29 + $0x170] sm:$0xff] }
  0x1d   : > { %446 = vst [vmem:[%s3790_s30 + $0xc0] sm:$0xff] %v445_v24  ;;  %448 = vst [vmem:[%s3790_s30 + $0xc8] sm:$0xff] %v447_v25  ;;  %v451_v27 = vld [vmem:[%s3785_s29 + $0x178] sm:$0xff]  ;;  %v453_v28 = vld [vmem:[%s3785_s29 + $0x180] sm:$0xff] }
  0x1e   : > { %450 = vst [vmem:[%s3790_s30 + $0xd0] sm:$0xff] %v449_v26  ;;  %v455_v29 = vld [vmem:[%s3785_s29 + $0x188] sm:$0xff]  ;;  %452 = vst [vmem:[%s3790_s30 + $0xd8] sm:$0xff] %v451_v27  ;;  %v457_v30 = vld [vmem:[%s3785_s29 + $0x190] sm:$0xff] }
  0x1f   : > { %454 = vst [vmem:[%s3790_s30 + $0xe0] sm:$0xff] %v453_v28  ;;  %456 = vst [vmem:[%s3790_s30 + $0xe8] sm:$0xff] %v455_v29  ;;  %v459_v31 = vld [vmem:[%s3785_s29 + $0x198] sm:$0xff]  ;;  %v461_v32 = vld [vmem:[%s3785_s29 + $0x1a0] sm:$0xff] }
  0x20   : > { %458 = vst [vmem:[%s3790_s30 + $0xf0] sm:$0xff] %v457_v30  ;;  %460 = vst [vmem:[%s3790_s30 + $0xf8] sm:$0xff] %v459_v31  ;;  %v463_v33 = vld [vmem:[%s3785_s29 + $0x1a8] sm:$0xff]  ;;  %v465_v34 = vld [vmem:[%s3785_s29 + $0x1b0] sm:$0xff] }
  0x21   : > { %462 = vst [vmem:[%s3790_s30 + $0x100] sm:$0xff] %v461_v32  ;;  %v467_v35 = vld [vmem:[%s3785_s29 + $0x1b8] sm:$0xff]  ;;  %464 = vst [vmem:[%s3790_s30 + $0x108] sm:$0xff] %v463_v33  ;;  %v469_v36 = vld [vmem:[%s3785_s29 + $0x1c0] sm:$0xff] }
  0x22   : > { %466 = vst [vmem:[%s3790_s30 + $0x110] sm:$0xff] %v465_v34  ;;  %468 = vst [vmem:[%s3790_s30 + $0x118] sm:$0xff] %v467_v35  ;;  %v471_v37 = vld [vmem:[%s3785_s29 + $0x1c8] sm:$0xff]  ;;  %v473_v38 = vld [vmem:[%s3785_s29 + $0x1d0] sm:$0xff] }
  0x23   : > { %470 = vst [vmem:[%s3790_s30 + $0x120] sm:$0xff] %v469_v36  ;;  %472 = vst [vmem:[%s3790_s30 + $0x128] sm:$0xff] %v471_v37  ;;  %v475_v39 = vld [vmem:[%s3785_s29 + $0x1d8] sm:$0xff]  ;;  %v477_v40 = vld [vmem:[%s3785_s29 + $0x280] sm:$0xff] }
  0x24   : > { %474 = vst [vmem:[%s3790_s30 + $0x130] sm:$0xff] %v473_v38  ;;  %v479_v41 = vld [vmem:[%s3785_s29 + $0x288] sm:$0xff]  ;;  %476 = vst [vmem:[%s3790_s30 + $0x138] sm:$0xff] %v475_v39  ;;  %v481_v42 = vld [vmem:[%s3785_s29 + $0x290] sm:$0xff] }
  0x25   : > { %478 = vst [vmem:[%s3790_s30 + $0x140] sm:$0xff] %v477_v40  ;;  %480 = vst [vmem:[%s3790_s30 + $0x148] sm:$0xff] %v479_v41  ;;  %v483_v43 = vld [vmem:[%s3785_s29 + $0x298] sm:$0xff]  ;;  %v485_v44 = vld [vmem:[%s3785_s29 + $0x2a0] sm:$0xff] }
  0x26   : > { %482 = vst [vmem:[%s3790_s30 + $0x150] sm:$0xff] %v481_v42  ;;  %484 = vst [vmem:[%s3790_s30 + $0x158] sm:$0xff] %v483_v43  ;;  %v487_v45 = vld [vmem:[%s3785_s29 + $0x2a8] sm:$0xff]  ;;  %v489_v46 = vld [vmem:[%s3785_s29 + $0x2b0] sm:$0xff] }
  0x27   : > { %486 = vst [vmem:[%s3790_s30 + $0x160] sm:$0xff] %v485_v44  ;;  %v491_v47 = vld [vmem:[%s3785_s29 + $0x2b8] sm:$0xff]  ;;  %488 = vst [vmem:[%s3790_s30 + $0x168] sm:$0xff] %v487_v45  ;;  %v493_v48 = vld [vmem:[%s3785_s29 + $0x2c0] sm:$0xff] }
  0x28   : > { %490 = vst [vmem:[%s3790_s30 + $0x170] sm:$0xff] %v489_v46  ;;  %492 = vst [vmem:[%s3790_s30 + $0x178] sm:$0xff] %v491_v47  ;;  %v495_v49 = vld [vmem:[%s3785_s29 + $0x2c8] sm:$0xff]  ;;  %v497_v50 = vld [vmem:[%s3785_s29 + $0x2d0] sm:$0xff] }
  0x29   : > { %494 = vst [vmem:[%s3790_s30 + $0x180] sm:$0xff] %v493_v48  ;;  %496 = vst [vmem:[%s3790_s30 + $0x188] sm:$0xff] %v495_v49  ;;  %v499_v51 = vld [vmem:[%s3785_s29 + $0x2d8] sm:$0xff]  ;;  %v501_v52 = vld [vmem:[%s3785_s29 + $0x2e0] sm:$0xff] }
  0x2a   : > { %498 = vst [vmem:[%s3790_s30 + $0x190] sm:$0xff] %v497_v50  ;;  %v503_v53 = vld [vmem:[%s3785_s29 + $0x2e8] sm:$0xff]  ;;  %500 = vst [vmem:[%s3790_s30 + $0x198] sm:$0xff] %v499_v51  ;;  %v505_v54 = vld [vmem:[%s3785_s29 + $0x2f0] sm:$0xff] }
  0x2b   : > { %502 = vst [vmem:[%s3790_s30 + $0x1a0] sm:$0xff] %v501_v52  ;;  %504 = vst [vmem:[%s3790_s30 + $0x1a8] sm:$0xff] %v503_v53  ;;  %v507_v55 = vld [vmem:[%s3785_s29 + $0x2f8] sm:$0xff]  ;;  %v509_v56 = vld [vmem:[%s3785_s29 + $0x300] sm:$0xff] }
  0x2c   : > { %506 = vst [vmem:[%s3790_s30 + $0x1b0] sm:$0xff] %v505_v54  ;;  %508 = vst [vmem:[%s3790_s30 + $0x1b8] sm:$0xff] %v507_v55  ;;  %v511_v57 = vld [vmem:[%s3785_s29 + $0x308] sm:$0xff]  ;;  %v513_v58 = vld [vmem:[%s3785_s29 + $0x310] sm:$0xff] }
  0x2d   : > { %510 = vst [vmem:[%s3790_s30 + $0x1c0] sm:$0xff] %v509_v56  ;;  %v515_v59 = vld [vmem:[%s3785_s29 + $0x318] sm:$0xff]  ;;  %512 = vst [vmem:[%s3790_s30 + $0x1c8] sm:$0xff] %v511_v57  ;;  %v517_v60 = vld [vmem:[%s3785_s29 + $0x3c0] sm:$0xff] }
  0x2e   : > { %514 = vst [vmem:[%s3790_s30 + $0x1d0] sm:$0xff] %v513_v58  ;;  %516 = vst [vmem:[%s3790_s30 + $0x1d8] sm:$0xff] %v515_v59  ;;  %v519_v61 = vld [vmem:[%s3785_s29 + $0x3c8] sm:$0xff]  ;;  %v521_v62 = vld [vmem:[%s3785_s29 + $0x3d0] sm:$0xff] }
  0x2f   : > { %518 = vst [vmem:[%s3790_s30 + $0x1e0] sm:$0xff] %v517_v60  ;;  %520 = vst [vmem:[%s3790_s30 + $0x1e8] sm:$0xff] %v519_v61  ;;  %v523_v63 = vld [vmem:[%s3785_s29 + $0x3d8] sm:$0xff]  ;;  %v525_v0 = vld [vmem:[%s3785_s29 + $0x3e0] sm:$0xff] }
  0x30   : > { %522 = vst [vmem:[%s3790_s30 + $0x1f0] sm:$0xff] %v521_v62  ;;  %v527_v1 = vld [vmem:[%s3785_s29 + $0x3e8] sm:$0xff]  ;;  %524 = vst [vmem:[%s3790_s30 + $0x1f8] sm:$0xff] %v523_v63  ;;  %v529_v2 = vld [vmem:[%s3785_s29 + $0x3f0] sm:$0xff] }
  0x31   : > { %526 = vst [vmem:[%s3790_s30 + $0x200] sm:$0xff] %v525_v0  ;;  %528 = vst [vmem:[%s3790_s30 + $0x208] sm:$0xff] %v527_v1  ;;  %v531_v3 = vld [vmem:[%s3785_s29 + $0x3f8] sm:$0xff]  ;;  %v533_v4 = vld [vmem:[%s3785_s29 + $0x400] sm:$0xff] }
  0x32   : > { %530 = vst [vmem:[%s3790_s30 + $0x210] sm:$0xff] %v529_v2  ;;  %532 = vst [vmem:[%s3790_s30 + $0x218] sm:$0xff] %v531_v3  ;;  %v535_v5 = vld [vmem:[%s3785_s29 + $0x408] sm:$0xff]  ;;  %v537_v6 = vld [vmem:[%s3785_s29 + $0x410] sm:$0xff] }
  0x33   : > { %534 = vst [vmem:[%s3790_s30 + $0x220] sm:$0xff] %v533_v4  ;;  %v539_v7 = vld [vmem:[%s3785_s29 + $0x418] sm:$0xff]  ;;  %536 = vst [vmem:[%s3790_s30 + $0x228] sm:$0xff] %v535_v5  ;;  %v541_v8 = vld [vmem:[%s3785_s29 + $0x420] sm:$0xff] }
  0x34   : > { %538 = vst [vmem:[%s3790_s30 + $0x230] sm:$0xff] %v537_v6  ;;  %540 = vst [vmem:[%s3790_s30 + $0x238] sm:$0xff] %v539_v7  ;;  %v543_v9 = vld [vmem:[%s3785_s29 + $0x428] sm:$0xff]  ;;  %v545_v10 = vld [vmem:[%s3785_s29 + $0x430] sm:$0xff] }
  0x35   : > { %542 = vst [vmem:[%s3790_s30 + $0x240] sm:$0xff] %v541_v8  ;;  %544 = vst [vmem:[%s3790_s30 + $0x248] sm:$0xff] %v543_v9  ;;  %v547_v11 = vld [vmem:[%s3785_s29 + $0x438] sm:$0xff]  ;;  %v549_v12 = vld [vmem:[%s3785_s29 + $0x440] sm:$0xff] }
  0x36   : > { %546 = vst [vmem:[%s3790_s30 + $0x250] sm:$0xff] %v545_v10  ;;  %v551_v13 = vld [vmem:[%s3785_s29 + $0x448] sm:$0xff]  ;;  %548 = vst [vmem:[%s3790_s30 + $0x258] sm:$0xff] %v547_v11  ;;  %v553_v14 = vld [vmem:[%s3785_s29 + $0x450] sm:$0xff] }
  0x37   : > { %550 = vst [vmem:[%s3790_s30 + $0x260] sm:$0xff] %v549_v12  ;;  %552 = vst [vmem:[%s3790_s30 + $0x268] sm:$0xff] %v551_v13  ;;  %v555_v15 = vld [vmem:[%s3785_s29 + $0x458] sm:$0xff] }
  0x38   : > { %554 = vst [vmem:[%s3790_s30 + $0x270] sm:$0xff] %v553_v14  ;;  %556 = vst [vmem:[%s3790_s30 + $0x278] sm:$0xff] %v555_v15 }
  0x39 PF: > { %p2947_p6 = scmp.ge.s32.totalorder %s3714_s19, 1  ;;  %p561_p7 = scmp.lt.s32.totalorder %s3714_s19, 3 }
  0x3b   : > { %p562_p8 = pnand %p2947_p6, %p561_p7 }
  0x3d   : > { %565 = sbr.rel (%p562_p8) target bundleno = 418 (0x1a2), region = 70 }
  0x42   : > { %v2966_v16 = vld [vmem:[%s4750_s1 + $0x4] sm:$0xf]  ;;  %vm722_vm0 = vcmask 1043456   ;;  %s568_s7 = sand.u32 1, %s3698_s15   ;;  %v652_v17 = vld [vmem:[%s4750_s1] sm:$0xf] }
  0x43   : > { %3630 = vmatprep.subr.msk.mxu1 %vm722_vm0, %v2966_v16  ;;  %3396 = vmatprep.subr.msk.mxu0 %vm722_vm0, %v2966_v16  ;;  %s3634_s8 = smul.u32 640, %s568_s7  ;;  %v3017_v18 = vld [vmem:[%s4750_s1 + $0x8] sm:$0xf]  ;;  %vm673_vm1 = vcmask 31744   ;;  %v3051_v25 = vld [vmem:[%s4750_s1 + $0xc] sm:$0xf] }
  0x44   : > { %3631 = vmatpush3.msk.msra.mxu1 %vm722_vm0, %v2966_v16  ;;  %3397 = vmatpush3.msk.msra.mxu0 %vm722_vm0, %v2966_v16  ;;  %v3085_v26 = vld [vmem:[%s4750_s1 + $0x10] sm:$0xf]  ;;  %v4070_v43 = vld [vmem:[%s4750_s1 + $0x14] sm:$0xf]  ;;  %v4075_v44 = vld [vmem:[%s4750_s1 + $0x18] sm:$0xf] }
  0x45   : > { %3422 = vmatprep.subr.msk.mxu1 %vm722_vm0, %v652_v17  ;;  %3448 = vmatprep.subr.msk.mxu0 %vm722_vm0, %v3017_v18  ;;  %s3967_s13 = scalar_lea.vmem [#allocation2], %s3634_s8  ;;  %v4230_v13 = vld [vmem:[%s4750_s1 + $0x1c] sm:$0xf]  ;;  %v4235_v14 = vld [vmem:[%s4750_s1 + $0x20] sm:$0xf]  ;;  %p621_p9 = scmp.lt.s32.totalorder %s3706_s17, 1 }
  0x46   : > { %v2950_v19 = vld [vmem:[%s3967_s13 + $0xa0] sm:$0xff]  ;;  %v2951_v21 = vld [vmem:[%s3967_s13 + $0xa8] sm:$0xff]  ;;  %v3981_v23 = vld [vmem:[%s3967_s13 + $0xb0] sm:$0xff] }
  0x47   : > { %v3971_v20 = vld [vmem:[%s3967_s13 + $0xe0] sm:$0xff]  ;;  %3398 = vmatprep.mubr.msk.f32.mxu0 %vm673_vm1, %v2950_v19  ;;  %v3978_v22 = vld [vmem:[%s3967_s13 + $0xe8] sm:$0xff]  ;;  %v3984_v24 = vld [vmem:[%s3967_s13 + $0xf0] sm:$0xff]  ;;  %s4803_s17 = smov (!%p621_p9, %s3706_s17), 1 }
  0x48   : > { %3410 = vmatprep.mubr.msk.f32.mxu1 %vm673_vm1, %v3971_v20  ;;  %3399 = vmatmul.mubr.msk.f32.vlgmr.msra.gmra.mxu0 %vm673_vm1, %v2951_v21  ;;  %v3998_v27 = vld [vmem:[%s3967_s13 + $0xb8] sm:$0xff]  ;;  %v4008_v29 = vld [vmem:[%s3967_s13 + $0xc0] sm:$0xff]  ;;  %v4024_v31 = vld [vmem:[%s3967_s13 + $0xc8] sm:$0xff]  ;;  %s3242_s10 = sshll.u32 %s4803_s17, 7 }
  0x49   : > { %3411 = vmatmul.mubr.msk.f32.vlgmr.msra.gmra.mxu1 %vm673_vm1, %v3978_v22  ;;  %3449 = vmatpush3.msk.msra.mxu0 %vm722_vm0, %v3017_v18  ;;  %v4001_v28 = vld [vmem:[%s3967_s13 + $0xf8] sm:$0xff]  ;;  %v4011_v30 = vld [vmem:[%s3967_s13 + $0x100] sm:$0xff]  ;;  %v4027_v32 = vld [vmem:[%s3967_s13 + $0x108] sm:$0xff]  ;;  %s4637_s12 = scalar_lea.vmem %s4753_s4, %s3242_s10 }
  0x4a   : > { %3423 = vmatpush3.msk.msra.mxu1 %vm722_vm0, %v652_v17  ;;  %3401 = vmatprep.mubr.msk.f32.mxu0 %vm673_vm1, %v3981_v23  ;;  %v4030_v33 = vld [vmem:[%s3967_s13 + $0xd0] sm:$0xff]  ;;  %v4044_v35 = vld [vmem:[%s3967_s13 + $0xd8] sm:$0xff]  ;;  %v636_v37 = vld [vmem:[%s3967_s13] sm:$0xff] }
  0x4b   : > { %3413 = vmatprep.mubr.msk.f32.mxu1 %vm673_vm1, %v3984_v24  ;;  %3474 = vmatprep.subr.msk.mxu1 %vm722_vm0, %v3051_v25  ;;  %v4033_v34 = vld [vmem:[%s3967_s13 + $0x110] sm:$0xff]  ;;  %v4047_v36 = vld [vmem:[%s3967_s13 + $0x118] sm:$0xff]  ;;  %v3001_v38 = vld [vmem:[%s3967_s13 + $0x1] sm:$0xff] }
  0x4c   : > { %3500 = vmatprep.subr.msk.mxu0 %vm722_vm0, %v3085_v26  ;;  %3402 = vmatmul.mubr.msk.f32.gmra.mxu0 %vm673_vm1, %v3998_v27  ;;  %v637_v39 = vld [vmem:[%s3967_s13 + $0x8] sm:$0xff]  ;;  %v4060_v41 = vld [vmem:[%s3967_s13 + $0x10] sm:$0xff]  ;;  %v4080_v45 = vld [vmem:[%s3967_s13 + $0x18] sm:$0xff] }
  0x4d   : > { %3414 = vmatmul.mubr.msk.f32.gmra.mxu1 %vm673_vm1, %v4001_v28  ;;  %3404 = vmatprep.mubr.msk.f32.mxu0 %vm673_vm1, %v4008_v29  ;;  %v3002_v40 = vld [vmem:[%s3967_s13 + $0x9] sm:$0xff]  ;;  %v4063_v42 = vld [vmem:[%s3967_s13 + $0x11] sm:$0xff]  ;;  %v4083_v46 = vld [vmem:[%s3967_s13 + $0x19] sm:$0xff] }
  0x4e   : > { %3416 = vmatprep.mubr.msk.f32.mxu1 %vm673_vm1, %v4011_v30  ;;  %v4090_v47 = vld [vmem:[%s3967_s13 + $0x20] sm:$0xff]  ;;  %v4108_v49 = vld [vmem:[%s3967_s13 + $0x28] sm:$0xff]  ;;  %v4114_v51 = vld [vmem:[%s3967_s13 + $0x30] sm:$0xff] }
  0x4f   : > { %v4093_v48 = vld [vmem:[%s3967_s13 + $0x21] sm:$0xff]  ;;  %v4111_v50 = vld [vmem:[%s3967_s13 + $0x29] sm:$0xff]  ;;  %v4117_v52 = vld [vmem:[%s3967_s13 + $0x31] sm:$0xff] }
  0x50   : > { %3405 = vmatmul.mubr.msk.f32.gmra.mxu0 %vm673_vm1, %v4024_v31  ;;  %v4128_v53 = vld [vmem:[%s3967_s13 + $0x38] sm:$0xff]  ;;  %v4134_v55 = vld [vmem:[%s3967_s13 + $0x40] sm:$0xff]  ;;  %v4148_v57 = vld [vmem:[%s3967_s13 + $0x48] sm:$0xff] }
  0x51   : > { %3417 = vmatmul.mubr.msk.f32.gmra.mxu1 %vm673_vm1, %v4027_v32  ;;  %3407 = vmatprep.mubr.msk.f32.mxu0 %vm673_vm1, %v4030_v33  ;;  %v4131_v54 = vld [vmem:[%s3967_s13 + $0x39] sm:$0xff]  ;;  %v4137_v56 = vld [vmem:[%s3967_s13 + $0x41] sm:$0xff]  ;;  %v4151_v58 = vld [vmem:[%s3967_s13 + $0x49] sm:$0xff] }
  0x52   : > { %3419 = vmatprep.mubr.msk.f32.mxu1 %vm673_vm1, %v4033_v34  ;;  %v4154_v59 = vld [vmem:[%s3967_s13 + $0x50] sm:$0xff]  ;;  %v4168_v61 = vld [vmem:[%s3967_s13 + $0x58] sm:$0xff]  ;;  %v4174_v63 = vld [vmem:[%s3967_s13 + $0x60] sm:$0xff] }
  0x53   : > { %v4157_v60 = vld [vmem:[%s3967_s13 + $0x51] sm:$0xff]  ;;  %v4171_v62 = vld [vmem:[%s3967_s13 + $0x59] sm:$0xff]  ;;  %v4177_v0 = vld [vmem:[%s3967_s13 + $0x61] sm:$0xff] }
  0x54   : > { %3408 = vmatmul.mubr.msk.f32.gmra.mxu0 %vm673_vm1, %v4044_v35  ;;  %v4188_v1 = vld [vmem:[%s3967_s13 + $0x68] sm:$0xff]  ;;  %v4194_v3 = vld [vmem:[%s3967_s13 + $0x70] sm:$0xff]  ;;  %v4208_v5 = vld [vmem:[%s3967_s13 + $0x78] sm:$0xff] }
  0x55   : > { %3420 = vmatmul.mubr.msk.f32.gmra.mxu1 %vm673_vm1, %v4047_v36  ;;  %3450 = vmatprep.mubr.msk.f32.mxu0 %vm673_vm1, %v3001_v38  ;;  %v4191_v2 = vld [vmem:[%s3967_s13 + $0x69] sm:$0xff]  ;;  %v4197_v4 = vld [vmem:[%s3967_s13 + $0x71] sm:$0xff]  ;;  %v4211_v6 = vld [vmem:[%s3967_s13 + $0x79] sm:$0xff] }
  0x56   : > { %3424 = vmatprep.mubr.msk.f32.mxu1 %vm673_vm1, %v636_v37  ;;  %v3035_v7 = vld [vmem:[%s3967_s13 + $0x140] sm:$0xff]  ;;  %v3036_v9 = vld [vmem:[%s3967_s13 + $0x148] sm:$0xff]  ;;  %v3037_v11 = vld [vmem:[%s3967_s13 + $0x150] sm:$0xff] }
  0x57   : > { %v3069_v8 = vld [vmem:[%s3967_s13 + $0x1e0] sm:$0xff]  ;;  %v3070_v10 = vld [vmem:[%s3967_s13 + $0x1e8] sm:$0xff]  ;;  %v3071_v12 = vld [vmem:[%s3967_s13 + $0x1f0] sm:$0xff] }
  0x58   : > { %3451 = vmatmul.mubr.msk.f32.vlgmr.msra.gmra.mxu0 %vm673_vm1, %v3002_v40  ;;  %v3038_v15 = vld [vmem:[%s3967_s13 + $0x158] sm:$0xff]  ;;  %v3039_v17 = vld [vmem:[%s3967_s13 + $0x160] sm:$0xff]  ;;  %v3040_v19 = vld [vmem:[%s3967_s13 + $0x168] sm:$0xff] }
  0x59   : > { %3425 = vmatmul.mubr.msk.f32.vlgmr.msra.gmra.mxu1 %vm673_vm1, %v637_v39  ;;  %3501 = vmatpush3.msk.msra.mxu0 %vm722_vm0, %v3085_v26  ;;  %v3072_v16 = vld [vmem:[%s3967_s13 + $0x1f8] sm:$0xff]  ;;  %v3073_v18 = vld [vmem:[%s3967_s13 + $0x200] sm:$0xff]  ;;  %v3074_v21 = vld [vmem:[%s3967_s13 + $0x208] sm:$0xff] }
  0x5a   : > { %3475 = vmatpush3.msk.msra.mxu1 %vm722_vm0, %v3051_v25  ;;  %3427 = vmatprep.mubr.msk.f32.mxu1 %vm673_vm1, %v4060_v41  ;;  %v3041_v25 = vld [vmem:[%s3967_s13 + $0x170] sm:$0xff]  ;;  %v3042_v37 = vld [vmem:[%s3967_s13 + $0x178] sm:$0xff]  ;;  %v3043_v39 = vld [vmem:[%s3967_s13 + $0x180] sm:$0xff] }
  0x5b   : > { %3453 = vmatprep.mubr.msk.f32.mxu0 %vm673_vm1, %v4063_v42  ;;  %3526 = vmatprep.subr.msk.mxu1 %vm722_vm0, %v4070_v43  ;;  %v3075_v26 = vld [vmem:[%s3967_s13 + $0x210] sm:$0xff]  ;;  %v3076_v38 = vld [vmem:[%s3967_s13 + $0x218] sm:$0xff]  ;;  %v3077_v40 = vld [vmem:[%s3967_s13 + $0x220] sm:$0xff] }
  0x5c   : > { %3552 = vmatprep.subr.msk.mxu0 %vm722_vm0, %v4075_v44  ;;  %3454 = vmatmul.mubr.msk.f32.gmra.mxu0 %vm673_vm1, %v4083_v46 }
  0x5d   : > { %3428 = vmatmul.mubr.msk.f32.gmra.mxu1 %vm673_vm1, %v4080_v45  ;;  %3456 = vmatprep.mubr.msk.f32.mxu0 %vm673_vm1, %v4093_v48 }
  0x5e   : > { %3430 = vmatprep.mubr.msk.f32.mxu1 %vm673_vm1, %v4090_v47 }
  0x60   : > { %3457 = vmatmul.mubr.msk.f32.gmra.mxu0 %vm673_vm1, %v4111_v50 }
  0x61   : > { %3431 = vmatmul.mubr.msk.f32.gmra.mxu1 %vm673_vm1, %v4108_v49  ;;  %3459 = vmatprep.mubr.msk.f32.mxu0 %vm673_vm1, %v4117_v52 }
  0x62   : > { %3433 = vmatprep.mubr.msk.f32.mxu1 %vm673_vm1, %v4114_v51 }
  0x64   : > { %3460 = vmatmul.mubr.msk.f32.gmra.mxu0 %vm673_vm1, %v4131_v54 }
  0x65   : > { %3434 = vmatmul.mubr.msk.f32.gmra.mxu1 %vm673_vm1, %v4128_v53  ;;  %3462 = vmatprep.mubr.msk.f32.mxu0 %vm673_vm1, %v4137_v56 }
  0x66   : > { %3436 = vmatprep.mubr.msk.f32.mxu1 %vm673_vm1, %v4134_v55 }
  0x68   : > { %3463 = vmatmul.mubr.msk.f32.gmra.mxu0 %vm673_vm1, %v4151_v58 }
  0x69   : > { %3437 = vmatmul.mubr.msk.f32.gmra.mxu1 %vm673_vm1, %v4148_v57  ;;  %3465 = vmatprep.mubr.msk.f32.mxu0 %vm673_vm1, %v4157_v60 }
  0x6a   : > { %3439 = vmatprep.mubr.msk.f32.mxu1 %vm673_vm1, %v4154_v59 }
  0x6c   : > { %3466 = vmatmul.mubr.msk.f32.gmra.mxu0 %vm673_vm1, %v4171_v62 }
  0x6d   : > { %3440 = vmatmul.mubr.msk.f32.gmra.mxu1 %vm673_vm1, %v4168_v61  ;;  %3468 = vmatprep.mubr.msk.f32.mxu0 %vm673_vm1, %v4177_v0 }
  0x6e   : > { %3442 = vmatprep.mubr.msk.f32.mxu1 %vm673_vm1, %v4174_v63 }
  0x70   : > { %3469 = vmatmul.mubr.msk.f32.gmra.mxu0 %vm673_vm1, %v4191_v2 }
  0x71   : > { %3443 = vmatmul.mubr.msk.f32.gmra.mxu1 %vm673_vm1, %v4188_v1  ;;  %3471 = vmatprep.mubr.msk.f32.mxu0 %vm673_vm1, %v4197_v4 }
  0x72   : > { %3445 = vmatprep.mubr.msk.f32.mxu1 %vm673_vm1, %v4194_v3 }
  0x74   : > { %3472 = vmatmul.mubr.msk.f32.gmra.mxu0 %vm673_vm1, %v4211_v6 }
  0x75   : > { %3446 = vmatmul.mubr.msk.f32.gmra.mxu1 %vm673_vm1, %v4208_v5  ;;  %3502 = vmatprep.mubr.msk.f32.mxu0 %vm673_vm1, %v3069_v8  ;;  %v3079_v8 = vld [vmem:[%s3967_s13 + $0x230] sm:$0xff] }
  0x76   : > { %3476 = vmatprep.mubr.msk.f32.mxu1 %vm673_vm1, %v3035_v7  ;;  %v3045_v7 = vld [vmem:[%s3967_s13 + $0x190] sm:$0xff] }
  0x78   : > { %3503 = vmatmul.mubr.msk.f32.vlgmr.msra.gmra.mxu0 %vm673_vm1, %v3070_v10  ;;  %v3080_v10 = vld [vmem:[%s3967_s13 + $0x238] sm:$0xff] }
  0x79   : > { %3477 = vmatmul.mubr.msk.f32.vlgmr.msra.gmra.mxu1 %vm673_vm1, %v3036_v9  ;;  %3553 = vmatpush3.msk.msra.mxu0 %vm722_vm0, %v4075_v44  ;;  %v3078_v44 = vld [vmem:[%s3967_s13 + $0x228] sm:$0xff]  ;;  %v3046_v9 = vld [vmem:[%s3967_s13 + $0x198] sm:$0xff] }
  0x7a   : > { %3527 = vmatpush3.msk.msra.mxu1 %vm722_vm0, %v4070_v43  ;;  %3479 = vmatprep.mubr.msk.f32.mxu1 %vm673_vm1, %v3037_v11  ;;  %v3044_v43 = vld [vmem:[%s3967_s13 + $0x188] sm:$0xff]  ;;  %v3047_v11 = vld [vmem:[%s3967_s13 + $0x1a0] sm:$0xff] }
  0x7b   : > { %3505 = vmatprep.mubr.msk.f32.mxu0 %vm673_vm1, %v3071_v12  ;;  %3578 = vmatprep.subr.msk.mxu1 %vm722_vm0, %v4230_v13  ;;  %v3081_v12 = vld [vmem:[%s3967_s13 + $0x240] sm:$0xff] }
  0x7c   : > { %3604 = vmatprep.subr.msk.mxu0 %vm722_vm0, %v4235_v14  ;;  %3506 = vmatmul.mubr.msk.f32.gmra.mxu0 %vm673_vm1, %v3072_v16  ;;  %v3082_v16 = vld [vmem:[%s3967_s13 + $0x248] sm:$0xff] }
  0x7d   : > { %3480 = vmatmul.mubr.msk.f32.gmra.mxu1 %vm673_vm1, %v3038_v15  ;;  %3508 = vmatprep.mubr.msk.f32.mxu0 %vm673_vm1, %v3073_v18  ;;  %v3048_v15 = vld [vmem:[%s3967_s13 + $0x1a8] sm:$0xff]  ;;  %v3083_v18 = vld [vmem:[%s3967_s13 + $0x250] sm:$0xff] }
  0x7e   : > { %3482 = vmatprep.mubr.msk.f32.mxu1 %vm673_vm1, %v3039_v17  ;;  %v3049_v17 = vld [vmem:[%s3967_s13 + $0x1b0] sm:$0xff] }
  0x80   : > { %3509 = vmatmul.mubr.msk.f32.gmra.mxu0 %vm673_vm1, %v3074_v21  ;;  %v3084_v21 = vld [vmem:[%s3967_s13 + $0x258] sm:$0xff] }
  0x81   : > { %3483 = vmatmul.mubr.msk.f32.gmra.mxu1 %vm673_vm1, %v3040_v19  ;;  %3511 = vmatprep.mubr.msk.f32.mxu0 %vm673_vm1, %v3075_v26  ;;  %v3050_v19 = vld [vmem:[%s3967_s13 + $0x1b8] sm:$0xff]  ;;  %v3104_v26 = vld [vmem:[%s3967_s13 + $0x149] sm:$0xff] }
  0x82   : > { %3485 = vmatprep.mubr.msk.f32.mxu1 %vm673_vm1, %v3041_v25  ;;  %v3103_v25 = vld [vmem:[%s3967_s13 + $0x141] sm:$0xff] }
  0x84   : > { %3512 = vmatmul.mubr.msk.f32.gmra.mxu0 %vm673_vm1, %v3076_v38  ;;  %v3106_v38 = vld [vmem:[%s3967_s13 + $0x159] sm:$0xff] }
  0x85   : > { %3486 = vmatmul.mubr.msk.f32.gmra.mxu1 %vm673_vm1, %v3042_v37  ;;  %3514 = vmatprep.mubr.msk.f32.mxu0 %vm673_vm1, %v3077_v40  ;;  %v3105_v37 = vld [vmem:[%s3967_s13 + $0x151] sm:$0xff] }
  0x86   : > { %3488 = vmatprep.mubr.msk.f32.mxu1 %vm673_vm1, %v3043_v39  ;;  %v3152_v39 = vld [vmem:[%s3967_s13 + $0x88] sm:$0xff] }
  0x88   : > { %3515 = vmatmul.mubr.msk.f32.gmra.mxu0 %vm673_vm1, %v3078_v44 }
  0x89   : > { %3489 = vmatmul.mubr.msk.f32.gmra.mxu1 %vm673_vm1, %v3044_v43  ;;  %3517 = vmatprep.mubr.msk.f32.mxu0 %vm673_vm1, %v3079_v8 }
  0x8a   : > { %3491 = vmatprep.mubr.msk.f32.mxu1 %vm673_vm1, %v3045_v7 }
  0x8c   : > { %3518 = vmatmul.mubr.msk.f32.gmra.mxu0 %vm673_vm1, %v3080_v10 }
  0x8d   : > { %3492 = vmatmul.mubr.msk.f32.gmra.mxu1 %vm673_vm1, %v3046_v9  ;;  %3520 = vmatprep.mubr.msk.f32.mxu0 %vm673_vm1, %v3081_v12 }
  0x8e   : > { %3494 = vmatprep.mubr.msk.f32.mxu1 %vm673_vm1, %v3047_v11 }
  0x90   : > { %3521 = vmatmul.mubr.msk.f32.gmra.mxu0 %vm673_vm1, %v3082_v16 }
  0x91   : > { %3495 = vmatmul.mubr.msk.f32.gmra.mxu1 %vm673_vm1, %v3048_v15  ;;  %3523 = vmatprep.mubr.msk.f32.mxu0 %vm673_vm1, %v3083_v18 }
  0x92   : > { %3497 = vmatprep.mubr.msk.f32.mxu1 %vm673_vm1, %v3049_v17 }
  0x94   : > { %3524 = vmatmul.mubr.msk.f32.gmra.mxu0 %vm673_vm1, %v3084_v21 }
  0x95   : > { %3498 = vmatmul.mubr.msk.f32.gmra.mxu1 %vm673_vm1, %v3050_v19  ;;  %3554 = vmatprep.mubr.msk.f32.mxu0 %vm673_vm1, %v4060_v41  ;;  %v3107_v41 = vld [vmem:[%s3967_s13 + $0x161] sm:$0xff] }
  0x96   : > { %3528 = vmatprep.mubr.msk.f32.mxu1 %vm673_vm1, %v3103_v25 }
  0x98   : > { %3555 = vmatmul.mubr.msk.f32.vlgmr.msra.gmra.mxu0 %vm673_vm1, %v4080_v45  ;;  %v3108_v45 = vld [vmem:[%s3967_s13 + $0x169] sm:$0xff] }
  0x99   : > { %3529 = vmatmul.mubr.msk.f32.vlgmr.msra.gmra.mxu1 %vm673_vm1, %v3104_v26  ;;  %3605 = vmatpush3.msk.msra.mxu0 %vm722_vm0, %v4235_v14  ;;  %v3151_v14 = vld [vmem:[%s3967_s13 + $0x80] sm:$0xff] }
  0x9a   : > { %3579 = vmatpush3.msk.msra.mxu1 %vm722_vm0, %v4230_v13  ;;  %3531 = vmatprep.mubr.msk.f32.mxu1 %vm673_vm1, %v3105_v37  ;;  %v3109_v13 = vld [vmem:[%s3967_s13 + $0x171] sm:$0xff] }
  0x9b   : > { %3557 = vmatprep.mubr.msk.f32.mxu0 %vm673_vm1, %v4090_v47  ;;  %v3110_v47 = vld [vmem:[%s3967_s13 + $0x179] sm:$0xff] }
  0x9c   : > { %3558 = vmatmul.mubr.msk.f32.gmra.mxu0 %vm673_vm1, %v4108_v49  ;;  %v3111_v49 = vld [vmem:[%s3967_s13 + $0x181] sm:$0xff] }
  0x9d   : > { %3532 = vmatmul.mubr.msk.f32.gmra.mxu1 %vm673_vm1, %v3106_v38  ;;  %3560 = vmatprep.mubr.msk.f32.mxu0 %vm673_vm1, %v4114_v51  ;;  %v3112_v51 = vld [vmem:[%s3967_s13 + $0x189] sm:$0xff] }
  0x9e   : > { %3534 = vmatprep.mubr.msk.f32.mxu1 %vm673_vm1, %v3107_v41 }
  0xa0   : > { %3561 = vmatmul.mubr.msk.f32.gmra.mxu0 %vm673_vm1, %v4128_v53  ;;  %v3113_v53 = vld [vmem:[%s3967_s13 + $0x191] sm:$0xff] }
  0xa1   : > { %3535 = vmatmul.mubr.msk.f32.gmra.mxu1 %vm673_vm1, %v3108_v45  ;;  %3563 = vmatprep.mubr.msk.f32.mxu0 %vm673_vm1, %v4134_v55  ;;  %v3114_v55 = vld [vmem:[%s3967_s13 + $0x199] sm:$0xff] }
  0xa2   : > { %3537 = vmatprep.mubr.msk.f32.mxu1 %vm673_vm1, %v3109_v13 }
  0xa4   : > { %3564 = vmatmul.mubr.msk.f32.gmra.mxu0 %vm673_vm1, %v4148_v57  ;;  %v3115_v57 = vld [vmem:[%s3967_s13 + $0x1a1] sm:$0xff] }
  0xa5   : > { %3538 = vmatmul.mubr.msk.f32.gmra.mxu1 %vm673_vm1, %v3110_v47  ;;  %3566 = vmatprep.mubr.msk.f32.mxu0 %vm673_vm1, %v4154_v59  ;;  %v3116_v59 = vld [vmem:[%s3967_s13 + $0x1a9] sm:$0xff] }
  0xa6   : > { %3540 = vmatprep.mubr.msk.f32.mxu1 %vm673_vm1, %v3111_v49 }
  0xa8   : > { %3567 = vmatmul.mubr.msk.f32.gmra.mxu0 %vm673_vm1, %v4168_v61  ;;  %v3117_v61 = vld [vmem:[%s3967_s13 + $0x1b1] sm:$0xff] }
  0xa9   : > { %3541 = vmatmul.mubr.msk.f32.gmra.mxu1 %vm673_vm1, %v3112_v51  ;;  %3569 = vmatprep.mubr.msk.f32.mxu0 %vm673_vm1, %v4174_v63  ;;  %v3118_v63 = vld [vmem:[%s3967_s13 + $0x1b9] sm:$0xff] }
  0xaa   : > { %3543 = vmatprep.mubr.msk.f32.mxu1 %vm673_vm1, %v3113_v53 }
  0xac   : > { %3570 = vmatmul.mubr.msk.f32.gmra.mxu0 %vm673_vm1, %v4188_v1 }
  0xad   : > { %3544 = vmatmul.mubr.msk.f32.gmra.mxu1 %vm673_vm1, %v3114_v55  ;;  %3572 = vmatprep.mubr.msk.f32.mxu0 %vm673_vm1, %v4194_v3 }
  0xae   : > { %3546 = vmatprep.mubr.msk.f32.mxu1 %vm673_vm1, %v3115_v57 }
  0xb0   : > { %3573 = vmatmul.mubr.msk.f32.gmra.mxu0 %vm673_vm1, %v4208_v5 }
  0xb1   : > { %3547 = vmatmul.mubr.msk.f32.gmra.mxu1 %vm673_vm1, %v3116_v59  ;;  %3575 = vmatprep.mubr.msk.f32.mxu0 %vm673_vm1, %v3151_v14 }
  0xb2   : > { %3549 = vmatprep.mubr.msk.f32.mxu1 %vm673_vm1, %v3117_v61 }
  0xb4   : > { %3576 = vmatmul.mubr.msk.f32.gmra.mxu0 %vm673_vm1, %v3152_v39 }
  0xb5   : > { %3550 = vmatmul.mubr.msk.f32.gmra.mxu1 %vm673_vm1, %v3118_v63  ;;  %3606 = vmatprep.mubr.msk.f32.mxu0 %vm673_vm1, %v4063_v42 }
  0xb6   : > { %3580 = vmatprep.mubr.msk.f32.mxu1 %vm673_vm1, %v3981_v23  ;;  %v3186_v23 = vld [vmem:[%s3967_s13 + $0x128] sm:$0xff] }
  0xb8   : > { %3607 = vmatmul.mubr.msk.f32.vlgmr.msra.gmra.mxu0 %vm673_vm1, %v4083_v46 }
  0xb9   : > { %3581 = vmatmul.mubr.msk.f32.vlgmr.msra.gmra.mxu1 %vm673_vm1, %v3998_v27  ;;  %3609 = vmatprep.mubr.msk.f32.mxu0 %vm673_vm1, %v4093_v48 }
  0xba   : > { %3583 = vmatprep.mubr.msk.f32.mxu1 %vm673_vm1, %v4008_v29 }
  0xbc   : > { %3610 = vmatmul.mubr.msk.f32.gmra.mxu0 %vm673_vm1, %v4111_v50 }
  0xbd   : > { %3584 = vmatmul.mubr.msk.f32.gmra.mxu1 %vm673_vm1, %v4024_v31  ;;  %3612 = vmatprep.mubr.msk.f32.mxu0 %vm673_vm1, %v4117_v52 }
  0xbe   : > { %3586 = vmatprep.mubr.msk.f32.mxu1 %vm673_vm1, %v4030_v33 }
  0xc0   : > { %3613 = vmatmul.mubr.msk.f32.gmra.mxu0 %vm673_vm1, %v4131_v54 }
  0xc1   : > { %3587 = vmatmul.mubr.msk.f32.gmra.mxu1 %vm673_vm1, %v4044_v35  ;;  %3615 = vmatprep.mubr.msk.f32.mxu0 %vm673_vm1, %v4137_v56 }
  0xc2   : > { %3589 = vmatprep.mubr.msk.f32.mxu1 %vm673_vm1, %v3971_v20  ;;  %v3185_v20 = vld [vmem:[%s3967_s13 + $0x120] sm:$0xff] }
  0xc4   : > { %3616 = vmatmul.mubr.msk.f32.gmra.mxu0 %vm673_vm1, %v4151_v58 }
  0xc5   : > { %3590 = vmatmul.mubr.msk.f32.gmra.mxu1 %vm673_vm1, %v3978_v22  ;;  %3618 = vmatprep.mubr.msk.f32.mxu0 %vm673_vm1, %v4157_v60  ;;  %v3219_v22 = vld [vmem:[%s3967_s13 + $0x81] sm:$0xff] }
  0xc6   : > { %3592 = vmatprep.mubr.msk.f32.mxu1 %vm673_vm1, %v3984_v24  ;;  %v3220_v24 = vld [vmem:[%s3967_s13 + $0x89] sm:$0xff] }
  0xc8   : > { %3619 = vmatmul.mubr.msk.f32.gmra.mxu0 %vm673_vm1, %v4171_v62 }
  0xc9   : > { %3593 = vmatmul.mubr.msk.f32.gmra.mxu1 %vm673_vm1, %v4001_v28  ;;  %3621 = vmatprep.mubr.msk.f32.mxu0 %vm673_vm1, %v4177_v0 }
  0xca   : > { %3595 = vmatprep.mubr.msk.f32.mxu1 %vm673_vm1, %v4011_v30 }
  0xcc   : > { %3622 = vmatmul.mubr.msk.f32.gmra.mxu0 %vm673_vm1, %v4191_v2 }
  0xcd   : > { %3596 = vmatmul.mubr.msk.f32.gmra.mxu1 %vm673_vm1, %v4027_v32  ;;  %3624 = vmatprep.mubr.msk.f32.mxu0 %vm673_vm1, %v4197_v4 }
  0xce   : > { %3598 = vmatprep.mubr.msk.f32.mxu1 %vm673_vm1, %v4033_v34 }
  0xd0   : > { %3625 = vmatmul.mubr.msk.f32.gmra.mxu0 %vm673_vm1, %v4211_v6 }
  0xd1   : > { %3599 = vmatmul.mubr.msk.f32.gmra.mxu1 %vm673_vm1, %v4047_v36  ;;  %3627 = vmatprep.mubr.msk.f32.mxu0 %vm673_vm1, %v3219_v22 }
  0xd2   : > { %3601 = vmatprep.mubr.msk.f32.mxu1 %vm673_vm1, %v3185_v20 }
  0xd4   : > { %3628 = vmatmul.mubr.msk.f32.gmra.mxu0 %vm673_vm1, %v3220_v24 }
  0xd5   : > { %3602 = vmatmul.mubr.msk.f32.gmra.mxu1 %vm673_vm1, %v3186_v23 }
 0x108   : > { %v3400_v27 = vpop.f32.mrf.mxu0 }
 0x109   : > { %v3412_v28 = vpop.f32.mrf.mxu1 }
 0x10a   : > { %v792_v29 = vpop.f32.mrf.mxu0 }
 0x10b   : > { %v832_v30 = vpop.f32.mrf.mxu1 }
 0x10c   : > { %v3403_v31 = vpop.f32.mrf.mxu0 }
 0x10d   : > { %v3415_v32 = vpop.f32.mrf.mxu1 }
 0x10e   : > { %v802_v33 = vpop.f32.mrf.mxu0 }
 0x10f   : > { %v842_v34 = vpop.f32.mrf.mxu1 }
 0x110   : > { %v3406_v35 = vpop.f32.mrf.mxu0 }
 0x111   : > { %v3418_v36 = vpop.f32.mrf.mxu1 }
 0x112   : > { %v812_v42 = vpop.f32.mrf.mxu0 }
 0x113   : > { %v852_v46 = vpop.f32.mrf.mxu1 }
 0x114   : > { %v3409_v48 = vpop.f32.mrf.mxu0 }
 0x115   : > { %v3421_v50 = vpop.f32.mrf.mxu1 }
 0x116   : > { %v822_v52 = vpop.f32.mrf.mxu0 }
 0x117   : > { %v4431_v54 = vpop.f32.mrf.mxu1 }
 0x118   : > { %v3452_v58 = vpop.f32.mrf.mxu0 }
 0x119   : > { %v3426_v56 = vpop.f32.mrf.mxu1 }
 0x11a   : > { %v994_v60 = vadd.f32 %v3426_v56, %v3400_v27  ;;  %v1204_v0 = vpop.f32.mrf.mxu0 }
 0x11b   : > { %v988_v62 = vpop.f32.mrf.mxu1 }
 0x11c   : > { %v4433_v1 = vadd.f32 %v3452_v58, %v994_v60  ;;  %v989_v2 = vadd.f32 %v988_v62, %v792_v29  ;;  %v3455_v4 = vpop.f32.mrf.mxu0 }
 0x11d   : > { %v3429_v3 = vpop.f32.mrf.mxu1 }
 0x11e   : > { %v4435_v5 = vadd.f32 %v1204_v0, %v989_v2  ;;  %v1004_v6 = vadd.f32 %v3429_v3, %v3403_v31  ;;  %v1214_v43 = vpop.f32.mrf.mxu0 }
 0x11f   : > { %v998_v40 = vpop.f32.mrf.mxu1 }
 0x120   : > { %v4437_v44 = vadd.f32 %v3455_v4, %v1004_v6  ;;  %v999_v7 = vadd.f32 %v998_v40, %v802_v33  ;;  %v3458_v9 = vpop.f32.mrf.mxu0 }
 0x121   : > { %v3432_v8 = vpop.f32.mrf.mxu1 }
 0x122   : > { %v4439_v10 = vadd.f32 %v1214_v43, %v999_v7  ;;  %v1014_v11 = vadd.f32 %v3432_v8, %v3406_v35  ;;  %v1224_v15 = vpop.f32.mrf.mxu0 }
 0x123   : > { %v1008_v12 = vpop.f32.mrf.mxu1 }
 0x124   : > { %v4441_v16 = vadd.f32 %v3458_v9, %v1014_v11  ;;  %v1009_v17 = vadd.f32 %v1008_v12, %v812_v42  ;;  %v3461_v19 = vpop.f32.mrf.mxu0 }
 0x125   : > { %v3435_v18 = vpop.f32.mrf.mxu1 }
 0x126   : > { %v4443_v21 = vadd.f32 %v1224_v15, %v1009_v17  ;;  %v1024_v25 = vadd.f32 %v3435_v18, %v3409_v48  ;;  %v1234_v37 = vpop.f32.mrf.mxu0 }
 0x127   : > { %v1018_v26 = vpop.f32.mrf.mxu1 }
 0x128   : > { %v4445_v38 = vadd.f32 %v3461_v19, %v1024_v25  ;;  %v1019_v41 = vadd.f32 %v1018_v26, %v822_v52  ;;  %v3464_v13 = vpop.f32.mrf.mxu0 }
 0x129   : > { %v3438_v45 = vpop.f32.mrf.mxu1 }
 0x12a   : > { %v4447_v47 = vadd.f32 %v1234_v37, %v1019_v41  ;;  %v1034_v49 = vadd.f32 %v3438_v45, %v3412_v28  ;;  %v1244_v53 = vpop.f32.mrf.mxu0 }
 0x12b   : > { %v1028_v51 = vpop.f32.mrf.mxu1 }
 0x12c   : > { %v4449_v55 = vadd.f32 %v3464_v13, %v1034_v49  ;;  %v1029_v57 = vadd.f32 %v1028_v51, %v832_v30  ;;  %v3467_v61 = vpop.f32.mrf.mxu0 }
 0x12d   : > { %v3441_v59 = vpop.f32.mrf.mxu1 }
 0x12e   : > { %v4451_v14 = vadd.f32 %v1244_v53, %v1029_v57  ;;  %v1044_v63 = vadd.f32 %v3441_v59, %v3415_v32  ;;  %v1254_v20 = vpop.f32.mrf.mxu0 }
 0x12f   : > { %v1038_v39 = vpop.f32.mrf.mxu1 }
 0x130   : > { %v4453_v22 = vadd.f32 %v3467_v61, %v1044_v63  ;;  %v1039_v23 = vadd.f32 %v1038_v39, %v842_v34  ;;  %v3470_v27 = vpop.f32.mrf.mxu0 }
 0x131   : > { %v3444_v24 = vpop.f32.mrf.mxu1 }
 0x132   : > { %v4455_v29 = vadd.f32 %v1254_v20, %v1039_v23  ;;  %v1054_v28 = vadd.f32 %v3444_v24, %v3418_v36  ;;  %v1264_v33 = vpop.f32.mrf.mxu0 }
 0x133   : > { %v1048_v31 = vpop.f32.mrf.mxu1 }
 0x134   : > { %v4457_v35 = vadd.f32 %v3470_v27, %v1054_v28  ;;  %v1049_v30 = vadd.f32 %v1048_v31, %v852_v46  ;;  %v3473_v48 = vpop.f32.mrf.mxu0 }
 0x135   : > { %v3447_v42 = vpop.f32.mrf.mxu1 }
 0x136   : > { %v4459_v52 = vadd.f32 %v1264_v33, %v1049_v30  ;;  %v1064_v32 = vadd.f32 %v3447_v42, %v3421_v50  ;;  %v1274_v58 = vpop.f32.mrf.mxu0 }
 0x137   : > { %v1058_v56 = vpop.f32.mrf.mxu1 }
 0x138   : > { %v4461_v60 = vadd.f32 %v3473_v48, %v1064_v32  ;;  %v1059_v34 = vadd.f32 %v1058_v56, %v4431_v54  ;;  %v4464_v0 = vpop.f32.mrf.mxu0 }
 0x139   : > { %v3478_v62 = vpop.f32.mrf.mxu1 }
 0x13a   : > { %4754 = vst [vmem:[#allocation3_spill] sm:$0xff] %v4461_v60  ;;  %v4466_v36 = vadd.f32 %v1274_v58, %v1059_v34  ;;  %v4468_v3 = vpop.f32.mrf.mxu0 }
 0x13b   : > { %v1436_v2 = vpop.f32.mrf.mxu1 }
 0x13c   : > { %4755 = vst [vmem:[#allocation4_spill] sm:$0xff] %v4466_v36  ;;  %v4470_v4 = vpop.f32.mrf.mxu0 }
 0x13d   : > { %v3481_v46 = vpop.f32.mrf.mxu1 }
 0x13e   : > { %v4474_v50 = vpop.f32.mrf.mxu0 }
 0x13f   : > { %v4472_v6 = vpop.f32.mrf.mxu1 }
 0x140   : > { %v4478_v43 = vpop.f32.mrf.mxu0 }
 0x141   : > { %v4476_v40 = vpop.f32.mrf.mxu1 }
 0x142   : > { %v4482_v7 = vpop.f32.mrf.mxu0 }
 0x143   : > { %v4480_v54 = vpop.f32.mrf.mxu1 }
 0x144   : > { %v4486_v9 = vpop.f32.mrf.mxu0 }
 0x145   : > { %v4484_v8 = vpop.f32.mrf.mxu1 }
 0x146   : > { %v4490_v12 = vpop.f32.mrf.mxu0 }
 0x147   : > { %v4488_v11 = vpop.f32.mrf.mxu1 }
 0x148   : > { %v4494_v17 = vpop.f32.mrf.mxu0 }
 0x149   : > { %v4492_v15 = vpop.f32.mrf.mxu1 }
 0x14a   : > { %v4498_v19 = vpop.f32.mrf.mxu0 }
 0x14b   : > { %v4496_v18 = vpop.f32.mrf.mxu1 }
 0x14c   : > { %v4502_v26 = vpop.f32.mrf.mxu0 }
 0x14d   : > { %v4500_v25 = vpop.f32.mrf.mxu1 }
 0x14e   : > { %v4506_v41 = vpop.f32.mrf.mxu0 }
 0x14f   : > { %v4504_v37 = vpop.f32.mrf.mxu1  ;;  %4756 = vst [vmem:[#allocation5_spill] sm:$0xff] %v4506_v41 }
 0x150   : > { %v4510_v13 = vpop.f32.mrf.mxu0 }
 0x151   : > { %v4508_v45 = vpop.f32.mrf.mxu1  ;;  %4757 = vst [vmem:[#allocation6_spill] sm:$0xff] %v4510_v13  ;;  %v2715_v13 = vld [vmem:[%s4752_s3] sm:$0x1] }
 0x152   : > { %v4514_v51 = vpop.f32.mrf.mxu0  ;;  %vm2716_vm2 = vcmp.gt.f32.partialorder %v2715_v13, 0.5 }
 0x153   : > { %v4512_v49 = vpop.f32.mrf.mxu1  ;;  %4758 = vst [vmem:[#allocation7_spill] sm:$0xff] %v4514_v51 }
 0x154   : > { %v4518_v57 = vpop.f32.mrf.mxu0 }
 0x155   : > { %v4516_v53 = vpop.f32.mrf.mxu1  ;;  %4760 = vst [vmem:[#allocation9_spill] sm:$0xff] %v4518_v57 }
 0x156   : > { %4759 = vst [vmem:[#allocation8_spill] sm:$0xff] %v4516_v53  ;;  %v4522_v61 = vpop.f32.mrf.mxu0 }
 0x157   : > { %v4520_v59 = vpop.f32.mrf.mxu1  ;;  %4762 = vst [vmem:[#allocation11_spill] sm:$0xff] %v4522_v61 }
 0x158   : > { %4761 = vst [vmem:[#allocation10_spill] sm:$0xff] %v4520_v59  ;;  %v3556_v39 = vpop.f32.mrf.mxu0  ;;  %v2734_v59 = vlaneseq }
 0x159   : > { %v3530_v63 = vpop.f32.mrf.mxu1 }
 0x15a   : > { %v2133_v23 = vpop.f32.mrf.mxu0 }
 0x15b   : > { %v1900_v20 = vpop.f32.mrf.mxu1 }
 0x15c   : > { %v4524_v27 = vpop.f32.mrf.mxu0 }
 0x15d   : > { %v3533_v24 = vpop.f32.mrf.mxu1 }
 0x15e   : > { %v4526_v31 = vpop.f32.mrf.mxu0 }
 0x15f   : > { %v1910_v28 = vpop.f32.mrf.mxu1 }
 0x160   : > { %v4530_v30 = vpop.f32.mrf.mxu0 }
 0x161   : > { %v4528_v33 = vpop.f32.mrf.mxu1 }
 0x162   : > { %v4534_v48 = vpop.f32.mrf.mxu0 }
 0x163   : > { %v4532_v42 = vpop.f32.mrf.mxu1  ;;  %4763 = vst [vmem:[#allocation12_spill] sm:$0xff] %v4534_v48 }
 0x164   : > { %v4538_v56 = vpop.f32.mrf.mxu0 }
 0x165   : > { %v4536_v32 = vpop.f32.mrf.mxu1  ;;  %4764 = vst [vmem:[#allocation13_spill] sm:$0xff] %v4538_v56  ;;  %v1516_v56 = vadd.f32 %v3478_v62, %v4433_v1  ;;  %v3716_v62 = vmov 0  }
 0x166   : > { %v4542_v34 = vpop.f32.mrf.mxu0 }
 0x167   : > { %v4540_v58 = vpop.f32.mrf.mxu1  ;;  %4766 = vst [vmem:[#allocation15_spill] sm:$0xff] %v4542_v34  ;;  %v2735_v34 = vshrl.u32 %v2734_v59, 7  ;;  %v2733_v59 = vsel %vm2716_vm2, 1, %v3716_v62 }
 0x168   : > { %4765 = vst [vmem:[#allocation14_spill] sm:$0xff] %v4540_v58  ;;  %v4546_v57 = vpop.f32.mrf.mxu0 }
 0x169   : > { %v4544_v61 = vpop.f32.mrf.mxu1  ;;  %4768 = vst [vmem:[#allocation17_spill] sm:$0xff] %v4546_v57  ;;  %v1515_v57 = vadd.f32 %v1436_v2, %v4435_v5  ;;  %v2736_v58 = vsub.s32 0, %v2735_v34  ;;  %v1517_v5 = vadd.f32 %v4472_v6, %v4439_v10  ;;  %v1522_v10 = vadd.f32 %v4484_v8, %v4445_v38 }
 0x16a   : > { %4767 = vst [vmem:[#allocation16_spill] sm:$0xff] %v4544_v61  ;;  %v4550_v53 = vpop.f32.mrf.mxu0 }
 0x16b   : > { %v4548_v36 = vpop.f32.mrf.mxu1  ;;  %4770 = vst [vmem:[#allocation19_spill] sm:$0xff] %v4550_v53 }
 0x16c   : > { %4769 = vst [vmem:[#allocation18_spill] sm:$0xff] %v4548_v36  ;;  %v4554_v51 = vpop.f32.mrf.mxu0  ;;  %v1518_v36 = vadd.f32 %v3481_v46, %v4437_v44  ;;  %v4584_v46 = vrot.slane %v2733_v59, %v2736_v58 }
 0x16d   : > { %v4552_v60 = vpop.f32.mrf.mxu1  ;;  %4772 = vst [vmem:[#allocation21_spill] sm:$0xff] %v4554_v51  ;;  %v1748_v51 = vadd.f32 %v4464_v0, %v1516_v56  ;;  %v1520_v56 = vadd.f32 %v4476_v40, %v4441_v16  ;;  %v1524_v16 = vadd.f32 %v4492_v15, %v4449_v55  ;;  %v1754_v55 = vadd.f32 %v4486_v9, %v1522_v10 }
 0x16e   : > { %4771 = vst [vmem:[#allocation20_spill] sm:$0xff] %v4552_v60  ;;  %v4562_v61 = vpop.f32.mrf.mxu0  ;;  %v1750_v44 = vadd.f32 %v4470_v4, %v1518_v36  ;;  %v1521_v36 = vadd.f32 %v4488_v11, %v4447_v47  ;;  %vm2738_vm3 = vcmp.eq.s32.totalorder %v4584_v46, 1  ;;  %v4617_v11 = vld [vmem:[%s4751_s2] ss:$0 sm:$0xff] }
 0x16f   : > { %v4560_v41 = vpop.f32.mrf.mxu1  ;;  %4773 = vst [vmem:[#allocation22_spill] sm:$0xff] %v4562_v61  ;;  %v1747_v61 = vadd.f32 %v4468_v3, %v1515_v57  ;;  %v1980_v2 = vadd.f32 %v3530_v63, %v1748_v51  ;;  %v1519_v3 = vadd.f32 %v4480_v54, %v4443_v21  ;;  %v1749_v57 = vadd.f32 %v4474_v50, %v1517_v5 }
 0x170   : > { %v4567_v60 = vpop.f32.mrf.mxu0  ;;  %v1523_v21 = vadd.f32 %v4496_v18, %v4451_v14  ;;  %v1752_v47 = vadd.f32 %v4478_v43, %v1520_v56  ;;  %v1526_v14 = vadd.f32 %v4500_v25, %v4453_v22 }
 0x171   : > { %v4565_v53 = vpop.f32.mrf.mxu1  ;;  %4774 = vst [vmem:[#allocation23_spill] sm:$0xff] %v4567_v60  ;;  %v1979_v0 = vadd.f32 %v1900_v20, %v1747_v61  ;;  %v2213_v4 = vadd.f32 %v3556_v39, %v1980_v2  ;;  %v1982_v61 = vadd.f32 %v3533_v24, %v1750_v44  ;;  %v1981_v8 = vadd.f32 %v1910_v28, %v1749_v57 }
 0x172   : > { %v4573_v1 = vpop.f32.mrf.mxu0  ;;  %v1751_v50 = vadd.f32 %v4482_v7, %v1519_v3  ;;  %v1753_v39 = vadd.f32 %v4490_v12, %v1521_v36  ;;  %v1756_v7 = vadd.f32 %v4494_v17, %v1524_v16  ;;  %v1755_v9 = vadd.f32 %v4498_v19, %v1523_v21  ;;  %v4778_v16 = vld [vmem:[#allocation13_spill] sm:$0xff] }
 0x173   : > { %v4571_v48 = vpop.f32.mrf.mxu1  ;;  %v2212_v54 = vadd.f32 %v2133_v23, %v1979_v0  ;;  %v2215_v20 = vadd.f32 %v4524_v27, %v1982_v61  ;;  %v1984_v24 = vadd.f32 %v4528_v33, %v1752_v47  ;;  %v2214_v58 = vadd.f32 %v4526_v31, %v1981_v8 }
 0x174   : > { %v4580_v60 = vpop.f32.mrf.mxu0  ;;  %v1983_v22 = vadd.f32 %v4532_v42, %v1751_v50  ;;  %v1758_v27 = vadd.f32 %v4502_v26, %v1526_v14  ;;  %v1525_v17 = vadd.f32 %v4504_v37, %v4455_v29  ;;  %v1528_v19 = vadd.f32 %v4508_v45, %v4457_v35  ;;  %v4775_v37 = vld [vmem:[#allocation12_spill] sm:$0xff]  ;;  %v4780_v50 = vld [vmem:[#allocation6_spill] sm:$0xff]  ;;  %v4781_v14 = vld [vmem:[#allocation7_spill] sm:$0xff] }
 0x175   : > { %v4578_v13 = vpop.f32.mrf.mxu1  ;;  %v1986_v33 = vadd.f32 %v4536_v32, %v1754_v55  ;;  %v1527_v29 = vadd.f32 %v4512_v49, %v4459_v52  ;;  %v2217_v35 = vadd.f32 %v4530_v30, %v1984_v24  ;;  %v4776_v32 = vld [vmem:[#allocation14_spill] sm:$0xff]  ;;  %v4779_v49 = vld [vmem:[#allocation16_spill] sm:$0xff] }
 0x176   : > { %v4594_v51 = vpop.f32.mrf.mxu0  ;;  %v2216_v45 = vadd.f32 %v4775_v37, %v1983_v22  ;;  %v1985_v44 = vadd.f32 %v4776_v32, %v1753_v39  ;;  %v1988_v30 = vadd.f32 %v4779_v49, %v1756_v7  ;;  %v1760_v55 = vadd.f32 %v4780_v50, %v1528_v19  ;;  %v4788_v37 = vld [vmem:[#allocation4_spill] sm:$0xff] }
 0x177   : > { %v4592_v6 = vpop.f32.mrf.mxu1  ;;  %v2219_v52 = vadd.f32 %v4778_v16, %v1986_v33  ;;  %v4791_v16 = vld [vmem:[#allocation21_spill] sm:$0xff] }
 0x178   : > { %v3608_v38 = vpop.f32.mrf.mxu0  ;;  %v1992_v49 = vadd.f32 %v4565_v53, %v1760_v55 }
 0x179   : > { %v3582_v40 = vpop.f32.mrf.mxu1 }
 0x17a   : > { %v2445_v63 = vadd.f32 %v3582_v40, %v2213_v4  ;;  %v2597_v18 = vpop.f32.mrf.mxu0  ;;  %v4777_v4 = vld [vmem:[#allocation5_spill] sm:$0xff] }
 0x17b   : > { %v2365_v15 = vpop.f32.mrf.mxu1  ;;  %v1757_v61 = vadd.f32 %v4777_v4, %v1525_v17 }
 0x17c   : > { %v2677_v23 = vadd.f32 %v3608_v38, %v2445_v63  ;;  %v2444_v43 = vadd.f32 %v2365_v15, %v2212_v54  ;;  %v3611_v28 = vpop.f32.mrf.mxu0  ;;  %v1759_v15 = vadd.f32 %v4781_v14, %v1527_v29  ;;  %v4787_v29 = vld [vmem:[#allocation8_spill] sm:$0xff] }
 0x17d   : > { %v3585_v25 = vpop.f32.mrf.mxu1 }
 0x17e   : > { %v2700_v34 = vadd.f32 %v4617_v11, %v2677_v23  ;;  %v2676_v12 = vadd.f32 %v2597_v18, %v2444_v43  ;;  %v2447_v62 = vadd.f32 %v3585_v25, %v2215_v20  ;;  %v2607_v59 = vpop.f32.mrf.mxu0  ;;  %v4782_v18 = vld [vmem:[#allocation15_spill] sm:$0xff] }
 0x17f   : > { %v2375_v42 = vpop.f32.mrf.mxu1  ;;  %v2218_v39 = vadd.f32 %v4782_v18, %v1985_v44 }
 0x180   : > { %v2718_v31 = vmax.f32 %v2700_v34, 0.0  ;;  %v2699_v5 = vadd.f32 %v4617_v11, %v2676_v12  ;;  %v2679_v26 = vadd.f32 %v3611_v28, %v2447_v62  ;;  %v2446_v2 = vadd.f32 %v2375_v42, %v2214_v58  ;;  %v3614_v56 = vpop.f32.mrf.mxu0  ;;  %v4783_v28 = vld [vmem:[#allocation17_spill] sm:$0xff]  ;;  %v4785_v62 = vld [vmem:[#allocation20_spill] sm:$0xff] }
 0x181   : > { %v3588_v0 = vpop.f32.mrf.mxu1  ;;  %v2221_v58 = vadd.f32 %v4783_v28, %v1988_v30  ;;  %v1990_v17 = vadd.f32 %v4785_v62, %v1758_v27  ;;  %v1989_v27 = vadd.f32 %v4560_v41, %v1757_v61 }
 0x182   : > { %v2740_v3 = vsel %vm2738_vm3, %v2718_v31, %v2700_v34  ;;  %v2717_v10 = vmax.f32 %v2699_v5, 0.0  ;;  %v2702_v57 = vadd.f32 %v4617_v11, %v2679_v26  ;;  %v2678_v36 = vadd.f32 %v2607_v59, %v2446_v2  ;;  %v2617_v38 = vpop.f32.mrf.mxu0  ;;  %v4784_v34 = vld [vmem:[#allocation18_spill] sm:$0xff]  ;;  %v4786_v2 = vld [vmem:[#allocation3_spill] sm:$0xff] }
 0x183   : > { %2756 = vst [vmem:[%s4637_s12 + $0x8] sm:$0xff] %v2740_v3  ;;  %v2449_v21 = vadd.f32 %v3588_v0, %v2217_v35  ;;  %v2385_v40 = vpop.f32.mrf.mxu1  ;;  %v1987_v12 = vadd.f32 %v4784_v34, %v1755_v9  ;;  %v1530_v35 = vadd.f32 %v4787_v29, %v4786_v2 }
 0x184   : > { %v2739_v54 = vsel %vm2738_vm3, %v2717_v10, %v2699_v5  ;;  %v2720_v8 = vmax.f32 %v2702_v57, 0.0  ;;  %v2701_v63 = vadd.f32 %v4617_v11, %v2678_v36  ;;  %v2448_v47 = vadd.f32 %v2385_v40, %v2216_v45  ;;  %v3617_v43 = vpop.f32.mrf.mxu0  ;;  %v4789_v45 = vld [vmem:[#allocation10_spill] sm:$0xff]  ;;  %v4790_v36 = vld [vmem:[#allocation19_spill] sm:$0xff] }
 0x185   : > { %2755 = vst [vmem:[%s4637_s12] sm:$0xff] %v2739_v54  ;;  %v2681_v20 = vadd.f32 %v3614_v56, %v2449_v21  ;;  %v3591_v23 = vpop.f32.mrf.mxu1  ;;  %v1529_v9 = vadd.f32 %v4789_v45, %v4788_v37  ;;  %v2220_v4 = vadd.f32 %v4790_v36, %v1987_v12 }
 0x186   : > { %v2742_v7 = vsel %vm2738_vm3, %v2720_v8, %v2702_v57  ;;  %v2719_v24 = vmax.f32 %v2701_v63, 0.0  ;;  %v2680_v22 = vadd.f32 %v2617_v38, %v2448_v47  ;;  %v2451_v25 = vadd.f32 %v3591_v23, %v2219_v52  ;;  %v2627_v42 = vpop.f32.mrf.mxu0  ;;  %v4792_v8 = vld [vmem:[#allocation22_spill] sm:$0xff]  ;;  %v4793_v23 = vld [vmem:[#allocation9_spill] sm:$0xff] }
 0x187   : > { %2758 = vst [vmem:[%s4637_s12 + $0x18] sm:$0xff] %v2742_v7  ;;  %v2704_v19 = vadd.f32 %v4617_v11, %v2681_v20  ;;  %v2395_v33 = vpop.f32.mrf.mxu1  ;;  %v2223_v52 = vadd.f32 %v4791_v16, %v1990_v17  ;;  %v1991_v47 = vadd.f32 %v4571_v48, %v1759_v15  ;;  %v4794_v7 = vld [vmem:[#allocation11_spill] sm:$0xff] }
 0x188   : > { %v2741_v59 = vsel %vm2738_vm3, %v2719_v24, %v2701_v63  ;;  %v2703_v31 = vadd.f32 %v4617_v11, %v2680_v22  ;;  %v2683_v5 = vadd.f32 %v3617_v43, %v2451_v25  ;;  %v2450_v26 = vadd.f32 %v2395_v33, %v2218_v39  ;;  %v3620_v0 = vpop.f32.mrf.mxu0  ;;  %v4795_v22 = vld [vmem:[#allocation23_spill] sm:$0xff] }
 0x189   : > { %2757 = vst [vmem:[%s4637_s12 + $0x10] sm:$0xff] %v2741_v59  ;;  %v2722_v32 = vmax.f32 %v2704_v19, 0.0  ;;  %v3594_v44 = vpop.f32.mrf.mxu1  ;;  %v2222_v63 = vadd.f32 %v4792_v8, %v1989_v27  ;;  %v1762_v43 = vadd.f32 %v4793_v23, %v1530_v35  ;;  %v1761_v24 = vadd.f32 %v4794_v7, %v1529_v9 }
 0x18a   : > { %v2721_v56 = vmax.f32 %v2703_v31, 0.0  ;;  %v2706_v3 = vadd.f32 %v4617_v11, %v2683_v5  ;;  %v2682_v10 = vadd.f32 %v2627_v42, %v2450_v26  ;;  %v2453_v57 = vadd.f32 %v3594_v44, %v2221_v58  ;;  %v2637_v61 = vpop.f32.mrf.mxu0 }
 0x18b   : > { %v2744_v30 = vsel %vm2738_vm3, %v2722_v32, %v2704_v19  ;;  %v2405_v41 = vpop.f32.mrf.mxu1  ;;  %v2225_v25 = vadd.f32 %v4795_v22, %v1992_v49  ;;  %v2224_v17 = vadd.f32 %v4573_v1, %v1991_v47  ;;  %v1994_v19 = vadd.f32 %v4578_v13, %v1762_v43 }
 0x18c   : > { %2760 = vst [vmem:[%s4637_s12 + $0x28] sm:$0xff] %v2744_v30  ;;  %v2743_v21 = vsel %vm2738_vm3, %v2721_v56, %v2703_v31  ;;  %v2724_v40 = vmax.f32 %v2706_v3, 0.0  ;;  %v2705_v38 = vadd.f32 %v4617_v11, %v2682_v10  ;;  %v2685_v54 = vadd.f32 %v3620_v0, %v2453_v57  ;;  %v3623_v55 = vpop.f32.mrf.mxu0 }
 0x18d   : > { %2759 = vst [vmem:[%s4637_s12 + $0x20] sm:$0xff] %v2743_v21  ;;  %v2452_v53 = vadd.f32 %v2405_v41, %v2220_v4  ;;  %v3597_v50 = vpop.f32.mrf.mxu1  ;;  %v1993_v33 = vadd.f32 %v4592_v6, %v1761_v24  ;;  %v2227_v27 = vadd.f32 %v4580_v60, %v1994_v19 }
 0x18e   : > { %v2746_v14 = vsel %vm2738_vm3, %v2724_v40, %v2706_v3  ;;  %v2723_v18 = vmax.f32 %v2705_v38, 0.0  ;;  %v2708_v39 = vadd.f32 %v4617_v11, %v2685_v54  ;;  %v2455_v20 = vadd.f32 %v3597_v50, %v2223_v52  ;;  %v2647_v28 = vpop.f32.mrf.mxu0 }
 0x18f   : > { %2762 = vst [vmem:[%s4637_s12 + $0x38] sm:$0xff] %v2746_v14  ;;  %v2684_v48 = vadd.f32 %v2637_v61, %v2452_v53  ;;  %v2415_v15 = vpop.f32.mrf.mxu1  ;;  %v2226_v32 = vadd.f32 %v4594_v51, %v1993_v33 }
 0x190   : > { %v2745_v58 = vsel %vm2738_vm3, %v2723_v18, %v2705_v38  ;;  %v2726_v34 = vmax.f32 %v2708_v39, 0.0  ;;  %v2687_v12 = vadd.f32 %v3623_v55, %v2455_v20  ;;  %v2454_v62 = vadd.f32 %v2415_v15, %v2222_v63  ;;  %v3626_v31 = vpop.f32.mrf.mxu0 }
 0x191   : > { %2761 = vst [vmem:[%s4637_s12 + $0x30] sm:$0xff] %v2745_v58  ;;  %v2707_v42 = vadd.f32 %v4617_v11, %v2684_v48  ;;  %v3600_v59 = vpop.f32.mrf.mxu1 }
 0x192   : > { %v2748_v5 = vsel %vm2738_vm3, %v2726_v34, %v2708_v39  ;;  %v2710_v26 = vadd.f32 %v4617_v11, %v2687_v12  ;;  %v2686_v2 = vadd.f32 %v2647_v28, %v2454_v62  ;;  %v2457_v29 = vadd.f32 %v3600_v59, %v2225_v25  ;;  %v2657_v13 = vpop.f32.mrf.mxu0 }
 0x193   : > { %2764 = vst [vmem:[%s4637_s12 + $0x48] sm:$0xff] %v2748_v5  ;;  %v2725_v35 = vmax.f32 %v2707_v42, 0.0  ;;  %v2425_v1 = vpop.f32.mrf.mxu1 }
 0x194   : > { %v2728_v37 = vmax.f32 %v2710_v26, 0.0  ;;  %v2709_v6 = vadd.f32 %v4617_v11, %v2686_v2  ;;  %v2689_v45 = vadd.f32 %v3626_v31, %v2457_v29  ;;  %v2456_v9 = vadd.f32 %v2425_v1, %v2224_v17  ;;  %v3629_v56 = vpop.f32.mrf.mxu0 }
 0x195   : > { %v2747_v44 = vsel %vm2738_vm3, %v2725_v35, %v2707_v42  ;;  %v3603_v0 = vpop.f32.mrf.mxu1 }
 0x196   : > { %2763 = vst [vmem:[%s4637_s12 + $0x40] sm:$0xff] %v2747_v44  ;;  %v2750_v3 = vsel %vm2738_vm3, %v2728_v37, %v2710_v26  ;;  %v2727_v10 = vmax.f32 %v2709_v6, 0.0  ;;  %v2712_v57 = vadd.f32 %v4617_v11, %v2689_v45  ;;  %v2688_v36 = vadd.f32 %v2657_v13, %v2456_v9  ;;  %v2667_v41 = vpop.f32.mrf.mxu0 }
 0x197   : > { %2766 = vst [vmem:[%s4637_s12 + $0x58] sm:$0xff] %v2750_v3  ;;  %v2459_v4 = vadd.f32 %v3603_v0, %v2227_v27  ;;  %v2435_v60 = vpop.f32.mrf.mxu1 }
 0x198   : > { %v2749_v51 = vsel %vm2738_vm3, %v2727_v10, %v2709_v6  ;;  %v2730_v16 = vmax.f32 %v2712_v57, 0.0  ;;  %v2711_v52 = vadd.f32 %v4617_v11, %v2688_v36  ;;  %v2458_v49 = vadd.f32 %v2435_v60, %v2226_v32 }
 0x199   : > { %2765 = vst [vmem:[%s4637_s12 + $0x50] sm:$0xff] %v2749_v51  ;;  %v2691_v30 = vadd.f32 %v3629_v56, %v2459_v4 }
 0x19a   : > { %v2752_v61 = vsel %vm2738_vm3, %v2730_v16, %v2712_v57  ;;  %v2729_v21 = vmax.f32 %v2711_v52, 0.0  ;;  %v2690_v40 = vadd.f32 %v2667_v41, %v2458_v49 }
 0x19b   : > { %2768 = vst [vmem:[%s4637_s12 + $0x68] sm:$0xff] %v2752_v61  ;;  %v2714_v38 = vadd.f32 %v4617_v11, %v2691_v30 }
 0x19c   : > { %v2751_v54 = vsel %vm2738_vm3, %v2729_v21, %v2711_v52  ;;  %v2713_v8 = vadd.f32 %v4617_v11, %v2690_v40 }
 0x19d   : > { %2767 = vst [vmem:[%s4637_s12 + $0x60] sm:$0xff] %v2751_v54  ;;  %v2732_v63 = vmax.f32 %v2714_v38, 0.0 }
 0x19e   : > { %v2731_v47 = vmax.f32 %v2713_v8, 0.0 }
 0x19f   : > { %v2754_v53 = vsel %vm2738_vm3, %v2732_v63, %v2714_v38 }
 0x1a0   : > { %2770 = vst [vmem:[%s4637_s12 + $0x78] sm:$0xff] %v2754_v53  ;;  %v2753_v50 = vsel %vm2738_vm3, %v2731_v47, %v2713_v8 }
 0x1a1   : > { %2769 = vst [vmem:[%s4637_s12 + $0x70] sm:$0xff] %v2753_v50 }
 0x1a2 PF: > { %s14_s19 = sadd.s32 1, %s3714_s19   ;;  %s4796_s15 = smov %s3702_s16 }
 0x1a3   : > { %p11_p10 = scmp.ge.s32.totalorder %s14_s19, 4   ;;  %s4797_s16 = smov %s3777_s23 }
 0x1a4   : > { %s4798_s17 = smov %s3710_s18  ;;  %s4799_s18 = smov %s4801_s20 }
 0x1a5   :  { %13 = sbr.rel (!%p11_p10) target bundleno = 3 (0x3), region = 135 }

// kernel: faster_block_forward.3
= control target key start
LH: loop header
LB: loop body
LE: loop exit
PB: predicated region body
PF: predicated region fallthrough
CT: control target
= control target key end

     0   :  { %s3367_s15 = smov 0   ;;  %s3369_s16 = smov 0   ;;  %s4109_s0 = inlined_call_operand.vmem [shape: f32[1,2,176,8], index: 0, kind: input, shape index: {}]   ;;  %s4110_s1 = inlined_call_operand.vmem [shape: f32[9,8,128], index: 1, kind: input, shape index: {}]   ;;  %s4111_s2 = inlined_call_operand.vmem [shape: f32[1,128], index: 2, kind: input, shape index: {}]   ;;  %s4112_s3 = inlined_call_operand.vmem [shape: f32[2,128,128], index: 3, kind: input, shape index: {}]   ;;  %s4113_s4 = inlined_call_operand.vmem [shape: f32[2,128,128], index: 4, kind: output, shape index: {}]  }
   0x1   :  { %s3371_s17 = smov 0  }
   0x2 LB: > { %s33_s18 = sadd.s32 1, %s3336_s16  ;;  %p2613_p0 = scmp.ge.s32.totalorder %s3340_s17, 1  ;;  %s3340_s17 = sphi %s3371_s17, %s14_s17   ;;  %s3336_s16 = sphi %s3369_s16, %s4153_s16   ;;  %s3332_s15 = sphi %s3367_s15, %s4152_s15  }
   0x3   : > { %p35_p1 = scmp.ge.s32.totalorder %s33_s18, 2  ;;  %p224_p2 = scmp.lt.s32.totalorder %s3340_s17, 3 }
   0x5   : > { %s4155_s18 = smov (%p35_p1, %s33_s18), 0  ;;  %p225_p3 = pnand %p2613_p0, %p224_p2 }
   0x7   : > { %228 = sbr.rel (%p225_p3) target bundleno = 367 (0x16f), region = 36 }
   0xc   : > { %v2635_v0 = vld [vmem:[%s4110_s1 + $0x8] sm:$0xff]  ;;  %p276_p4 = scmp.lt.s32.totalorder %s3332_s15, 1  ;;  %v333_v1 = vld [vmem:[%s4110_s1] sm:$0xff]  ;;  %v2684_v2 = vld [vmem:[%s4110_s1 + $0x10] sm:$0xff]  ;;  %vm354_vm0 = vcmask 64512  }
   0xd   : > { %3291 = vmatprep.subr.mxu1 %v2635_v0  ;;  %3057 = vmatprep.subr.mxu0 %v2635_v0  ;;  %v2717_v9 = vld [vmem:[%s4110_s1 + $0x18] sm:$0xff]  ;;  %v2750_v10 = vld [vmem:[%s4110_s1 + $0x20] sm:$0xff]  ;;  %v3499_v27 = vld [vmem:[%s4110_s1 + $0x28] sm:$0xff] }
   0xe   : > { %3292 = vmatpush3.msra.mxu1 %v2635_v0  ;;  %3058 = vmatpush3.msra.mxu0 %v2635_v0  ;;  %s4157_s15 = smov (!%p276_p4, %s3332_s15), 1  ;;  %v3504_v28 = vld [vmem:[%s4110_s1 + $0x30] sm:$0xff]  ;;  %v2849_v55 = vld [vmem:[%s4110_s1 + $0x38] sm:$0xff]  ;;  %v2882_v56 = vld [vmem:[%s4110_s1 + $0x40] sm:$0xff] }
   0xf   : > { %3083 = vmatprep.subr.mxu1 %v333_v1  ;;  %3109 = vmatprep.subr.mxu0 %v2684_v2  ;;  %s3293_s25 = smul.u32 176, %s4157_s15  ;;  %s2902_s19 = sshll.u32 %s4157_s15, 7 }
  0x10   : > { %s3991_s22 = scalar_lea.vmem %s4112_s3, %s2902_s19  ;;  %s4027_s27 = scalar_lea.vmem %s4113_s4, %s2902_s19 }
  0x11   : > { %s3400_s28 = scalar_lea.vmem %s4109_s0, %s3293_s25 }
  0x12   : > { %v2619_v3 = vld [vmem:[%s3400_s28 + $0x1] sm:$0xff]  ;;  %v2620_v5 = vld [vmem:[%s3400_s28 + $0x9] sm:$0xff]  ;;  %v3414_v7 = vld [vmem:[%s3400_s28 + $0x11] sm:$0xff] }
  0x13   : > { %v3404_v4 = vld [vmem:[%s3400_s28 + $0x41] sm:$0xff]  ;;  %3059 = vmatprep.mubr.msk.f32.mxu0 %vm354_vm0, %v2619_v3  ;;  %v3411_v6 = vld [vmem:[%s3400_s28 + $0x49] sm:$0xff]  ;;  %v3417_v8 = vld [vmem:[%s3400_s28 + $0x51] sm:$0xff] }
  0x14   : > { %3071 = vmatprep.mubr.msk.f32.mxu1 %vm354_vm0, %v3404_v4  ;;  %3060 = vmatmul.mubr.msk.f32.vlgmr.msra.gmra.mxu0 %vm354_vm0, %v2620_v5  ;;  %v3429_v11 = vld [vmem:[%s3400_s28 + $0x19] sm:$0xff]  ;;  %v3439_v13 = vld [vmem:[%s3400_s28 + $0x21] sm:$0xff]  ;;  %v3453_v15 = vld [vmem:[%s3400_s28 + $0x29] sm:$0xff] }
  0x15   : > { %3072 = vmatmul.mubr.msk.f32.vlgmr.msra.gmra.mxu1 %vm354_vm0, %v3411_v6  ;;  %3110 = vmatpush3.msra.mxu0 %v2684_v2  ;;  %v3432_v12 = vld [vmem:[%s3400_s28 + $0x59] sm:$0xff]  ;;  %v3442_v14 = vld [vmem:[%s3400_s28 + $0x61] sm:$0xff]  ;;  %v3456_v16 = vld [vmem:[%s3400_s28 + $0x69] sm:$0xff] }
  0x16   : > { %3084 = vmatpush3.msra.mxu1 %v333_v1  ;;  %3062 = vmatprep.mubr.msk.f32.mxu0 %vm354_vm0, %v3414_v7  ;;  %v3459_v17 = vld [vmem:[%s3400_s28 + $0x31] sm:$0xff]  ;;  %v3473_v19 = vld [vmem:[%s3400_s28 + $0x39] sm:$0xff]  ;;  %v2668_v22 = vld [vmem:[%s3400_s28 + $0x2] sm:$0xff] }
  0x17   : > { %3074 = vmatprep.mubr.msk.f32.mxu1 %vm354_vm0, %v3417_v8  ;;  %3135 = vmatprep.subr.mxu1 %v2717_v9  ;;  %v3462_v18 = vld [vmem:[%s3400_s28 + $0x71] sm:$0xff]  ;;  %v3476_v20 = vld [vmem:[%s3400_s28 + $0x79] sm:$0xff]  ;;  %v318_v23 = vld [vmem:[%s3400_s28 + $0x8] sm:$0xff] }
  0x18   : > { %3161 = vmatprep.subr.mxu0 %v2750_v10  ;;  %3063 = vmatmul.mubr.msk.f32.gmra.mxu0 %vm354_vm0, %v3429_v11  ;;  %v317_v21 = vld [vmem:[%s3400_s28] sm:$0xff]  ;;  %v2669_v24 = vld [vmem:[%s3400_s28 + $0xa] sm:$0xff]  ;;  %v3492_v26 = vld [vmem:[%s3400_s28 + $0x12] sm:$0xff] }
  0x19   : > { %3075 = vmatmul.mubr.msk.f32.gmra.mxu1 %vm354_vm0, %v3432_v12  ;;  %3065 = vmatprep.mubr.msk.f32.mxu0 %vm354_vm0, %v3439_v13  ;;  %v3489_v25 = vld [vmem:[%s3400_s28 + $0x10] sm:$0xff]  ;;  %v320_v29 = vld [vmem:[%s3400_s28 + $0x18] sm:$0xff]  ;;  %v3515_v31 = vld [vmem:[%s3400_s28 + $0x20] sm:$0xff] }
  0x1a   : > { %3077 = vmatprep.mubr.msk.f32.mxu1 %vm354_vm0, %v3442_v14  ;;  %v3508_v30 = vld [vmem:[%s3400_s28 + $0x1a] sm:$0xff]  ;;  %v3518_v32 = vld [vmem:[%s3400_s28 + $0x22] sm:$0xff]  ;;  %v3533_v34 = vld [vmem:[%s3400_s28 + $0x2a] sm:$0xff] }
  0x1b   : > { %v3530_v33 = vld [vmem:[%s3400_s28 + $0x28] sm:$0xff]  ;;  %v3536_v35 = vld [vmem:[%s3400_s28 + $0x30] sm:$0xff]  ;;  %v3550_v37 = vld [vmem:[%s3400_s28 + $0x38] sm:$0xff] }
  0x1c   : > { %3066 = vmatmul.mubr.msk.f32.gmra.mxu0 %vm354_vm0, %v3453_v15  ;;  %v3539_v36 = vld [vmem:[%s3400_s28 + $0x32] sm:$0xff]  ;;  %v3553_v38 = vld [vmem:[%s3400_s28 + $0x3a] sm:$0xff]  ;;  %v3559_v40 = vld [vmem:[%s3400_s28 + $0x42] sm:$0xff] }
  0x1d   : > { %3078 = vmatmul.mubr.msk.f32.gmra.mxu1 %vm354_vm0, %v3456_v16  ;;  %3068 = vmatprep.mubr.msk.f32.mxu0 %vm354_vm0, %v3459_v17  ;;  %v3556_v39 = vld [vmem:[%s3400_s28 + $0x40] sm:$0xff]  ;;  %v3570_v41 = vld [vmem:[%s3400_s28 + $0x48] sm:$0xff]  ;;  %v3576_v43 = vld [vmem:[%s3400_s28 + $0x50] sm:$0xff] }
  0x1e   : > { %3080 = vmatprep.mubr.msk.f32.mxu1 %vm354_vm0, %v3462_v18  ;;  %v3573_v42 = vld [vmem:[%s3400_s28 + $0x4a] sm:$0xff]  ;;  %v3579_v44 = vld [vmem:[%s3400_s28 + $0x52] sm:$0xff]  ;;  %v3593_v46 = vld [vmem:[%s3400_s28 + $0x5a] sm:$0xff] }
  0x1f   : > { %v3590_v45 = vld [vmem:[%s3400_s28 + $0x58] sm:$0xff]  ;;  %v3596_v47 = vld [vmem:[%s3400_s28 + $0x60] sm:$0xff]  ;;  %v3610_v49 = vld [vmem:[%s3400_s28 + $0x68] sm:$0xff] }
  0x20   : > { %3069 = vmatmul.mubr.msk.f32.gmra.mxu0 %vm354_vm0, %v3473_v19  ;;  %v3599_v48 = vld [vmem:[%s3400_s28 + $0x62] sm:$0xff]  ;;  %v3613_v50 = vld [vmem:[%s3400_s28 + $0x6a] sm:$0xff]  ;;  %v3619_v52 = vld [vmem:[%s3400_s28 + $0x72] sm:$0xff] }
  0x21   : > { %3081 = vmatmul.mubr.msk.f32.gmra.mxu1 %vm354_vm0, %v3476_v20  ;;  %3111 = vmatprep.mubr.msk.f32.mxu0 %vm354_vm0, %v2668_v22  ;;  %v3616_v51 = vld [vmem:[%s3400_s28 + $0x70] sm:$0xff]  ;;  %v3630_v53 = vld [vmem:[%s3400_s28 + $0x78] sm:$0xff]  ;;  %v2715_v57 = vld [vmem:[%s3400_s28 + $0x80] sm:$0xff] }
  0x22   : > { %3085 = vmatprep.mubr.msk.f32.mxu1 %vm354_vm0, %v317_v21  ;;  %v3633_v54 = vld [vmem:[%s3400_s28 + $0x7a] sm:$0xff]  ;;  %v2716_v59 = vld [vmem:[%s3400_s28 + $0x88] sm:$0xff]  ;;  %v2814_v62 = vld [vmem:[%s3400_s28 + $0x90] sm:$0xff] }
  0x23   : > { %v3700_v58 = vld [vmem:[%s3400_s28 + $0x81] sm:$0xff]  ;;  %v3711_v60 = vld [vmem:[%s3400_s28 + $0x89] sm:$0xff]  ;;  %v2815_v0 = vld [vmem:[%s3400_s28 + $0x98] sm:$0xff] }
  0x24   : > { %3112 = vmatmul.mubr.msk.f32.vlgmr.msra.gmra.mxu0 %vm354_vm0, %v2669_v24  ;;  %v2781_v61 = vld [vmem:[%s3400_s28 + $0x82] sm:$0xff]  ;;  %v2782_v63 = vld [vmem:[%s3400_s28 + $0x8a] sm:$0xff]  ;;  %v2880_v2 = vld [vmem:[%s3400_s28 + $0x92] sm:$0xff] }
  0x25   : > { %3086 = vmatmul.mubr.msk.f32.vlgmr.msra.gmra.mxu1 %vm354_vm0, %v318_v23  ;;  %3162 = vmatpush3.msra.mxu0 %v2750_v10  ;;  %v2847_v1 = vld [vmem:[%s3400_s28 + $0x91] sm:$0xff]  ;;  %v2848_v3 = vld [vmem:[%s3400_s28 + $0x99] sm:$0xff] }
  0x26   : > { %3136 = vmatpush3.msra.mxu1 %v2717_v9  ;;  %3088 = vmatprep.mubr.msk.f32.mxu1 %vm354_vm0, %v3489_v25 }
  0x27   : > { %3114 = vmatprep.mubr.msk.f32.mxu0 %vm354_vm0, %v3492_v26  ;;  %3187 = vmatprep.subr.mxu1 %v3499_v27 }
  0x28   : > { %3213 = vmatprep.subr.mxu0 %v3504_v28  ;;  %3115 = vmatmul.mubr.msk.f32.gmra.mxu0 %vm354_vm0, %v3508_v30 }
  0x29   : > { %3089 = vmatmul.mubr.msk.f32.gmra.mxu1 %vm354_vm0, %v320_v29  ;;  %3117 = vmatprep.mubr.msk.f32.mxu0 %vm354_vm0, %v3518_v32 }
  0x2a   : > { %3091 = vmatprep.mubr.msk.f32.mxu1 %vm354_vm0, %v3515_v31 }
  0x2c   : > { %3118 = vmatmul.mubr.msk.f32.gmra.mxu0 %vm354_vm0, %v3533_v34 }
  0x2d   : > { %3092 = vmatmul.mubr.msk.f32.gmra.mxu1 %vm354_vm0, %v3530_v33  ;;  %3120 = vmatprep.mubr.msk.f32.mxu0 %vm354_vm0, %v3539_v36 }
  0x2e   : > { %3094 = vmatprep.mubr.msk.f32.mxu1 %vm354_vm0, %v3536_v35 }
  0x30   : > { %3121 = vmatmul.mubr.msk.f32.gmra.mxu0 %vm354_vm0, %v3553_v38 }
  0x31   : > { %3095 = vmatmul.mubr.msk.f32.gmra.mxu1 %vm354_vm0, %v3550_v37  ;;  %3123 = vmatprep.mubr.msk.f32.mxu0 %vm354_vm0, %v3559_v40 }
  0x32   : > { %3097 = vmatprep.mubr.msk.f32.mxu1 %vm354_vm0, %v3556_v39 }
  0x34   : > { %3124 = vmatmul.mubr.msk.f32.gmra.mxu0 %vm354_vm0, %v3573_v42 }
  0x35   : > { %3098 = vmatmul.mubr.msk.f32.gmra.mxu1 %vm354_vm0, %v3570_v41  ;;  %3126 = vmatprep.mubr.msk.f32.mxu0 %vm354_vm0, %v3579_v44 }
  0x36   : > { %3100 = vmatprep.mubr.msk.f32.mxu1 %vm354_vm0, %v3576_v43 }
  0x38   : > { %3127 = vmatmul.mubr.msk.f32.gmra.mxu0 %vm354_vm0, %v3593_v46 }
  0x39   : > { %3101 = vmatmul.mubr.msk.f32.gmra.mxu1 %vm354_vm0, %v3590_v45  ;;  %3129 = vmatprep.mubr.msk.f32.mxu0 %vm354_vm0, %v3599_v48 }
  0x3a   : > { %3103 = vmatprep.mubr.msk.f32.mxu1 %vm354_vm0, %v3596_v47 }
  0x3c   : > { %3130 = vmatmul.mubr.msk.f32.gmra.mxu0 %vm354_vm0, %v3613_v50 }
  0x3d   : > { %3104 = vmatmul.mubr.msk.f32.gmra.mxu1 %vm354_vm0, %v3610_v49  ;;  %3132 = vmatprep.mubr.msk.f32.mxu0 %vm354_vm0, %v3619_v52 }
  0x3e   : > { %3106 = vmatprep.mubr.msk.f32.mxu1 %vm354_vm0, %v3616_v51 }
  0x40   : > { %3133 = vmatmul.mubr.msk.f32.gmra.mxu0 %vm354_vm0, %v3633_v54 }
  0x41   : > { %3107 = vmatmul.mubr.msk.f32.gmra.mxu1 %vm354_vm0, %v3630_v53  ;;  %3163 = vmatprep.mubr.msk.f32.mxu0 %vm354_vm0, %v3414_v7 }
  0x42   : > { %3137 = vmatprep.mubr.msk.f32.mxu1 %vm354_vm0, %v3489_v25 }
  0x44   : > { %3164 = vmatmul.mubr.msk.f32.vlgmr.msra.gmra.mxu0 %vm354_vm0, %v3429_v11 }
  0x45   : > { %3138 = vmatmul.mubr.msk.f32.vlgmr.msra.gmra.mxu1 %vm354_vm0, %v320_v29  ;;  %3214 = vmatpush3.msra.mxu0 %v3504_v28 }
  0x46   : > { %3188 = vmatpush3.msra.mxu1 %v3499_v27  ;;  %3140 = vmatprep.mubr.msk.f32.mxu1 %vm354_vm0, %v3515_v31 }
  0x47   : > { %3166 = vmatprep.mubr.msk.f32.mxu0 %vm354_vm0, %v3439_v13  ;;  %3239 = vmatprep.subr.mxu1 %v2849_v55 }
  0x48   : > { %3265 = vmatprep.subr.mxu0 %v2882_v56  ;;  %3167 = vmatmul.mubr.msk.f32.gmra.mxu0 %vm354_vm0, %v3453_v15 }
  0x49   : > { %3141 = vmatmul.mubr.msk.f32.gmra.mxu1 %vm354_vm0, %v3530_v33  ;;  %3169 = vmatprep.mubr.msk.f32.mxu0 %vm354_vm0, %v3459_v17 }
  0x4a   : > { %3143 = vmatprep.mubr.msk.f32.mxu1 %vm354_vm0, %v3536_v35 }
  0x4c   : > { %3170 = vmatmul.mubr.msk.f32.gmra.mxu0 %vm354_vm0, %v3473_v19 }
  0x4d   : > { %3144 = vmatmul.mubr.msk.f32.gmra.mxu1 %vm354_vm0, %v3550_v37  ;;  %3172 = vmatprep.mubr.msk.f32.mxu0 %vm354_vm0, %v3404_v4 }
  0x4e   : > { %3146 = vmatprep.mubr.msk.f32.mxu1 %vm354_vm0, %v3556_v39 }
  0x50   : > { %3173 = vmatmul.mubr.msk.f32.gmra.mxu0 %vm354_vm0, %v3411_v6 }
  0x51   : > { %3147 = vmatmul.mubr.msk.f32.gmra.mxu1 %vm354_vm0, %v3570_v41  ;;  %3175 = vmatprep.mubr.msk.f32.mxu0 %vm354_vm0, %v3417_v8 }
  0x52   : > { %3149 = vmatprep.mubr.msk.f32.mxu1 %vm354_vm0, %v3576_v43 }
  0x54   : > { %3176 = vmatmul.mubr.msk.f32.gmra.mxu0 %vm354_vm0, %v3432_v12 }
  0x55   : > { %3150 = vmatmul.mubr.msk.f32.gmra.mxu1 %vm354_vm0, %v3590_v45  ;;  %3178 = vmatprep.mubr.msk.f32.mxu0 %vm354_vm0, %v3442_v14 }
  0x56   : > { %3152 = vmatprep.mubr.msk.f32.mxu1 %vm354_vm0, %v3596_v47 }
  0x58   : > { %3179 = vmatmul.mubr.msk.f32.gmra.mxu0 %vm354_vm0, %v3456_v16 }
  0x59   : > { %3153 = vmatmul.mubr.msk.f32.gmra.mxu1 %vm354_vm0, %v3610_v49  ;;  %3181 = vmatprep.mubr.msk.f32.mxu0 %vm354_vm0, %v3462_v18 }
  0x5a   : > { %3155 = vmatprep.mubr.msk.f32.mxu1 %vm354_vm0, %v3616_v51 }
  0x5c   : > { %3182 = vmatmul.mubr.msk.f32.gmra.mxu0 %vm354_vm0, %v3476_v20 }
  0x5d   : > { %3156 = vmatmul.mubr.msk.f32.gmra.mxu1 %vm354_vm0, %v3630_v53  ;;  %3184 = vmatprep.mubr.msk.f32.mxu0 %vm354_vm0, %v3700_v58 }
  0x5e   : > { %3158 = vmatprep.mubr.msk.f32.mxu1 %vm354_vm0, %v2715_v57 }
  0x60   : > { %3185 = vmatmul.mubr.msk.f32.gmra.mxu0 %vm354_vm0, %v3711_v60 }
  0x61   : > { %3159 = vmatmul.mubr.msk.f32.gmra.mxu1 %vm354_vm0, %v2716_v59  ;;  %3215 = vmatprep.mubr.msk.f32.mxu0 %vm354_vm0, %v3515_v31 }
  0x62   : > { %3189 = vmatprep.mubr.msk.f32.mxu1 %vm354_vm0, %v3492_v26 }
  0x64   : > { %3216 = vmatmul.mubr.msk.f32.vlgmr.msra.gmra.mxu0 %vm354_vm0, %v3530_v33 }
  0x65   : > { %3190 = vmatmul.mubr.msk.f32.vlgmr.msra.gmra.mxu1 %vm354_vm0, %v3508_v30  ;;  %3266 = vmatpush3.msra.mxu0 %v2882_v56 }
  0x66   : > { %3240 = vmatpush3.msra.mxu1 %v2849_v55  ;;  %3192 = vmatprep.mubr.msk.f32.mxu1 %vm354_vm0, %v3518_v32 }
  0x67   : > { %3218 = vmatprep.mubr.msk.f32.mxu0 %vm354_vm0, %v3536_v35 }
  0x68   : > { %3219 = vmatmul.mubr.msk.f32.gmra.mxu0 %vm354_vm0, %v3550_v37 }
  0x69   : > { %3193 = vmatmul.mubr.msk.f32.gmra.mxu1 %vm354_vm0, %v3533_v34  ;;  %3221 = vmatprep.mubr.msk.f32.mxu0 %vm354_vm0, %v3556_v39 }
  0x6a   : > { %3195 = vmatprep.mubr.msk.f32.mxu1 %vm354_vm0, %v3539_v36 }
  0x6c   : > { %3222 = vmatmul.mubr.msk.f32.gmra.mxu0 %vm354_vm0, %v3570_v41 }
  0x6d   : > { %3196 = vmatmul.mubr.msk.f32.gmra.mxu1 %vm354_vm0, %v3553_v38  ;;  %3224 = vmatprep.mubr.msk.f32.mxu0 %vm354_vm0, %v3576_v43 }
  0x6e   : > { %3198 = vmatprep.mubr.msk.f32.mxu1 %vm354_vm0, %v3559_v40 }
  0x70   : > { %3225 = vmatmul.mubr.msk.f32.gmra.mxu0 %vm354_vm0, %v3590_v45 }
  0x71   : > { %3199 = vmatmul.mubr.msk.f32.gmra.mxu1 %vm354_vm0, %v3573_v42  ;;  %3227 = vmatprep.mubr.msk.f32.mxu0 %vm354_vm0, %v3596_v47 }
  0x72   : > { %3201 = vmatprep.mubr.msk.f32.mxu1 %vm354_vm0, %v3579_v44 }
  0x74   : > { %3228 = vmatmul.mubr.msk.f32.gmra.mxu0 %vm354_vm0, %v3610_v49 }
  0x75   : > { %3202 = vmatmul.mubr.msk.f32.gmra.mxu1 %vm354_vm0, %v3593_v46  ;;  %3230 = vmatprep.mubr.msk.f32.mxu0 %vm354_vm0, %v3616_v51 }
  0x76   : > { %3204 = vmatprep.mubr.msk.f32.mxu1 %vm354_vm0, %v3599_v48 }
  0x78   : > { %3231 = vmatmul.mubr.msk.f32.gmra.mxu0 %vm354_vm0, %v3630_v53 }
  0x79   : > { %3205 = vmatmul.mubr.msk.f32.gmra.mxu1 %vm354_vm0, %v3613_v50  ;;  %3233 = vmatprep.mubr.msk.f32.mxu0 %vm354_vm0, %v2715_v57 }
  0x7a   : > { %3207 = vmatprep.mubr.msk.f32.mxu1 %vm354_vm0, %v3619_v52 }
  0x7c   : > { %3234 = vmatmul.mubr.msk.f32.gmra.mxu0 %vm354_vm0, %v2716_v59 }
  0x7d   : > { %3208 = vmatmul.mubr.msk.f32.gmra.mxu1 %vm354_vm0, %v3633_v54  ;;  %3236 = vmatprep.mubr.msk.f32.mxu0 %vm354_vm0, %v2814_v62 }
  0x7e   : > { %3210 = vmatprep.mubr.msk.f32.mxu1 %vm354_vm0, %v2781_v61 }
  0x80   : > { %3237 = vmatmul.mubr.msk.f32.gmra.mxu0 %vm354_vm0, %v2815_v0 }
  0x81   : > { %3211 = vmatmul.mubr.msk.f32.gmra.mxu1 %vm354_vm0, %v2782_v63  ;;  %3267 = vmatprep.mubr.msk.f32.mxu0 %vm354_vm0, %v3518_v32 }
  0x82   : > { %3241 = vmatprep.mubr.msk.f32.mxu1 %vm354_vm0, %v3439_v13 }
  0x84   : > { %3268 = vmatmul.mubr.msk.f32.vlgmr.msra.gmra.mxu0 %vm354_vm0, %v3533_v34 }
  0x85   : > { %3242 = vmatmul.mubr.msk.f32.vlgmr.msra.gmra.mxu1 %vm354_vm0, %v3453_v15  ;;  %3270 = vmatprep.mubr.msk.f32.mxu0 %vm354_vm0, %v3539_v36 }
  0x86   : > { %3244 = vmatprep.mubr.msk.f32.mxu1 %vm354_vm0, %v3459_v17 }
  0x88   : > { %3271 = vmatmul.mubr.msk.f32.gmra.mxu0 %vm354_vm0, %v3553_v38 }
  0x89   : > { %3245 = vmatmul.mubr.msk.f32.gmra.mxu1 %vm354_vm0, %v3473_v19  ;;  %3273 = vmatprep.mubr.msk.f32.mxu0 %vm354_vm0, %v3559_v40 }
  0x8a   : > { %3247 = vmatprep.mubr.msk.f32.mxu1 %vm354_vm0, %v3404_v4  ;;  %v2881_v4 = vld [vmem:[%s3400_s28 + $0x9a] sm:$0xff] }
  0x8c   : > { %3274 = vmatmul.mubr.msk.f32.gmra.mxu0 %vm354_vm0, %v3573_v42 }
  0x8d   : > { %3248 = vmatmul.mubr.msk.f32.gmra.mxu1 %vm354_vm0, %v3411_v6  ;;  %3276 = vmatprep.mubr.msk.f32.mxu0 %vm354_vm0, %v3579_v44 }
  0x8e   : > { %3250 = vmatprep.mubr.msk.f32.mxu1 %vm354_vm0, %v3417_v8 }
  0x90   : > { %3277 = vmatmul.mubr.msk.f32.gmra.mxu0 %vm354_vm0, %v3593_v46 }
  0x91   : > { %3251 = vmatmul.mubr.msk.f32.gmra.mxu1 %vm354_vm0, %v3432_v12  ;;  %3279 = vmatprep.mubr.msk.f32.mxu0 %vm354_vm0, %v3599_v48 }
  0x92   : > { %3253 = vmatprep.mubr.msk.f32.mxu1 %vm354_vm0, %v3442_v14 }
  0x94   : > { %3280 = vmatmul.mubr.msk.f32.gmra.mxu0 %vm354_vm0, %v3613_v50 }
  0x95   : > { %3254 = vmatmul.mubr.msk.f32.gmra.mxu1 %vm354_vm0, %v3456_v16  ;;  %3282 = vmatprep.mubr.msk.f32.mxu0 %vm354_vm0, %v3619_v52 }
  0x96   : > { %3256 = vmatprep.mubr.msk.f32.mxu1 %vm354_vm0, %v3462_v18 }
  0x98   : > { %3283 = vmatmul.mubr.msk.f32.gmra.mxu0 %vm354_vm0, %v3633_v54 }
  0x99   : > { %3257 = vmatmul.mubr.msk.f32.gmra.mxu1 %vm354_vm0, %v3476_v20  ;;  %3285 = vmatprep.mubr.msk.f32.mxu0 %vm354_vm0, %v2781_v61 }
  0x9a   : > { %3259 = vmatprep.mubr.msk.f32.mxu1 %vm354_vm0, %v3700_v58 }
  0x9c   : > { %3286 = vmatmul.mubr.msk.f32.gmra.mxu0 %vm354_vm0, %v2782_v63 }
  0x9d   : > { %3260 = vmatmul.mubr.msk.f32.gmra.mxu1 %vm354_vm0, %v3711_v60  ;;  %3288 = vmatprep.mubr.msk.f32.mxu0 %vm354_vm0, %v2880_v2 }
  0x9e   : > { %3262 = vmatprep.mubr.msk.f32.mxu1 %vm354_vm0, %v2847_v1 }
  0xa0   : > { %3289 = vmatmul.mubr.msk.f32.gmra.mxu0 %vm354_vm0, %v2881_v4 }
  0xa1   : > { %3263 = vmatmul.mubr.msk.f32.gmra.mxu1 %vm354_vm0, %v2848_v3 }
  0xd4   : > { %v3061_v5 = vpop.f32.mrf.mxu0 }
  0xd5   : > { %v3073_v6 = vpop.f32.mrf.mxu1 }
  0xd6   : > { %v469_v7 = vpop.f32.mrf.mxu0 }
  0xd7   : > { %v509_v8 = vpop.f32.mrf.mxu1 }
  0xd8   : > { %v3064_v9 = vpop.f32.mrf.mxu0 }
  0xd9   : > { %v3076_v10 = vpop.f32.mrf.mxu1 }
  0xda   : > { %v479_v11 = vpop.f32.mrf.mxu0 }
  0xdb   : > { %v519_v12 = vpop.f32.mrf.mxu1 }
  0xdc   : > { %v3067_v13 = vpop.f32.mrf.mxu0 }
  0xdd   : > { %v3079_v14 = vpop.f32.mrf.mxu1 }
  0xde   : > { %v489_v15 = vpop.f32.mrf.mxu0 }
  0xdf   : > { %v529_v16 = vpop.f32.mrf.mxu1 }
  0xe0   : > { %v3070_v17 = vpop.f32.mrf.mxu0 }
  0xe1   : > { %v3082_v18 = vpop.f32.mrf.mxu1 }
  0xe2   : > { %v499_v19 = vpop.f32.mrf.mxu0 }
  0xe3   : > { %v3840_v20 = vpop.f32.mrf.mxu1 }
  0xe4   : > { %v3113_v22 = vpop.f32.mrf.mxu0 }
  0xe5   : > { %v3087_v21 = vpop.f32.mrf.mxu1 }
  0xe6   : > { %v668_v23 = vadd.f32 %v3087_v21, %v3061_v5  ;;  %v875_v25 = vpop.f32.mrf.mxu0 }
  0xe7   : > { %v662_v24 = vpop.f32.mrf.mxu1 }
  0xe8   : > { %v3842_v26 = vadd.f32 %v3113_v22, %v668_v23  ;;  %v663_v27 = vadd.f32 %v662_v24, %v469_v7  ;;  %v3116_v29 = vpop.f32.mrf.mxu0 }
  0xe9   : > { %v3090_v28 = vpop.f32.mrf.mxu1 }
  0xea   : > { %v3844_v30 = vadd.f32 %v875_v25, %v663_v27  ;;  %v678_v31 = vadd.f32 %v3090_v28, %v3064_v9  ;;  %v885_v33 = vpop.f32.mrf.mxu0 }
  0xeb   : > { %v672_v32 = vpop.f32.mrf.mxu1 }
  0xec   : > { %v3846_v34 = vadd.f32 %v3116_v29, %v678_v31  ;;  %v673_v35 = vadd.f32 %v672_v32, %v479_v11  ;;  %v3119_v37 = vpop.f32.mrf.mxu0 }
  0xed   : > { %v3093_v36 = vpop.f32.mrf.mxu1 }
  0xee   : > { %v3848_v38 = vadd.f32 %v885_v33, %v673_v35  ;;  %v688_v39 = vadd.f32 %v3093_v36, %v3067_v13  ;;  %v895_v41 = vpop.f32.mrf.mxu0 }
  0xef   : > { %v682_v40 = vpop.f32.mrf.mxu1 }
  0xf0   : > { %v3850_v42 = vadd.f32 %v3119_v37, %v688_v39  ;;  %v683_v43 = vadd.f32 %v682_v40, %v489_v15  ;;  %v3122_v45 = vpop.f32.mrf.mxu0 }
  0xf1   : > { %v3096_v44 = vpop.f32.mrf.mxu1 }
  0xf2   : > { %v3852_v46 = vadd.f32 %v895_v41, %v683_v43  ;;  %v698_v47 = vadd.f32 %v3096_v44, %v3070_v17  ;;  %v905_v49 = vpop.f32.mrf.mxu0 }
  0xf3   : > { %v692_v48 = vpop.f32.mrf.mxu1 }
  0xf4   : > { %v3854_v50 = vadd.f32 %v3122_v45, %v698_v47  ;;  %v693_v51 = vadd.f32 %v692_v48, %v499_v19  ;;  %v3125_v53 = vpop.f32.mrf.mxu0 }
  0xf5   : > { %v3099_v52 = vpop.f32.mrf.mxu1 }
  0xf6   : > { %v3856_v54 = vadd.f32 %v905_v49, %v693_v51  ;;  %v708_v55 = vadd.f32 %v3099_v52, %v3073_v6  ;;  %v915_v57 = vpop.f32.mrf.mxu0 }
  0xf7   : > { %v702_v56 = vpop.f32.mrf.mxu1 }
  0xf8   : > { %v3858_v58 = vadd.f32 %v3125_v53, %v708_v55  ;;  %v703_v59 = vadd.f32 %v702_v56, %v509_v8  ;;  %v3128_v61 = vpop.f32.mrf.mxu0 }
  0xf9   : > { %v3102_v60 = vpop.f32.mrf.mxu1 }
  0xfa   : > { %v3860_v62 = vadd.f32 %v915_v57, %v703_v59  ;;  %v718_v63 = vadd.f32 %v3102_v60, %v3076_v10  ;;  %v925_v1 = vpop.f32.mrf.mxu0 }
  0xfb   : > { %v712_v0 = vpop.f32.mrf.mxu1 }
  0xfc   : > { %v3862_v2 = vadd.f32 %v3128_v61, %v718_v63  ;;  %v713_v3 = vadd.f32 %v712_v0, %v519_v12  ;;  %v3131_v5 = vpop.f32.mrf.mxu0 }
  0xfd   : > { %v3105_v4 = vpop.f32.mrf.mxu1 }
  0xfe   : > { %v3864_v7 = vadd.f32 %v925_v1, %v713_v3  ;;  %v728_v6 = vadd.f32 %v3105_v4, %v3079_v14  ;;  %v935_v11 = vpop.f32.mrf.mxu0 }
  0xff   : > { %v722_v9 = vpop.f32.mrf.mxu1 }
 0x100   : > { %v3866_v13 = vadd.f32 %v3131_v5, %v728_v6  ;;  %v723_v8 = vadd.f32 %v722_v9, %v529_v16  ;;  %v3134_v17 = vpop.f32.mrf.mxu0 }
 0x101   : > { %v3108_v15 = vpop.f32.mrf.mxu1 }
 0x102   : > { %v3868_v19 = vadd.f32 %v935_v11, %v723_v8  ;;  %v738_v10 = vadd.f32 %v3108_v15, %v3082_v18  ;;  %v945_v22 = vpop.f32.mrf.mxu0 }
 0x103   : > { %v732_v21 = vpop.f32.mrf.mxu1 }
 0x104   : > { %v3870_v23 = vadd.f32 %v3134_v17, %v738_v10  ;;  %v733_v12 = vadd.f32 %v732_v21, %v3840_v20  ;;  %v3165_v25 = vpop.f32.mrf.mxu0 }
 0x105   : > { %v3139_v24 = vpop.f32.mrf.mxu1 }
 0x106   : > { %4114 = vst [vmem:[#allocation2_spill] sm:$0xff] %v3870_v23  ;;  %v3873_v27 = vadd.f32 %v945_v22, %v733_v12  ;;  %v1334_v28 = vpop.f32.mrf.mxu0 }
 0x107   : > { %v1105_v14 = vpop.f32.mrf.mxu1 }
 0x108   : > { %4115 = vst [vmem:[#allocation3_spill] sm:$0xff] %v3873_v27  ;;  %v3875_v31 = vpop.f32.mrf.mxu0 }
 0x109   : > { %v3142_v29 = vpop.f32.mrf.mxu1 }
 0x10a   : > { %v3877_v32 = vpop.f32.mrf.mxu0 }
 0x10b   : > { %v1115_v16 = vpop.f32.mrf.mxu1 }
 0x10c   : > { %v3881_v18 = vpop.f32.mrf.mxu0 }
 0x10d   : > { %v3879_v33 = vpop.f32.mrf.mxu1 }
 0x10e   : > { %v3883_v36 = vpop.f32.mrf.mxu0 }
 0x10f   : > { %v1125_v35 = vpop.f32.mrf.mxu1 }
 0x110   : > { %v3885_v37 = vpop.f32.mrf.mxu0 }
 0x111   : > { %v3148_v20 = vpop.f32.mrf.mxu1 }
 0x112   : > { %v3889_v40 = vpop.f32.mrf.mxu0 }
 0x113   : > { %v3887_v39 = vpop.f32.mrf.mxu1 }
 0x114   : > { %v3893_v43 = vpop.f32.mrf.mxu0 }
 0x115   : > { %v3891_v41 = vpop.f32.mrf.mxu1 }
 0x116   : > { %v3897_v45 = vpop.f32.mrf.mxu0 }
 0x117   : > { %v3895_v44 = vpop.f32.mrf.mxu1 }
 0x118   : > { %v3901_v48 = vpop.f32.mrf.mxu0 }
 0x119   : > { %v3899_v47 = vpop.f32.mrf.mxu1 }
 0x11a   : > { %v3905_v51 = vpop.f32.mrf.mxu0 }
 0x11b   : > { %v3903_v49 = vpop.f32.mrf.mxu1  ;;  %4116 = vst [vmem:[#allocation4_spill] sm:$0xff] %v3905_v51 }
 0x11c   : > { %v3909_v53 = vpop.f32.mrf.mxu0 }
 0x11d   : > { %v3907_v52 = vpop.f32.mrf.mxu1  ;;  %4117 = vst [vmem:[#allocation5_spill] sm:$0xff] %v3909_v53 }
 0x11e   : > { %v3913_v56 = vpop.f32.mrf.mxu0 }
 0x11f   : > { %v3911_v55 = vpop.f32.mrf.mxu1  ;;  %4118 = vst [vmem:[#allocation6_spill] sm:$0xff] %v3913_v56  ;;  %v1185_v56 = vadd.f32 %v3139_v24, %v3842_v26  ;;  %v1186_v26 = vadd.f32 %v1115_v16, %v3848_v38  ;;  %v1190_v16 = vadd.f32 %v3887_v39, %v3856_v54  ;;  %v4001_v39 = vld [vmem:[%s4111_s2] ss:$0 sm:$0xff] }
 0x120   : > { %v3917_v59 = vpop.f32.mrf.mxu0 }
 0x121   : > { %v3915_v57 = vpop.f32.mrf.mxu1  ;;  %4120 = vst [vmem:[#allocation8_spill] sm:$0xff] %v3917_v59  ;;  %v1415_v38 = vadd.f32 %v3877_v32, %v1186_v26 }
 0x122   : > { %4119 = vst [vmem:[#allocation7_spill] sm:$0xff] %v3915_v57  ;;  %v3921_v61 = vpop.f32.mrf.mxu0 }
 0x123   : > { %v3919_v60 = vpop.f32.mrf.mxu1  ;;  %4122 = vst [vmem:[#allocation10_spill] sm:$0xff] %v3921_v61 }
 0x124   : > { %4121 = vst [vmem:[#allocation9_spill] sm:$0xff] %v3919_v60  ;;  %v3217_v0 = vpop.f32.mrf.mxu0 }
 0x125   : > { %v3191_v63 = vpop.f32.mrf.mxu1 }
 0x126   : > { %v1793_v3 = vpop.f32.mrf.mxu0 }
 0x127   : > { %v1563_v1 = vpop.f32.mrf.mxu1 }
 0x128   : > { %v3220_v5 = vpop.f32.mrf.mxu0 }
 0x129   : > { %v3194_v4 = vpop.f32.mrf.mxu1 }
 0x12a   : > { %v3923_v9 = vpop.f32.mrf.mxu0 }
 0x12b   : > { %v1573_v6 = vpop.f32.mrf.mxu1 }
 0x12c   : > { %v3925_v8 = vpop.f32.mrf.mxu0 }
 0x12d   : > { %v3197_v11 = vpop.f32.mrf.mxu1 }
 0x12e   : > { %v3927_v17 = vpop.f32.mrf.mxu0 }
 0x12f   : > { %v1583_v15 = vpop.f32.mrf.mxu1 }
 0x130   : > { %v3931_v21 = vpop.f32.mrf.mxu0 }
 0x131   : > { %v3929_v10 = vpop.f32.mrf.mxu1  ;;  %4123 = vst [vmem:[#allocation11_spill] sm:$0xff] %v3931_v21 }
 0x132   : > { %v3935_v12 = vpop.f32.mrf.mxu0 }
 0x133   : > { %v3933_v22 = vpop.f32.mrf.mxu1  ;;  %4124 = vst [vmem:[#allocation12_spill] sm:$0xff] %v3935_v12  ;;  %v1184_v12 = vadd.f32 %v1105_v14, %v3844_v30 }
 0x134   : > { %v3939_v59 = vpop.f32.mrf.mxu0 }
 0x135   : > { %v3937_v61 = vpop.f32.mrf.mxu1  ;;  %4126 = vst [vmem:[#allocation14_spill] sm:$0xff] %v3939_v59  ;;  %v1414_v59 = vadd.f32 %v3165_v25, %v1185_v56  ;;  %v1189_v25 = vadd.f32 %v3879_v33, %v3850_v42  ;;  %v1193_v42 = vadd.f32 %v3891_v41, %v3858_v58 }
 0x136   : > { %4125 = vst [vmem:[#allocation13_spill] sm:$0xff] %v3937_v61  ;;  %v3943_v27 = vpop.f32.mrf.mxu0 }
 0x137   : > { %v3941_v60 = vpop.f32.mrf.mxu1  ;;  %4128 = vst [vmem:[#allocation16_spill] sm:$0xff] %v3943_v27  ;;  %v1187_v27 = vadd.f32 %v3142_v29, %v3846_v34  ;;  %v1643_v24 = vadd.f32 %v3191_v63, %v1414_v59  ;;  %v1188_v34 = vadd.f32 %v1125_v35, %v3852_v46  ;;  %v1191_v29 = vadd.f32 %v3148_v20, %v3854_v50 }
 0x138   : > { %4127 = vst [vmem:[#allocation15_spill] sm:$0xff] %v3941_v60  ;;  %v3947_v23 = vpop.f32.mrf.mxu0  ;;  %v1192_v46 = vadd.f32 %v3895_v44, %v3860_v62  ;;  %v1644_v35 = vadd.f32 %v1573_v6, %v1415_v38  ;;  %v1418_v54 = vadd.f32 %v3881_v18, %v1189_v25  ;;  %v1195_v62 = vadd.f32 %v3899_v47, %v3862_v2  ;;  %v2370_v2 = vld [vmem:[%s3991_s22 + $0x8] sm:$0xff] }
 0x139   : > { %v3945_v57 = vpop.f32.mrf.mxu1  ;;  %4130 = vst [vmem:[#allocation18_spill] sm:$0xff] %v3947_v23  ;;  %v1413_v23 = vadd.f32 %v1334_v28, %v1184_v12  ;;  %v1416_v30 = vadd.f32 %v3875_v31, %v1187_v27  ;;  %v1873_v27 = vadd.f32 %v3217_v0, %v1643_v24  ;;  %v1417_v32 = vadd.f32 %v3883_v36, %v1188_v34 }
 0x13a   : > { %4129 = vst [vmem:[#allocation17_spill] sm:$0xff] %v3945_v57  ;;  %v3952_v21 = vpop.f32.mrf.mxu0  ;;  %v1420_v58 = vadd.f32 %v3885_v37, %v1191_v29  ;;  %v1419_v59 = vadd.f32 %v3889_v40, %v1190_v16  ;;  %v1422_v18 = vadd.f32 %v3893_v43, %v1193_v42  ;;  %v1421_v36 = vadd.f32 %v3897_v45, %v1192_v46  ;;  %v2371_v46 = vld [vmem:[%s3991_s22 + $0x10] sm:$0xff] }
 0x13b   : > { %v3950_v53 = vpop.f32.mrf.mxu1  ;;  %4132 = vst [vmem:[#allocation20_spill] sm:$0xff] %v3952_v21  ;;  %v1642_v14 = vadd.f32 %v1563_v1, %v1413_v23  ;;  %v1645_v23 = vadd.f32 %v3194_v4, %v1416_v30  ;;  %v1647_v37 = vadd.f32 %v3197_v11, %v1418_v54  ;;  %v1874_v6 = vadd.f32 %v3923_v9, %v1644_v35  ;;  %v2369_v11 = vld [vmem:[%s3991_s22] sm:$0xff] }
 0x13c   : > { %4131 = vst [vmem:[#allocation19_spill] sm:$0xff] %v3950_v53  ;;  %v3957_v61 = vpop.f32.mrf.mxu0  ;;  %v1424_v40 = vadd.f32 %v3901_v48, %v1195_v62  ;;  %v1194_v43 = vadd.f32 %v3903_v49, %v3864_v7  ;;  %v1197_v45 = vadd.f32 %v3907_v52, %v3866_v13  ;;  %v1196_v48 = vadd.f32 %v3911_v55, %v3868_v19  ;;  %v2372_v49 = vld [vmem:[%s3991_s22 + $0x18] sm:$0xff] }
 0x13d   : > { %v3955_v51 = vpop.f32.mrf.mxu1  ;;  %v1872_v33 = vadd.f32 %v1793_v3, %v1642_v14  ;;  %v1875_v63 = vadd.f32 %v3220_v5, %v1645_v23  ;;  %v1646_v3 = vadd.f32 %v1583_v15, %v1417_v32  ;;  %v1649_v5 = vadd.f32 %v3929_v10, %v1420_v58  ;;  %v4136_v58 = vld [vmem:[#allocation5_spill] sm:$0xff] }
 0x13e   : > { %v3962_v57 = vpop.f32.mrf.mxu0  ;;  %v1877_v29 = vadd.f32 %v3925_v8, %v1647_v37  ;;  %v1648_v13 = vadd.f32 %v3933_v22, %v1419_v59  ;;  %v4133_v8 = vld [vmem:[#allocation4_spill] sm:$0xff]  ;;  %v4135_v22 = vld [vmem:[#allocation13_spill] sm:$0xff]  ;;  %v1426_v62 = vadd.f32 %v4136_v58, %v1197_v45 }
 0x13f   : > { %v3960_v60 = vpop.f32.mrf.mxu1  ;;  %v1876_v7 = vadd.f32 %v3927_v17, %v1646_v3  ;;  %v4134_v17 = vld [vmem:[#allocation11_spill] sm:$0xff]  ;;  %v1651_v42 = vadd.f32 %v4135_v22, %v1422_v18  ;;  %v4138_v59 = vld [vmem:[#allocation12_spill] sm:$0xff] }
 0x140   : > { %v3967_v21 = vpop.f32.mrf.mxu0  ;;  %v1879_v23 = vadd.f32 %v4134_v17, %v1649_v5  ;;  %v4147_v22 = vld [vmem:[#allocation16_spill] sm:$0xff] }
 0x141   : > { %v3965_v53 = vpop.f32.mrf.mxu1 }
 0x142   : > { %v3976_v28 = vpop.f32.mrf.mxu0 }
 0x143   : > { %v3974_v56 = vpop.f32.mrf.mxu1 }
 0x144   : > { %v3269_v50 = vpop.f32.mrf.mxu0 }
 0x145   : > { %v3243_v31 = vpop.f32.mrf.mxu1 }
 0x146   : > { %v2102_v20 = vadd.f32 %v3243_v31, %v1873_v27  ;;  %v2251_v44 = vpop.f32.mrf.mxu0  ;;  %v1423_v27 = vadd.f32 %v4133_v8, %v1194_v43  ;;  %v4141_v43 = vld [vmem:[#allocation17_spill] sm:$0xff] }
 0x147   : > { %v2022_v41 = vpop.f32.mrf.mxu1  ;;  %v1653_v45 = vadd.f32 %v4141_v43, %v1424_v40  ;;  %v4146_v40 = vld [vmem:[#allocation19_spill] sm:$0xff] }
 0x148   : > { %v2331_v0 = vadd.f32 %v3269_v50, %v2102_v20  ;;  %v2101_v1 = vadd.f32 %v2022_v41, %v1872_v33  ;;  %v3272_v4 = vpop.f32.mrf.mxu0  ;;  %v4137_v41 = vld [vmem:[#allocation6_spill] sm:$0xff] }
 0x149   : > { %v3246_v47 = vpop.f32.mrf.mxu1 }
 0x14a   : > { %v2354_v12 = vadd.f32 %v4001_v39, %v2331_v0  ;;  %v2330_v26 = vadd.f32 %v2251_v44, %v2101_v1  ;;  %v2104_v24 = vadd.f32 %v3246_v47, %v1875_v63  ;;  %v2261_v30 = vpop.f32.mrf.mxu0  ;;  %v1425_v44 = vadd.f32 %v4137_v41, %v1196_v48  ;;  %v4142_v48 = vld [vmem:[#allocation2_spill] sm:$0xff] }
 0x14b   : > { %v2032_v15 = vpop.f32.mrf.mxu1  ;;  %v1878_v63 = vadd.f32 %v4138_v59, %v1648_v13  ;;  %v4144_v13 = vld [vmem:[#allocation3_spill] sm:$0xff]  ;;  %v4149_v59 = vld [vmem:[#allocation20_spill] sm:$0xff] }
 0x14c   : > { %v2386_v9 = vadd.f32 %v2370_v2, %v2354_v12  ;;  %v2353_v14 = vadd.f32 %v4001_v39, %v2330_v26  ;;  %v2333_v25 = vadd.f32 %v3272_v4, %v2104_v24  ;;  %v2103_v34 = vadd.f32 %v2032_v15, %v1874_v6  ;;  %v3275_v10 = vpop.f32.mrf.mxu0  ;;  %v2374_v2 = vld [vmem:[%s3991_s22 + $0x28] sm:$0xff]  ;;  %v4139_v6 = vld [vmem:[#allocation14_spill] sm:$0xff] }
 0x14d   : > { %v3249_v52 = vpop.f32.mrf.mxu1  ;;  %v1881_v12 = vadd.f32 %v4139_v6, %v1651_v42  ;;  %v4140_v26 = vld [vmem:[#allocation15_spill] sm:$0xff] }
 0x14e   : > { %v2402_v38 = vmax.f32 %v2386_v9, 0.0  ;;  %v2385_v16 = vadd.f32 %v2369_v11, %v2353_v14  ;;  %v2356_v19 = vadd.f32 %v4001_v39, %v2333_v25  ;;  %v2332_v55 = vadd.f32 %v2261_v30, %v2103_v34  ;;  %v2271_v33 = vpop.f32.mrf.mxu0  ;;  %v2373_v11 = vld [vmem:[%s3991_s22 + $0x20] sm:$0xff] }
 0x14f   : > { %v2106_v31 = vadd.f32 %v3249_v52, %v1877_v29  ;;  %v2042_v50 = vpop.f32.mrf.mxu1  ;;  %v1650_v24 = vadd.f32 %v4140_v26, %v1421_v36  ;;  %v4143_v29 = vld [vmem:[#allocation7_spill] sm:$0xff]  ;;  %v1652_v52 = vadd.f32 %v4146_v40, %v1423_v27 }
 0x150   : > { %2418 = vst [vmem:[%s4027_s27 + $0x8] sm:$0xff] %v2402_v38  ;;  %v2401_v35 = vmax.f32 %v2385_v16, 0.0  ;;  %v2388_v20 = vadd.f32 %v2372_v49, %v2356_v19  ;;  %v2355_v54 = vadd.f32 %v4001_v39, %v2332_v55  ;;  %v2105_v32 = vadd.f32 %v2042_v50, %v1876_v7  ;;  %v3278_v18 = vpop.f32.mrf.mxu0  ;;  %v4145_v49 = vld [vmem:[#allocation9_spill] sm:$0xff] }
 0x151   : > { %v2335_v0 = vadd.f32 %v3275_v10, %v2106_v31  ;;  %v3252_v1 = vpop.f32.mrf.mxu1  ;;  %v1199_v7 = vadd.f32 %v4143_v29, %v4142_v48  ;;  %v1198_v36 = vadd.f32 %v4145_v49, %v4144_v13  ;;  %v2376_v38 = vld [vmem:[%s3991_s22 + $0x38] sm:$0xff]  ;;  %v1880_v42 = vadd.f32 %v4147_v22, %v1650_v24 }
 0x152   : > { %2417 = vst [vmem:[%s4027_s27] sm:$0xff] %v2401_v35  ;;  %v2404_v37 = vmax.f32 %v2388_v20, 0.0  ;;  %v2387_v3 = vadd.f32 %v2371_v46, %v2355_v54  ;;  %v2334_v47 = vadd.f32 %v2271_v33, %v2105_v32  ;;  %v2108_v4 = vadd.f32 %v3252_v1, %v1879_v23  ;;  %v2281_v30 = vpop.f32.mrf.mxu0  ;;  %v4148_v46 = vld [vmem:[#allocation18_spill] sm:$0xff]  ;;  %v2375_v33 = vld [vmem:[%s3991_s22 + $0x30] sm:$0xff]  ;;  %v2378_v1 = vld [vmem:[%s3991_s22 + $0x48] sm:$0xff] }
 0x153   : > { %v2358_v5 = vadd.f32 %v4001_v39, %v2335_v0  ;;  %v2052_v15 = vpop.f32.mrf.mxu1  ;;  %v1883_v31 = vadd.f32 %v4148_v46, %v1653_v45  ;;  %v1655_v50 = vadd.f32 %v3955_v51, %v1426_v62  ;;  %v1654_v0 = vadd.f32 %v3960_v60, %v1425_v44 }
 0x154   : > { %2420 = vst [vmem:[%s4027_s27 + $0x18] sm:$0xff] %v2404_v37  ;;  %v2403_v9 = vmax.f32 %v2387_v3, 0.0  ;;  %v2357_v14 = vadd.f32 %v4001_v39, %v2334_v47  ;;  %v2337_v25 = vadd.f32 %v3278_v18, %v2108_v4  ;;  %v2107_v34 = vadd.f32 %v2052_v15, %v1878_v63  ;;  %v3281_v19 = vpop.f32.mrf.mxu0  ;;  %v4150_v4 = vld [vmem:[#allocation8_spill] sm:$0xff] }
 0x155   : > { %v2390_v10 = vadd.f32 %v2374_v2, %v2358_v5  ;;  %v3255_v16 = vpop.f32.mrf.mxu1  ;;  %v1882_v63 = vadd.f32 %v4149_v59, %v1652_v52  ;;  %v1428_v6 = vadd.f32 %v4150_v4, %v1199_v7  ;;  %v1885_v60 = vadd.f32 %v3957_v61, %v1655_v50  ;;  %v2379_v52 = vld [vmem:[%s3991_s22 + $0x50] sm:$0xff] }
 0x156   : > { %2419 = vst [vmem:[%s4027_s27 + $0x10] sm:$0xff] %v2403_v9  ;;  %v2389_v55 = vadd.f32 %v2373_v11, %v2357_v14  ;;  %v2360_v8 = vadd.f32 %v4001_v39, %v2337_v25  ;;  %v2336_v17 = vadd.f32 %v2281_v30, %v2107_v34  ;;  %v2110_v23 = vadd.f32 %v3255_v16, %v1881_v12  ;;  %v2291_v20 = vpop.f32.mrf.mxu0  ;;  %v4151_v12 = vld [vmem:[#allocation10_spill] sm:$0xff]  ;;  %v2380_v34 = vld [vmem:[%s3991_s22 + $0x58] sm:$0xff] }
 0x157   : > { %v2406_v27 = vmax.f32 %v2390_v10, 0.0  ;;  %v2062_v35 = vpop.f32.mrf.mxu1  ;;  %v1427_v26 = vadd.f32 %v4151_v12, %v1198_v36  ;;  %v2377_v11 = vld [vmem:[%s3991_s22 + $0x40] sm:$0xff]  ;;  %v1884_v9 = vadd.f32 %v3962_v57, %v1654_v0  ;;  %v1657_v14 = vadd.f32 %v3965_v53, %v1428_v6 }
 0x158   : > { %v2405_v54 = vmax.f32 %v2389_v55, 0.0  ;;  %v2392_v32 = vadd.f32 %v2376_v38, %v2360_v8  ;;  %v2359_v58 = vadd.f32 %v4001_v39, %v2336_v17  ;;  %v2339_v41 = vadd.f32 %v3281_v19, %v2110_v23  ;;  %v3284_v51 = vpop.f32.mrf.mxu0  ;;  %v2382_v17 = vld [vmem:[%s3991_s22 + $0x68] sm:$0xff] }
 0x159   : > { %2422 = vst [vmem:[%s4027_s27 + $0x28] sm:$0xff] %v2406_v27  ;;  %v2109_v18 = vadd.f32 %v2062_v35, %v1880_v42  ;;  %v3258_v37 = vpop.f32.mrf.mxu1  ;;  %v1656_v25 = vadd.f32 %v3974_v56, %v1427_v26  ;;  %v1887_v19 = vadd.f32 %v3967_v21, %v1657_v14  ;;  %v2381_v27 = vld [vmem:[%s3991_s22 + $0x60] sm:$0xff] }
 0x15a   : > { %2421 = vst [vmem:[%s4027_s27 + $0x20] sm:$0xff] %v2405_v54  ;;  %v2408_v62 = vmax.f32 %v2392_v32, 0.0  ;;  %v2391_v3 = vadd.f32 %v2375_v33, %v2359_v58  ;;  %v2362_v2 = vadd.f32 %v4001_v39, %v2339_v41  ;;  %v2112_v47 = vadd.f32 %v3258_v37, %v1883_v31  ;;  %v2301_v43 = vpop.f32.mrf.mxu0 }
 0x15b   : > { %v2338_v44 = vadd.f32 %v2291_v20, %v2109_v18  ;;  %v2072_v24 = vpop.f32.mrf.mxu1  ;;  %v1886_v55 = vadd.f32 %v3976_v28, %v1656_v25  ;;  %v2383_v18 = vld [vmem:[%s3991_s22 + $0x70] sm:$0xff] }
 0x15c   : > { %2424 = vst [vmem:[%s4027_s27 + $0x38] sm:$0xff] %v2408_v62  ;;  %v2407_v45 = vmax.f32 %v2391_v3, 0.0  ;;  %v2394_v5 = vadd.f32 %v2378_v1, %v2362_v2  ;;  %v2341_v15 = vadd.f32 %v3284_v51, %v2112_v47  ;;  %v2111_v30 = vadd.f32 %v2072_v24, %v1882_v63  ;;  %v3287_v29 = vpop.f32.mrf.mxu0  ;;  %v2384_v63 = vld [vmem:[%s3991_s22 + $0x78] sm:$0xff] }
 0x15d   : > { %v2361_v61 = vadd.f32 %v4001_v39, %v2338_v44  ;;  %v3261_v48 = vpop.f32.mrf.mxu1 }
 0x15e   : > { %2423 = vst [vmem:[%s4027_s27 + $0x30] sm:$0xff] %v2407_v45  ;;  %v2410_v7 = vmax.f32 %v2394_v5, 0.0  ;;  %v2364_v13 = vadd.f32 %v4001_v39, %v2341_v15  ;;  %v2340_v49 = vadd.f32 %v2301_v43, %v2111_v30  ;;  %v2114_v36 = vadd.f32 %v3261_v48, %v1885_v60  ;;  %v2311_v10 = vpop.f32.mrf.mxu0 }
 0x15f   : > { %v2393_v40 = vadd.f32 %v2377_v11, %v2361_v61  ;;  %v2082_v57 = vpop.f32.mrf.mxu1 }
 0x160   : > { %2426 = vst [vmem:[%s4027_s27 + $0x48] sm:$0xff] %v2410_v7  ;;  %v2396_v53 = vadd.f32 %v2380_v34, %v2364_v13  ;;  %v2363_v56 = vadd.f32 %v4001_v39, %v2340_v49  ;;  %v2343_v38 = vadd.f32 %v3287_v29, %v2114_v36  ;;  %v2113_v16 = vadd.f32 %v2082_v57, %v1884_v9  ;;  %v3290_v22 = vpop.f32.mrf.mxu0 }
 0x161   : > { %v2409_v8 = vmax.f32 %v2393_v40, 0.0  ;;  %v3264_v23 = vpop.f32.mrf.mxu1 }
 0x162   : > { %v2412_v42 = vmax.f32 %v2396_v53, 0.0  ;;  %v2395_v46 = vadd.f32 %v2379_v52, %v2363_v56  ;;  %v2366_v31 = vadd.f32 %v4001_v39, %v2343_v38  ;;  %v2342_v50 = vadd.f32 %v2311_v10, %v2113_v16  ;;  %v2321_v58 = vpop.f32.mrf.mxu0 }
 0x163   : > { %2425 = vst [vmem:[%s4027_s27 + $0x40] sm:$0xff] %v2409_v8  ;;  %v2116_v33 = vadd.f32 %v3264_v23, %v1887_v19  ;;  %v2092_v35 = vpop.f32.mrf.mxu1 }
 0x164   : > { %2428 = vst [vmem:[%s4027_s27 + $0x58] sm:$0xff] %v2412_v42  ;;  %v2411_v21 = vmax.f32 %v2395_v46, 0.0  ;;  %v2398_v28 = vadd.f32 %v2382_v17, %v2366_v31  ;;  %v2365_v20 = vadd.f32 %v4001_v39, %v2342_v50  ;;  %v2115_v54 = vadd.f32 %v2092_v35, %v1886_v55 }
 0x165   : > { %v2345_v32 = vadd.f32 %v3290_v22, %v2116_v33 }
 0x166   : > { %2427 = vst [vmem:[%s4027_s27 + $0x50] sm:$0xff] %v2411_v21  ;;  %v2414_v41 = vmax.f32 %v2398_v28, 0.0  ;;  %v2397_v59 = vadd.f32 %v2381_v27, %v2365_v20  ;;  %v2344_v0 = vadd.f32 %v2321_v58, %v2115_v54 }
 0x167   : > { %v2368_v1 = vadd.f32 %v4001_v39, %v2345_v32 }
 0x168   : > { %2430 = vst [vmem:[%s4027_s27 + $0x68] sm:$0xff] %v2414_v41  ;;  %v2413_v37 = vmax.f32 %v2397_v59, 0.0  ;;  %v2367_v51 = vadd.f32 %v4001_v39, %v2344_v0 }
 0x169   : > { %v2400_v62 = vadd.f32 %v2384_v63, %v2368_v1 }
 0x16a   : > { %2429 = vst [vmem:[%s4027_s27 + $0x60] sm:$0xff] %v2413_v37  ;;  %v2399_v3 = vadd.f32 %v2383_v18, %v2367_v51 }
 0x16b   : > { %v2416_v2 = vmax.f32 %v2400_v62, 0.0 }
 0x16c   : > { %v2415_v47 = vmax.f32 %v2399_v3, 0.0 }
 0x16d   : > { %2432 = vst [vmem:[%s4027_s27 + $0x78] sm:$0xff] %v2416_v2 }
 0x16e   : > { %2431 = vst [vmem:[%s4027_s27 + $0x70] sm:$0xff] %v2415_v47 }
 0x16f PF: > { %s14_s17 = sadd.s32 1, %s3340_s17   ;;  %s4152_s15 = smov %s3336_s16 }
 0x170   : > { %p11_p5 = scmp.ge.s32.totalorder %s14_s17, 4   ;;  %s4153_s16 = smov %s4155_s18 }
 0x172   :  { %13 = sbr.rel (!%p11_p5) target bundleno = 2 (0x2), region = 92 }

</bundles_post_ra>
